<compile_context>
chip_gen: v5e
topology: v5e:2x2
jax: 0.10.0
libtpu: 0.0.40
codegen_flags: <defaults>
</compile_context>

<pallas_src>
import functools

import jax
import jax.numpy as jnp
from jax.experimental import pallas as pl
from jax.experimental.pallas import tpu as pltpu

EPS = 1e-5
LANES = 128


def _round_up(x, m):
    return ((x + m - 1) // m) * m


def _pad_last(a, c):
    pad = c - a.shape[-1]
    if pad == 0:
        return a
    return jnp.pad(a, [(0, 0)] * (a.ndim - 1) + [(0, pad)])


def _bands(img, th):
    # (N, H+2, W+2, C) zero-padded image -> (N, NB, th+2, W+2, C) overlapping row bands.
    n, hp, wp, c = img.shape
    nb = (hp - 2) // th
    return jnp.stack([img[:, i * th:i * th + th + 2] for i in range(nb)], axis=1)


# ----------------------------- Pallas kernels ------------------------------

def _upconv_kernel(x_ref, w_ref, b_ref, o_ref):
    # ConvTranspose2d(k=2, s=2) for one input image row: a single matmul; the two
    # output rows (dy=0/1) are stored as (W, 2*C_out) slabs whose column order is
    # (dx, c_out), so the wrapper's reshape realizes the dx interleave for free.
    x_row = x_ref[0, 0]                                          # (W, Cin)
    y = jnp.dot(x_row, w_ref[...], preferred_element_type=jnp.float32) + b_ref[...]
    c2 = o_ref.shape[3]                                          # 2 * c_out
    o_ref[0, 0] = y[:, :c2]                                      # dy = 0 -> out row 2h
    o_ref[0, 1] = y[:, c2:]                                      # dy = 1 -> out row 2h+1


def _conv1_kernel(cat_ref, w_ref, b_ref, oh_ref, os_ref):
    # block1 3x3 conv over a halo'd (TH+2, W+2, Ccat) band of the concat input:
    # 9 accumulated MXU matmuls (no im2col) + per-band BN1 partial statistics.
    th, w2, cp = oh_ref.shape[1], oh_ref.shape[2], oh_ref.shape[3]
    ccat = cat_ref.shape[4]
    acc = jnp.zeros((th * w2, cp), jnp.float32)
    for ky in range(3):
        for kx in range(3):
            patch = cat_ref[0, 0, ky:ky + th, kx:kx + w2, :].reshape(th * w2, ccat)
            acc = acc + jnp.dot(patch, w_ref[3 * ky + kx],
                                preferred_element_type=jnp.float32)
    acc = acc + b_ref[...]
    oh_ref[0] = acc.reshape(th, w2, cp)
    os_ref[0, 0, 0:1, :] = jnp.sum(acc, axis=0, keepdims=True)
    os_ref[0, 0, 1:2, :] = jnp.sum(acc * acc, axis=0, keepdims=True)


def _bn1_conv2_kernel(h1_ref, ab1_ref, t_ref, wm_ref, bm_ref, w2_ref, b2_ref,
                      oh_ref, os_ref, act_ref, *, img_h):
    # Apply block1 BatchNorm (per-channel affine), time-emb modulation and ReLU to the
    # halo'd h1 band (zero padding restored via a validity mask), then block2's 3x3
    # conv as 9 matmuls, emitting BN2 partial statistics.
    th, w2, cp = oh_ref.shape[1], oh_ref.shape[2], oh_ref.shape[3]
    hp, wp = h1_ref.shape[2], h1_ref.shape[3]
    band_i = pl.program_id(1)

    # time MLP for this sample: ReLU -> Linear -> (scale, shift)   (tiny matmul)
    t2 = jnp.dot(jnp.maximum(t_ref[0], 0.0), wm_ref[...],
                 preferred_element_type=jnp.float32) + bm_ref[...]       # (1, 2*cp)
    scale = t2[:, :cp].reshape(1, 1, cp)
    shift = t2[:, cp:].reshape(1, 1, cp)
    a1 = ab1_ref[0:1, :].reshape(1, 1, cp)
    b1 = ab1_ref[1:2, :].reshape(1, 1, cp)

    h = h1_ref[0, 0] * a1 + b1                                           # BN1 apply
    h = h * (scale + 1.0) + shift                                        # modulation
    h = jnp.maximum(h, 0.0)                                              # ReLU
    # the halo band was zero-padded *before* BN: re-zero out-of-image positions so
    # block2's conv sees proper zero padding.
    rows = jax.lax.broadcasted_iota(jnp.int32, (hp, wp, cp), 0) + band_i * th - 1
    cols = jax.lax.broadcasted_iota(jnp.int32, (hp, wp, cp), 1) - 1
    valid = (rows >= 0) & (rows < img_h) & (cols >= 0) & (cols < w2)
    act_ref[...] = jnp.where(valid, h, 0.0)

    acc = jnp.zeros((th * w2, cp), jnp.float32)
    for ky in range(3):
        for kx in range(3):
            patch = act_ref[ky:ky + th, kx:kx + w2, :].reshape(th * w2, cp)
            acc = acc + jnp.dot(patch, w2_ref[3 * ky + kx],
                                preferred_element_type=jnp.float32)
    acc = acc + b2_ref[...]
    oh_ref[0] = acc.reshape(th, w2, cp)
    os_ref[0, 0, 0:1, :] = jnp.sum(acc, axis=0, keepdims=True)
    os_ref[0, 0, 1:2, :] = jnp.sum(acc * acc, axis=0, keepdims=True)


def _bn2_res_kernel(h2_ref, ab2_ref, cat_ref, wr_ref, br_ref, o_ref):
    # BN2 affine + ReLU fused with the 1x1 residual conv on the same row tile;
    # lane-dense (128-channel-padded) output slab.
    th, w2, cp = o_ref.shape[1], o_ref.shape[2], o_ref.shape[3]
    ccat = cat_ref.shape[3]
    a2 = ab2_ref[0:1, :].reshape(1, 1, cp)
    b2 = ab2_ref[1:2, :].reshape(1, 1, cp)
    h = jnp.maximum(h2_ref[0] * a2 + b2, 0.0)
    res = jnp.dot(cat_ref[0].reshape(th * w2, ccat), wr_ref[...],
                  preferred_element_type=jnp.float32) + br_ref[...]
    o_ref[0] = h + res.reshape(th, w2, cp)


# ------------------------------- forward -----------------------------------

def unet_up_block_forward(params, x_nchw, bridge_nchw, time_emb, *, tile_h=8):
    f32 = jnp.float32
    n, c_in, h, w = x_nchw.shape
    c_out = params["b_up"].shape[0]
    hh, ww = 2 * h, 2 * w
    cp = _round_up(c_out, LANES)                  # lane-dense channel padding
    t_dim = time_emb.shape[1]
    th = tile_h if hh % tile_h == 0 else hh       # row-band height (divides output H)
    nb = hh // th
    wp = ww + 2
    par2 = pltpu.CompilerParams(dimension_semantics=("parallel", "parallel"))

    # ---- self.up : ConvTranspose2d(in, out, k=2, s=2); interleave fused into layout ----
    x_nhwc = jnp.transpose(x_nchw, (0, 2, 3, 1)).astype(f32)
    w_up = jnp.transpose(params["w_up"], (0, 2, 3, 1)).reshape(c_in, 4 * c_out).astype(f32)
    b_up = jnp.tile(params["b_up"], 4).reshape(1, 4 * c_out).astype(f32)
    u = pl.pallas_call(
        _upconv_kernel,
        grid=(n, h),
        in_specs=[pl.BlockSpec((1, 1, w, c_in), lambda ni, hi: (ni, hi, 0, 0)),
                  pl.BlockSpec((c_in, 4 * c_out), lambda ni, hi: (0, 0)),
                  pl.BlockSpec((1, 4 * c_out), lambda ni, hi: (0, 0))],
        out_specs=pl.BlockSpec((1, 2, w, 2 * c_out), lambda ni, hi: (ni, hi, 0, 0)),
        out_shape=jax.ShapeDtypeStruct((n, hh, w, 2 * c_out), f32),
        compiler_params=par2,
    )(x_nhwc, w_up, b_up)
    up = u.reshape(n, hh, ww, c_out)              # free adjacent-dim merge == stride-2 interleave

    # ---- center_crop(bridge) + channel concat (pure layout glue) ----
    bridge = jnp.transpose(bridge_nchw, (0, 2, 3, 1)).astype(f32)
    dy = (bridge.shape[1] - hh) // 2
    dx = (bridge.shape[2] - ww) // 2
    cat = jnp.concatenate([up, bridge[:, dy:dy + hh, dx:dx + ww, :]], axis=-1)
    c_cat = cat.shape[-1]

    # ---- pass A: block1 conv3x3 on halo'd bands + BN1 partial stats ----
    cat_bands = _bands(jnp.pad(cat, ((0, 0), (1, 1), (1, 1), (0, 0))), th)
    w1 = _pad_last(jnp.transpose(params["w1"], (2, 3, 1, 0)).reshape(9, c_cat, c_out), cp)
    b1 = _pad_last(params["b1"].reshape(1, c_out), cp)
    h1_raw, st1 = pl.pallas_call(
        _conv1_kernel,
        grid=(n, nb),
        in_specs=[pl.BlockSpec((1, 1, th + 2, wp, c_cat), lambda ni, bi: (ni, bi, 0, 0, 0)),
                  pl.BlockSpec((9, c_cat, cp), lambda ni, bi: (0, 0, 0)),
                  pl.BlockSpec((1, cp), lambda ni, bi: (0, 0))],
        out_specs=(pl.BlockSpec((1, th, ww, cp), lambda ni, bi: (ni, bi, 0, 0)),
                   pl.BlockSpec((1, 1, 2, cp), lambda ni, bi: (ni, bi, 0, 0))),
        out_shape=(jax.ShapeDtypeStruct((n, hh, ww, cp), f32),
                   jax.ShapeDtypeStruct((n, nb, 2, cp), f32)),
        compiler_params=par2,
    )(cat_bands, w1, b1)

    # ---- BN1 finalize: global batch stats -> per-channel affine (O(C) glue) ----
    cnt = float(n * hh * ww)
    g1 = _pad_last(params["g1"].reshape(1, c_out), cp)[0]
    be1 = _pad_last(params["beta1"].reshape(1, c_out), cp)[0]
    mu1 = jnp.sum(st1[:, :, 0, :], axis=(0, 1)) / cnt
    var1 = jnp.sum(st1[:, :, 1, :], axis=(0, 1)) / cnt - mu1 * mu1
    a1 = g1 * jax.lax.rsqrt(var1 + EPS)
    ab1 = jnp.stack([a1, be1 - mu1 * a1], axis=0)                        # (2, cp)

    # ---- pass B: BN1-apply + (scale+1)*x+shift + ReLU + block2 conv3x3 + BN2 stats ----
    wm = jnp.transpose(params["w_mlp"]).astype(f32)                      # (t_dim, 2*c_out)
    wm_p = jnp.concatenate([_pad_last(wm[:, :c_out], cp),
                            _pad_last(wm[:, c_out:], cp)], axis=1)       # (t_dim, 2*cp)
    bm = params["b_mlp"].astype(f32)
    bm_p = jnp.concatenate([_pad_last(bm[:c_out].reshape(1, c_out), cp),
                            _pad_last(bm[c_out:].reshape(1, c_out), cp)], axis=1)
    temb = time_emb.reshape(n, 1, t_dim).astype(f32)
    w2 = _pad_last(jnp.transpose(params["w2"], (2, 3, 1, 0)).reshape(9, c_out, c_out), cp)
    w2 = jnp.pad(w2, ((0, 0), (0, cp - c_out), (0, 0)))                  # pad input channels too
    b2 = _pad_last(params["b2"].reshape(1, c_out), cp)
    h1_bands = _bands(jnp.pad(h1_raw, ((0, 0), (1, 1), (1, 1), (0, 0))), th)
    h2_raw, st2 = pl.pallas_call(
        functools.partial(_bn1_conv2_kernel, img_h=hh),
        grid=(n, nb),
        in_specs=[pl.BlockSpec((1, 1, th + 2, wp, cp), lambda ni, bi: (ni, bi, 0, 0, 0)),
                  pl.BlockSpec((2, cp), lambda ni, bi: (0, 0)),
                  pl.BlockSpec((1, 1, t_dim), lambda ni, bi: (ni, 0, 0)),
                  pl.BlockSpec((t_dim, 2 * cp), lambda ni, bi: (0, 0)),
                  pl.BlockSpec((1, 2 * cp), lambda ni, bi: (0, 0)),
                  pl.BlockSpec((9, cp, cp), lambda ni, bi: (0, 0, 0)),
                  pl.BlockSpec((1, cp), lambda ni, bi: (0, 0))],
        out_specs=(pl.BlockSpec((1, th, ww, cp), lambda ni, bi: (ni, bi, 0, 0)),
                   pl.BlockSpec((1, 1, 2, cp), lambda ni, bi: (ni, bi, 0, 0))),
        out_shape=(jax.ShapeDtypeStruct((n, hh, ww, cp), f32),
                   jax.ShapeDtypeStruct((n, nb, 2, cp), f32)),
        scratch_shapes=[pltpu.VMEM((th + 2, wp, cp), jnp.float32)],
        compiler_params=par2,
    )(h1_bands, ab1, temb, wm_p, bm_p, w2, b2)

    # ---- BN2 finalize ----
    g2 = _pad_last(params["g2"].reshape(1, c_out), cp)[0]
    be2 = _pad_last(params["beta2"].reshape(1, c_out), cp)[0]
    mu2 = jnp.sum(st2[:, :, 0, :], axis=(0, 1)) / cnt
    var2 = jnp.sum(st2[:, :, 1, :], axis=(0, 1)) / cnt - mu2 * mu2
    a2 = g2 * jax.lax.rsqrt(var2 + EPS)
    ab2 = jnp.stack([a2, be2 - mu2 * a2], axis=0)                        # (2, cp)

    # ---- pass C: BN2-apply + ReLU + 1x1 residual conv + add (lane-dense output) ----
    wr = _pad_last(jnp.transpose(params["w_res"][:, :, 0, 0]).astype(f32), cp)   # (c_cat, cp)
    br = _pad_last(params["b_res"].reshape(1, c_out), cp)
    out_p = pl.pallas_call(
        _bn2_res_kernel,
        grid=(n, nb),
        in_specs=[pl.BlockSpec((1, th, ww, cp), lambda ni, bi: (ni, bi, 0, 0)),
                  pl.BlockSpec((2, cp), lambda ni, bi: (0, 0)),
                  pl.BlockSpec((1, th, ww, c_cat), lambda ni, bi: (ni, bi, 0, 0)),
                  pl.BlockSpec((c_cat, cp), lambda ni, bi: (0, 0)),
                  pl.BlockSpec((1, cp), lambda ni, bi: (0, 0))],
        out_specs=pl.BlockSpec((1, th, ww, cp), lambda ni, bi: (ni, bi, 0, 0)),
        out_shape=jax.ShapeDtypeStruct((n, hh, ww, cp), f32),
        compiler_params=par2,
    )(h2_raw, ab2, cat, wr, br)

    return jnp.transpose(out_p[..., :c_out], (0, 3, 1, 2))               # crop pad, back to NCHW


# -------------------- pure-JAX reference (PyTorch semantics) -----------------

def _reference_forward(params, x, bridge, time_emb):
    hp = jax.lax.Precision.HIGHEST
    n, c_in, h, w = x.shape
    c_out = params["b_up"].shape[0]
    hh, ww = 2 * h, 2 * w

    r = jnp.einsum('nchw,copq->nohpwq', x, params["w_up"], precision=hp)
    up = r.reshape(n, c_out, hh, ww) + params["b_up"][None, :, None, None]
    dy = (bridge.shape[2] - hh) // 2
    dx = (bridge.shape[3] - ww) // 2
    cat = jnp.concatenate([up, bridge[:, :, dy:dy + hh, dx:dx + ww]], axis=1)

    t2 = jnp.maximum(time_emb, 0.0) @ params["w_mlp"].T + params["b_mlp"]
    scale, shift = t2[:, :c_out], t2[:, c_out:]

    def conv3x3(z, wgt, b):
        zp = jnp.pad(z, ((0, 0), (0, 0), (1, 1), (1, 1)))
        out = b[None, :, None, None]
        for ky in range(3):
            for kx in range(3):
                out = out + jnp.einsum('nchw,oc->nohw',
                                       zp[:, :, ky:ky + hh, kx:kx + ww],
                                       wgt[:, :, ky, kx], precision=hp)
        return out

    def bn(z, g, be):
        mu = jnp.mean(z, axis=(0, 2, 3), keepdims=True)
        var = jnp.mean(jnp.square(z - mu), axis=(0, 2, 3), keepdims=True)
        return (z - mu) / jnp.sqrt(var + EPS) * g[None, :, None, None] + be[None, :, None, None]

    h1 = bn(conv3x3(cat, params["w1"], params["b1"]), params["g1"], params["beta1"])
    h1 = jnp.maximum(h1 * (scale[:, :, None, None] + 1.0) + shift[:, :, None, None], 0.0)
    h2 = jnp.maximum(bn(conv3x3(h1, params["w2"], params["b2"]), params["g2"], params["beta2"]), 0.0)
    res = jnp.einsum('nchw,oc->nohw', cat, params["w_res"][:, :, 0, 0], precision=hp) \
        + params["b_res"][None, :, None, None]
    return h2 + res


# ---------------------------------- main ------------------------------------

if __name__ == "__main__":
    in_size, out_size, time_dim = 16, 8, 16
    n, h, w = 2, 8, 8                      # x spatial 8x8 -> upsampled to 16x16

    key = jax.random.PRNGKey(0)
    ks = jax.random.split(key, 20)
    f32 = jnp.float32

    def nrm(k, shape, s=0.2):
        return (s * jax.random.normal(k, shape)).astype(f32)

    params = {
        "w_up":  nrm(ks[0], (in_size, out_size, 2, 2)),        # ConvTranspose2d weight
        "b_up":  nrm(ks[1], (out_size,)),
        "w_mlp": nrm(ks[2], (2 * out_size, time_dim)),         # nn.Linear weight (torch layout)
        "b_mlp": nrm(ks[3], (2 * out_size,)),
        "w1":    nrm(ks[4], (out_size, in_size, 3, 3)),        # block1 Conv2d
        "b1":    nrm(ks[5], (out_size,)),
        "g1":    (1.0 + nrm(ks[6], (out_size,), 0.1)),         # BatchNorm2d gamma
        "beta1": nrm(ks[7], (out_size,), 0.1),                 # BatchNorm2d beta
        "w2":    nrm(ks[8], (out_size, out_size, 3, 3)),       # block2 Conv2d
        "b2":    nrm(ks[9], (out_size,)),
        "g2":    (1.0 + nrm(ks[10], (out_size,), 0.1)),
        "beta2": nrm(ks[11], (out_size,), 0.1),
        "w_res": nrm(ks[12], (out_size, in_size, 1, 1)),       # res_conv (1x1)
        "b_res": nrm(ks[13], (out_size,)),
    }

    x = jax.random.normal(ks[14], (n, in_size, h, w), dtype=f32)
    bridge = jax.random.normal(ks[15], (n, in_size - out_size, 2 * h + 2, 2 * w + 2), dtype=f32)
    time_emb = jax.random.normal(ks[16], (n, time_dim), dtype=f32)

    fwd = jax.jit(unet_up_block_forward)
    out = jax.block_until_ready(fwd(params, x, bridge, time_emb))
    assert out.shape == (n, out_size, 2 * h, 2 * w), out.shape

    ref = jax.block_until_ready(_reference_forward(params, x, bridge, time_emb))
    err = float(jnp.max(jnp.abs(out - ref)))
    assert err < 2e-2, f"max abs err {err}"

    print("KERNEL_OK")
</pallas_src>

<mosaic_0001>
module attributes {stable_mosaic.version = 11 : i64} {
  func.func @_upconv_kernel(%arg0: i32, %arg1: i32, %arg2: memref<1x1x8x16xf32, #tpu.memory_space<vmem>>, %arg3: memref<16x32xf32, #tpu.memory_space<vmem>>, %arg4: memref<1x32xf32, #tpu.memory_space<vmem>>, %arg5: memref<1x2x8x16xf32, #tpu.memory_space<vmem>>) attributes {dimension_semantics = [#tpu.dimension_semantics<parallel>, #tpu.dimension_semantics<parallel>], iteration_bounds = array<i64: 2, 8>, scalar_prefetch = 0 : i64, scratch_operands = 0 : i64, tpu.core_type = #tpu.core_type<tc>, window_params = [{transform_indices = @transform_0, window_bounds = array<i64: 1, 1, 8, 16>}, {pipeline_mode = #tpu.pipeline_mode<synchronous>, transform_indices = @transform_1, window_bounds = array<i64: 16, 32>}, {pipeline_mode = #tpu.pipeline_mode<synchronous>, transform_indices = @transform_2, window_bounds = array<i64: 1, 32>}, {transform_indices = @transform_3, window_bounds = array<i64: 1, 2, 8, 16>}]} {
    %c0 = arith.constant 0 : index
    %c0_0 = arith.constant 0 : index
    %c0_1 = arith.constant 0 : index
    %c0_2 = arith.constant 0 : index
    %0 = vector.load %arg2[%c0, %c0_0, %c0_1, %c0_2] : memref<1x1x8x16xf32, #tpu.memory_space<vmem>>, vector<1x1x8x16xf32>
    %1 = vector.shape_cast %0 : vector<1x1x8x16xf32> to vector<8x16xf32>
    %c0_3 = arith.constant 0 : index
    %c0_4 = arith.constant 0 : index
    %2 = vector.load %arg3[%c0_3, %c0_4] : memref<16x32xf32, #tpu.memory_space<vmem>>, vector<16x32xf32>
    %cst = arith.constant dense<0.000000e+00> : vector<8x32xf32>
    %3 = tpu.matmul %1, %2, %cst {dimension_numbers = #tpu.dot_dimension_numbers<[1], [0], [0], [1], [0, 0, 1, 1], [], []>} : vector<8x16xf32>, vector<16x32xf32>, vector<8x32xf32> -> vector<8x32xf32>
    %c0_5 = arith.constant 0 : index
    %c0_6 = arith.constant 0 : index
    %4 = vector.load %arg4[%c0_5, %c0_6] : memref<1x32xf32, #tpu.memory_space<vmem>>, vector<1x32xf32>
    %5 = vector.broadcast %4 : vector<1x32xf32> to vector<8x32xf32>
    %6 = arith.addf %3, %5 : vector<8x32xf32>
    %7 = vector.extract_strided_slice %6 {offsets = [0, 0], sizes = [8, 16], strides = [1, 1]} : vector<8x32xf32> to vector<8x16xf32>
    %c0_7 = arith.constant 0 : index
    %c0_8 = arith.constant 0 : index
    %c0_9 = arith.constant 0 : index
    %c0_10 = arith.constant 0 : index
    %8 = vector.load %arg5[%c0_7, %c0_8, %c0_9, %c0_10] : memref<1x2x8x16xf32, #tpu.memory_space<vmem>>, vector<1x1x8x16xf32>
    %9 = vector.shape_cast %8 : vector<1x1x8x16xf32> to vector<8x16xf32>
    %10 = vector.shape_cast %7 : vector<8x16xf32> to vector<1x1x8x16xf32>
    tpu.vector_store %arg5[%c0_7, %c0_8, %c0_9, %c0_10], %10 {strides = array<i32>} : memref<1x2x8x16xf32, #tpu.memory_space<vmem>>, vector<1x1x8x16xf32>,
    %11 = vector.extract_strided_slice %6 {offsets = [0, 16], sizes = [8, 16], strides = [1, 1]} : vector<8x32xf32> to vector<8x16xf32>
    %c0_11 = arith.constant 0 : index
    %c1 = arith.constant 1 : index
    %c0_12 = arith.constant 0 : index
    %c0_13 = arith.constant 0 : index
    %12 = vector.load %arg5[%c0_11, %c1, %c0_12, %c0_13] : memref<1x2x8x16xf32, #tpu.memory_space<vmem>>, vector<1x1x8x16xf32>
    %13 = vector.shape_cast %12 : vector<1x1x8x16xf32> to vector<8x16xf32>
    %14 = vector.shape_cast %11 : vector<8x16xf32> to vector<1x1x8x16xf32>
    tpu.vector_store %arg5[%c0_11, %c1, %c0_12, %c0_13], %14 {strides = array<i32>} : memref<1x2x8x16xf32, #tpu.memory_space<vmem>>, vector<1x1x8x16xf32>,
    return
  }
  func.func @transform_0(%arg0: i32, %arg1: i32) -> (i32, i32, i32, i32) {
    %c0_i32 = arith.constant 0 : i32
    %c0_i32_0 = arith.constant 0 : i32
    %c0_i32_1 = arith.constant 0 : i32
    return %arg0, %arg1, %c0_i32, %c0_i32_0 : i32, i32, i32, i32
  }
  func.func @transform_1(%arg0: i32, %arg1: i32) -> (i32, i32) {
    %c0_i32 = arith.constant 0 : i32
    %c0_i32_0 = arith.constant 0 : i32
    %c0_i32_1 = arith.constant 0 : i32
    return %c0_i32, %c0_i32_0 : i32, i32
  }
  func.func @transform_2(%arg0: i32, %arg1: i32) -> (i32, i32) {
    %c0_i32 = arith.constant 0 : i32
    %c0_i32_0 = arith.constant 0 : i32
    %c0_i32_1 = arith.constant 0 : i32
    return %c0_i32, %c0_i32_0 : i32, i32
  }
  func.func @transform_3(%arg0: i32, %arg1: i32) -> (i32, i32, i32, i32) {
    %c0_i32 = arith.constant 0 : i32
    %c0_i32_0 = arith.constant 0 : i32
    %c0_i32_1 = arith.constant 0 : i32
    return %arg0, %arg1, %c0_i32, %c0_i32_0 : i32, i32, i32, i32
  }
}

module attributes {stable_mosaic.version = 11 : i64} {
  func.func @_conv1_kernel(%arg0: i32, %arg1: i32, %arg2: memref<1x1x10x18x16xf32, #tpu.memory_space<vmem>>, %arg3: memref<9x16x128xf32, #tpu.memory_space<vmem>>, %arg4: memref<1x128xf32, #tpu.memory_space<vmem>>, %arg5: memref<1x8x16x128xf32, #tpu.memory_space<vmem>>, %arg6: memref<1x1x2x128xf32, #tpu.memory_space<vmem>>) attributes {dimension_semantics = [#tpu.dimension_semantics<parallel>, #tpu.dimension_semantics<parallel>], iteration_bounds = array<i64: 2, 2>, scalar_prefetch = 0 : i64, scratch_operands = 0 : i64, tpu.core_type = #tpu.core_type<tc>, window_params = [{transform_indices = @transform_0, window_bounds = array<i64: 1, 1, 10, 18, 16>}, {pipeline_mode = #tpu.pipeline_mode<synchronous>, transform_indices = @transform_1, window_bounds = array<i64: 9, 16, 128>}, {pipeline_mode = #tpu.pipeline_mode<synchronous>, transform_indices = @transform_2, window_bounds = array<i64: 1, 128>}, {transform_indices = @transform_3, window_bounds = array<i64: 1, 8, 16, 128>}, {transform_indices = @transform_4, window_bounds = array<i64: 1, 1, 2, 128>}]} {
    %cst = arith.constant 0.000000e+00 : f32
    %0 = vector.broadcast %cst : f32 to vector<128x128xf32>
    %c0 = arith.constant 0 : index
    %c0_0 = arith.constant 0 : index
    %c0_1 = arith.constant 0 : index
    %c0_2 = arith.constant 0 : index
    %c0_3 = arith.constant 0 : index
    %1 = vector.load %arg2[%c0, %c0_0, %c0_1, %c0_2, %c0_3] : memref<1x1x10x18x16xf32, #tpu.memory_space<vmem>>, vector<1x1x8x16x16xf32>
    %2 = vector.shape_cast %1 : vector<1x1x8x16x16xf32> to vector<8x16x16xf32>
    %3 = vector.shape_cast %2 : vector<8x16x16xf32> to vector<128x16xf32>
    %c0_4 = arith.constant 0 : index
    %c0_5 = arith.constant 0 : index
    %c0_6 = arith.constant 0 : index
    %4 = vector.load %arg3[%c0_4, %c0_5, %c0_6] : memref<9x16x128xf32, #tpu.memory_space<vmem>>, vector<1x16x128xf32>
    %5 = vector.shape_cast %4 : vector<1x16x128xf32> to vector<16x128xf32>
    %cst_7 = arith.constant dense<0.000000e+00> : vector<128x128xf32>
    %6 = tpu.matmul %3, %5, %cst_7 {dimension_numbers = #tpu.dot_dimension_numbers<[1], [0], [0], [1], [0, 0, 1, 1], [], []>} : vector<128x16xf32>, vector<16x128xf32>, vector<128x128xf32> -> vector<128x128xf32>
    %7 = arith.addf %0, %6 : vector<128x128xf32>
    %c0_8 = arith.constant 0 : index
    %c0_9 = arith.constant 0 : index
    %c0_10 = arith.constant 0 : index
    %c1 = arith.constant 1 : index
    %c0_11 = arith.constant 0 : index
    %8 = vector.load %arg2[%c0_8, %c0_9, %c0_10, %c1, %c0_11] : memref<1x1x10x18x16xf32, #tpu.memory_space<vmem>>, vector<1x1x8x16x16xf32>
    %9 = vector.shape_cast %8 : vector<1x1x8x16x16xf32> to vector<8x16x16xf32>
    %10 = vector.shape_cast %9 : vector<8x16x16xf32> to vector<128x16xf32>
    %c1_12 = arith.constant 1 : index
    %c0_13 = arith.constant 0 : index
    %c0_14 = arith.constant 0 : index
    %11 = vector.load %arg3[%c1_12, %c0_13, %c0_14] : memref<9x16x128xf32, #tpu.memory_space<vmem>>, vector<1x16x128xf32>
    %12 = vector.shape_cast %11 : vector<1x16x128xf32> to vector<16x128xf32>
    %cst_15 = arith.constant dense<0.000000e+00> : vector<128x128xf32>
    %13 = tpu.matmul %10, %12, %cst_15 {dimension_numbers = #tpu.dot_dimension_numbers<[1], [0], [0], [1], [0, 0, 1, 1], [], []>} : vector<128x16xf32>, vector<16x128xf32>, vector<128x128xf32> -> vector<128x128xf32>
    %14 = arith.addf %7, %13 : vector<128x128xf32>
    %c0_16 = arith.constant 0 : index
    %c0_17 = arith.constant 0 : index
    %c0_18 = arith.constant 0 : index
    %c2 = arith.constant 2 : index
    %c0_19 = arith.constant 0 : index
    %15 = vector.load %arg2[%c0_16, %c0_17, %c0_18, %c2, %c0_19] : memref<1x1x10x18x16xf32, #tpu.memory_space<vmem>>, vector<1x1x8x16x16xf32>
    %16 = vector.shape_cast %15 : vector<1x1x8x16x16xf32> to vector<8x16x16xf32>
    %17 = vector.shape_cast %16 : vector<8x16x16xf32> to vector<128x16xf32>
    %c2_20 = arith.constant 2 : index
    %c0_21 = arith.constant 0 : index
    %c0_22 = arith.constant 0 : index
    %18 = vector.load %arg3[%c2_20, %c0_21, %c0_22] : memref<9x16x128xf32, #tpu.memory_space<vmem>>, vector<1x16x128xf32>
    %19 = vector.shape_cast %18 : vector<1x16x128xf32> to vector<16x128xf32>
    %cst_23 = arith.constant dense<0.000000e+00> : vector<128x128xf32>
    %20 = tpu.matmul %17, %19, %cst_23 {dimension_numbers = #tpu.dot_dimension_numbers<[1], [0], [0], [1], [0, 0, 1, 1], [], []>} : vector<128x16xf32>, vector<16x128xf32>, vector<128x128xf32> -> vector<128x128xf32>
    %21 = arith.addf %14, %20 : vector<128x128xf32>
    %c0_24 = arith.constant 0 : index
    %c0_25 = arith.constant 0 : index
    %c1_26 = arith.constant 1 : index
    %c0_27 = arith.constant 0 : index
    %c0_28 = arith.constant 0 : index
    %22 = vector.load %arg2[%c0_24, %c0_25, %c1_26, %c0_27, %c0_28] : memref<1x1x10x18x16xf32, #tpu.memory_space<vmem>>, vector<1x1x8x16x16xf32>
    %23 = vector.shape_cast %22 : vector<1x1x8x16x16xf32> to vector<8x16x16xf32>
    %24 = vector.shape_cast %23 : vector<8x16x16xf32> to vector<128x16xf32>
    %c3 = arith.constant 3 : index
    %c0_29 = arith.constant 0 : index
    %c0_30 = arith.constant 0 : index
    %25 = vector.load %arg3[%c3, %c0_29, %c0_30] : memref<9x16x128xf32, #tpu.memory_space<vmem>>, vector<1x16x128xf32>
    %26 = vector.shape_cast %25 : vector<1x16x128xf32> to vector<16x128xf32>
    %cst_31 = arith.constant dense<0.000000e+00> : vector<128x128xf32>
    %27 = tpu.matmul %24, %26, %cst_31 {dimension_numbers = #tpu.dot_dimension_numbers<[1], [0], [0], [1], [0, 0, 1, 1], [], []>} : vector<128x16xf32>, vector<16x128xf32>, vector<128x128xf32> -> vector<128x128xf32>
    %28 = arith.addf %21, %27 : vector<128x128xf32>
    %c0_32 = arith.constant 0 : index
    %c0_33 = arith.constant 0 : index
    %c1_34 = arith.constant 1 : index
    %c1_35 = arith.constant 1 : index
    %c0_36 = arith.constant 0 : index
    %29 = vector.load %arg2[%c0_32, %c0_33, %c1_34, %c1_35, %c0_36] : memref<1x1x10x18x16xf32, #tpu.memory_space<vmem>>, vector<1x1x8x16x16xf32>
    %30 = vector.shape_cast %29 : vector<1x1x8x16x16xf32> to vector<8x16x16xf32>
    %31 = vector.shape_cast %30 : vector<8x16x16xf32> to vector<128x16xf32>
    %c4 = arith.constant 4 : index
    %c0_37 = arith.constant 0 : index
    %c0_38 = arith.constant 0 : index
    %32 = vector.load %arg3[%c4, %c0_37, %c0_38] : memref<9x16x128xf32, #tpu.memory_space<vmem>>, vector<1x16x128xf32>
    %33 = vector.shape_cast %32 : vector<1x16x128xf32> to vector<16x128xf32>
    %cst_39 = arith.constant dense<0.000000e+00> : vector<128x128xf32>
    %34 = tpu.matmul %31, %33, %cst_39 {dimension_numbers = #tpu.dot_dimension_numbers<[1], [0], [0], [1], [0, 0, 1, 1], [], []>} : vector<128x16xf32>, vector<16x128xf32>, vector<128x128xf32> -> vector<128x128xf32>
    %35 = arith.addf %28, %34 : vector<128x128xf32>
    %c0_40 = arith.constant 0 : index
    %c0_41 = arith.constant 0 : index
    %c1_42 = arith.constant 1 : index
    %c2_43 = arith.constant 2 : index
    %c0_44 = arith.constant 0 : index
    %36 = vector.load %arg2[%c0_40, %c0_41, %c1_42, %c2_43, %c0_44] : memref<1x1x10x18x16xf32, #tpu.memory_space<vmem>>, vector<1x1x8x16x16xf32>
    %37 = vector.shape_cast %36 : vector<1x1x8x16x16xf32> to vector<8x16x16xf32>
    %38 = vector.shape_cast %37 : vector<8x16x16xf32> to vector<128x16xf32>
    %c5 = arith.constant 5 : index
    %c0_45 = arith.constant 0 : index
    %c0_46 = arith.constant 0 : index
    %39 = vector.load %arg3[%c5, %c0_45, %c0_46] : memref<9x16x128xf32, #tpu.memory_space<vmem>>, vector<1x16x128xf32>
    %40 = vector.shape_cast %39 : vector<1x16x128xf32> to vector<16x128xf32>
    %cst_47 = arith.constant dense<0.000000e+00> : vector<128x128xf32>
    %41 = tpu.matmul %38, %40, %cst_47 {dimension_numbers = #tpu.dot_dimension_numbers<[1], [0], [0], [1], [0, 0, 1, 1], [], []>} : vector<128x16xf32>, vector<16x128xf32>, vector<128x128xf32> -> vector<128x128xf32>
    %42 = arith.addf %35, %41 : vector<128x128xf32>
    %c0_48 = arith.constant 0 : index
    %c0_49 = arith.constant 0 : index
    %c2_50 = arith.constant 2 : index
    %c0_51 = arith.constant 0 : index
    %c0_52 = arith.constant 0 : index
    %43 = vector.load %arg2[%c0_48, %c0_49, %c2_50, %c0_51, %c0_52] : memref<1x1x10x18x16xf32, #tpu.memory_space<vmem>>, vector<1x1x8x16x16xf32>
    %44 = vector.shape_cast %43 : vector<1x1x8x16x16xf32> to vector<8x16x16xf32>
    %45 = vector.shape_cast %44 : vector<8x16x16xf32> to vector<128x16xf32>
    %c6 = arith.constant 6 : index
    %c0_53 = arith.constant 0 : index
    %c0_54 = arith.constant 0 : index
    %46 = vector.load %arg3[%c6, %c0_53, %c0_54] : memref<9x16x128xf32, #tpu.memory_space<vmem>>, vector<1x16x128xf32>
    %47 = vector.shape_cast %46 : vector<1x16x128xf32> to vector<16x128xf32>
    %cst_55 = arith.constant dense<0.000000e+00> : vector<128x128xf32>
    %48 = tpu.matmul %45, %47, %cst_55 {dimension_numbers = #tpu.dot_dimension_numbers<[1], [0], [0], [1], [0, 0, 1, 1], [], []>} : vector<128x16xf32>, vector<16x128xf32>, vector<128x128xf32> -> vector<128x128xf32>
    %49 = arith.addf %42, %48 : vector<128x128xf32>
    %c0_56 = arith.constant 0 : index
    %c0_57 = arith.constant 0 : index
    %c2_58 = arith.constant 2 : index
    %c1_59 = arith.constant 1 : index
    %c0_60 = arith.constant 0 : index
    %50 = vector.load %arg2[%c0_56, %c0_57, %c2_58, %c1_59, %c0_60] : memref<1x1x10x18x16xf32, #tpu.memory_space<vmem>>, vector<1x1x8x16x16xf32>
    %51 = vector.shape_cast %50 : vector<1x1x8x16x16xf32> to vector<8x16x16xf32>
    %52 = vector.shape_cast %51 : vector<8x16x16xf32> to vector<128x16xf32>
    %c7 = arith.constant 7 : index
    %c0_61 = arith.constant 0 : index
    %c0_62 = arith.constant 0 : index
    %53 = vector.load %arg3[%c7, %c0_61, %c0_62] : memref<9x16x128xf32, #tpu.memory_space<vmem>>, vector<1x16x128xf32>
    %54 = vector.shape_cast %53 : vector<1x16x128xf32> to vector<16x128xf32>
    %cst_63 = arith.constant dense<0.000000e+00> : vector<128x128xf32>
    %55 = tpu.matmul %52, %54, %cst_63 {dimension_numbers = #tpu.dot_dimension_numbers<[1], [0], [0], [1], [0, 0, 1, 1], [], []>} : vector<128x16xf32>, vector<16x128xf32>, vector<128x128xf32> -> vector<128x128xf32>
    %56 = arith.addf %49, %55 : vector<128x128xf32>
    %c0_64 = arith.constant 0 : index
    %c0_65 = arith.constant 0 : index
    %c2_66 = arith.constant 2 : index
    %c2_67 = arith.constant 2 : index
    %c0_68 = arith.constant 0 : index
    %57 = vector.load %arg2[%c0_64, %c0_65, %c2_66, %c2_67, %c0_68] : memref<1x1x10x18x16xf32, #tpu.memory_space<vmem>>, vector<1x1x8x16x16xf32>
    %58 = vector.shape_cast %57 : vector<1x1x8x16x16xf32> to vector<8x16x16xf32>
    %59 = vector.shape_cast %58 : vector<8x16x16xf32> to vector<128x16xf32>
    %c8 = arith.constant 8 : index
    %c0_69 = arith.constant 0 : index
    %c0_70 = arith.constant 0 : index
    %60 = vector.load %arg3[%c8, %c0_69, %c0_70] : memref<9x16x128xf32, #tpu.memory_space<vmem>>, vector<1x16x128xf32>
    %61 = vector.shape_cast %60 : vector<1x16x128xf32> to vector<16x128xf32>
    %cst_71 = arith.constant dense<0.000000e+00> : vector<128x128xf32>
    %62 = tpu.matmul %59, %61, %cst_71 {dimension_numbers = #tpu.dot_dimension_numbers<[1], [0], [0], [1], [0, 0, 1, 1], [], []>} : vector<128x16xf32>, vector<16x128xf32>, vector<128x128xf32> -> vector<128x128xf32>
    %63 = arith.addf %56, %62 : vector<128x128xf32>
    %c0_72 = arith.constant 0 : index
    %c0_73 = arith.constant 0 : index
    %64 = vector.load %arg4[%c0_72, %c0_73] : memref<1x128xf32, #tpu.memory_space<vmem>>, vector<1x128xf32>
    %65 = vector.broadcast %64 : vector<1x128xf32> to vector<128x128xf32>
    %66 = arith.addf %63, %65 : vector<128x128xf32>
    %67 = vector.shape_cast %66 : vector<128x128xf32> to vector<8x16x128xf32>
    %c0_74 = arith.constant 0 : index
    %c0_75 = arith.constant 0 : index
    %c0_76 = arith.constant 0 : index
    %c0_77 = arith.constant 0 : index
    %68 = vector.load %arg5[%c0_74, %c0_75, %c0_76, %c0_77] : memref<1x8x16x128xf32, #tpu.memory_space<vmem>>, vector<1x8x16x128xf32>
    %69 = vector.shape_cast %68 : vector<1x8x16x128xf32> to vector<8x16x128xf32>
    %70 = vector.shape_cast %67 : vector<8x16x128xf32> to vector<1x8x16x128xf32>
    tpu.vector_store %arg5[%c0_74, %c0_75, %c0_76, %c0_77], %70 {strides = array<i32>} : memref<1x8x16x128xf32, #tpu.memory_space<vmem>>, vector<1x8x16x128xf32>,
    %cst_78 = arith.constant dense<0.000000e+00> : vector<128xf32>
    %71 = vector.multi_reduction <add>, %66, %cst_78 [0] : vector<128x128xf32> to vector<128xf32>
    %72 = vector.shape_cast %71 : vector<128xf32> to vector<1x128xf32>
    %c0_79 = arith.constant 0 : index
    %c0_80 = arith.constant 0 : index
    %c0_81 = arith.constant 0 : index
    %c0_82 = arith.constant 0 : index
    %73 = vector.load %arg6[%c0_79, %c0_80, %c0_81, %c0_82] : memref<1x1x2x128xf32, #tpu.memory_space<vmem>>, vector<1x1x1x128xf32>
    %74 = vector.shape_cast %73 : vector<1x1x1x128xf32> to vector<1x128xf32>
    %75 = vector.shape_cast %72 : vector<1x128xf32> to vector<1x1x1x128xf32>
    tpu.vector_store %arg6[%c0_79, %c0_80, %c0_81, %c0_82], %75 {strides = array<i32>} : memref<1x1x2x128xf32, #tpu.memory_space<vmem>>, vector<1x1x1x128xf32>,
    %76 = arith.mulf %66, %66 : vector<128x128xf32>
    %cst_83 = arith.constant dense<0.000000e+00> : vector<128xf32>
    %77 = vector.multi_reduction <add>, %76, %cst_83 [0] : vector<128x128xf32> to vector<128xf32>
    %78 = vector.shape_cast %77 : vector<128xf32> to vector<1x128xf32>
    %c0_84 = arith.constant 0 : index
    %c0_85 = arith.constant 0 : index
    %c1_86 = arith.constant 1 : index
    %c0_87 = arith.constant 0 : index
    %79 = vector.load %arg6[%c0_84, %c0_85, %c1_86, %c0_87] : memref<1x1x2x128xf32, #tpu.memory_space<vmem>>, vector<1x1x1x128xf32>
    %80 = vector.shape_cast %79 : vector<1x1x1x128xf32> to vector<1x128xf32>
    %81 = vector.shape_cast %78 : vector<1x128xf32> to vector<1x1x1x128xf32>
    tpu.vector_store %arg6[%c0_84, %c0_85, %c1_86, %c0_87], %81 {strides = array<i32>} : memref<1x1x2x128xf32, #tpu.memory_space<vmem>>, vector<1x1x1x128xf32>,
    return
  }
  func.func @transform_0(%arg0: i32, %arg1: i32) -> (i32, i32, i32, i32, i32) {
    %c0_i32 = arith.constant 0 : i32
    %c0_i32_0 = arith.constant 0 : i32
    %c0_i32_1 = arith.constant 0 : i32
    %c0_i32_2 = arith.constant 0 : i32
    return %arg0, %arg1, %c0_i32, %c0_i32_0, %c0_i32_1 : i32, i32, i32, i32, i32
  }
  func.func @transform_1(%arg0: i32, %arg1: i32) -> (i32, i32, i32) {
    %c0_i32 = arith.constant 0 : i32
    %c0_i32_0 = arith.constant 0 : i32
    %c0_i32_1 = arith.constant 0 : i32
    %c0_i32_2 = arith.constant 0 : i32
    return %c0_i32, %c0_i32_0, %c0_i32_1 : i32, i32, i32
  }
  func.func @transform_2(%arg0: i32, %arg1: i32) -> (i32, i32) {
    %c0_i32 = arith.constant 0 : i32
    %c0_i32_0 = arith.constant 0 : i32
    %c0_i32_1 = arith.constant 0 : i32
    return %c0_i32, %c0_i32_0 : i32, i32
  }
  func.func @transform_3(%arg0: i32, %arg1: i32) -> (i32, i32, i32, i32) {
    %c0_i32 = arith.constant 0 : i32
    %c0_i32_0 = arith.constant 0 : i32
    %c0_i32_1 = arith.constant 0 : i32
    return %arg0, %arg1, %c0_i32, %c0_i32_0 : i32, i32, i32, i32
  }
  func.func @transform_4(%arg0: i32, %arg1: i32) -> (i32, i32, i32, i32) {
    %c0_i32 = arith.constant 0 : i32
    %c0_i32_0 = arith.constant 0 : i32
    %c0_i32_1 = arith.constant 0 : i32
    return %arg0, %arg1, %c0_i32, %c0_i32_0 : i32, i32, i32, i32
  }
}

module attributes {stable_mosaic.version = 11 : i64} {
  func.func @_bn1_conv2_kernel(%arg0: i32, %arg1: i32, %arg2: memref<1x1x10x18x128xf32, #tpu.memory_space<vmem>>, %arg3: memref<2x128xf32, #tpu.memory_space<vmem>>, %arg4: memref<1x1x16xf32, #tpu.memory_space<vmem>>, %arg5: memref<16x256xf32, #tpu.memory_space<vmem>>, %arg6: memref<1x256xf32, #tpu.memory_space<vmem>>, %arg7: memref<9x128x128xf32, #tpu.memory_space<vmem>>, %arg8: memref<1x128xf32, #tpu.memory_space<vmem>>, %arg9: memref<1x8x16x128xf32, #tpu.memory_space<vmem>>, %arg10: memref<1x1x2x128xf32, #tpu.memory_space<vmem>>, %arg11: memref<10x18x128xf32, #tpu.memory_space<vmem>>) attributes {dimension_semantics = [#tpu.dimension_semantics<parallel>, #tpu.dimension_semantics<parallel>], iteration_bounds = array<i64: 2, 2>, scalar_prefetch = 0 : i64, scratch_operands = 1 : i64, tpu.core_type = #tpu.core_type<tc>, window_params = [{transform_indices = @transform_0, window_bounds = array<i64: 1, 1, 10, 18, 128>}, {pipeline_mode = #tpu.pipeline_mode<synchronous>, transform_indices = @transform_1, window_bounds = array<i64: 2, 128>}, {transform_indices = @transform_2, window_bounds = array<i64: 1, 1, 16>}, {pipeline_mode = #tpu.pipeline_mode<synchronous>, transform_indices = @transform_3, window_bounds = array<i64: 16, 256>}, {pipeline_mode = #tpu.pipeline_mode<synchronous>, transform_indices = @transform_4, window_bounds = array<i64: 1, 256>}, {pipeline_mode = #tpu.pipeline_mode<synchronous>, transform_indices = @transform_5, window_bounds = array<i64: 9, 128, 128>}, {pipeline_mode = #tpu.pipeline_mode<synchronous>, transform_indices = @transform_6, window_bounds = array<i64: 1, 128>}, {transform_indices = @transform_7, window_bounds = array<i64: 1, 8, 16, 128>}, {transform_indices = @transform_8, window_bounds = array<i64: 1, 1, 2, 128>}]} {
    %c0 = arith.constant 0 : index
    %c0_0 = arith.constant 0 : index
    %c0_1 = arith.constant 0 : index
    %0 = vector.load %arg4[%c0, %c0_0, %c0_1] : memref<1x1x16xf32, #tpu.memory_space<vmem>>, vector<1x1x16xf32>
    %1 = vector.shape_cast %0 : vector<1x1x16xf32> to vector<1x16xf32>
    %cst = arith.constant 0.000000e+00 : f32
    %2 = vector.broadcast %cst : f32 to vector<1x16xf32>
    %3 = arith.maximumf %1, %2 : vector<1x16xf32>
    %c0_2 = arith.constant 0 : index
    %c0_3 = arith.constant 0 : index
    %4 = vector.load %arg5[%c0_2, %c0_3] : memref<16x256xf32, #tpu.memory_space<vmem>>, vector<16x256xf32>
    %cst_4 = arith.constant dense<0.000000e+00> : vector<1x256xf32>
    %5 = tpu.matmul %3, %4, %cst_4 {dimension_numbers = #tpu.dot_dimension_numbers<[1], [0], [0], [1], [0, 0, 1, 1], [], []>} : vector<1x16xf32>, vector<16x256xf32>, vector<1x256xf32> -> vector<1x256xf32>
    %c0_5 = arith.constant 0 : index
    %c0_6 = arith.constant 0 : index
    %6 = vector.load %arg6[%c0_5, %c0_6] : memref<1x256xf32, #tpu.memory_space<vmem>>, vector<1x256xf32>
    %7 = arith.addf %5, %6 : vector<1x256xf32>
    %8 = vector.extract_strided_slice %7 {offsets = [0, 0], sizes = [1, 128], strides = [1, 1]} : vector<1x256xf32> to vector<1x128xf32>
    %9 = vector.shape_cast %8 : vector<1x128xf32> to vector<1x1x128xf32>
    %10 = vector.extract_strided_slice %7 {offsets = [0, 128], sizes = [1, 128], strides = [1, 1]} : vector<1x256xf32> to vector<1x128xf32>
    %11 = vector.shape_cast %10 : vector<1x128xf32> to vector<1x1x128xf32>
    %c0_7 = arith.constant 0 : index
    %c0_8 = arith.constant 0 : index
    %12 = vector.load %arg3[%c0_7, %c0_8] : memref<2x128xf32, #tpu.memory_space<vmem>>, vector<1x128xf32>
    %13 = vector.shape_cast %12 : vector<1x128xf32> to vector<1x1x128xf32>
    %c1 = arith.constant 1 : index
    %c0_9 = arith.constant 0 : index
    %14 = vector.load %arg3[%c1, %c0_9] : memref<2x128xf32, #tpu.memory_space<vmem>>, vector<1x128xf32>
    %15 = vector.shape_cast %14 : vector<1x128xf32> to vector<1x1x128xf32>
    %c0_10 = arith.constant 0 : index
    %c0_11 = arith.constant 0 : index
    %c0_12 = arith.constant 0 : index
    %c0_13 = arith.constant 0 : index
    %c0_14 = arith.constant 0 : index
    %16 = vector.load %arg2[%c0_10, %c0_11, %c0_12, %c0_13, %c0_14] : memref<1x1x10x18x128xf32, #tpu.memory_space<vmem>>, vector<1x1x10x18x128xf32>
    %17 = vector.shape_cast %16 : vector<1x1x10x18x128xf32> to vector<10x18x128xf32>
    %18 = vector.broadcast %13 : vector<1x1x128xf32> to vector<10x18x128xf32>
    %19 = arith.mulf %17, %18 : vector<10x18x128xf32>
    %20 = vector.broadcast %15 : vector<1x1x128xf32> to vector<10x18x128xf32>
    %21 = arith.addf %19, %20 : vector<10x18x128xf32>
    %cst_15 = arith.constant 1.000000e+00 : f32
    %22 = vector.broadcast %cst_15 : f32 to vector<1x1x128xf32>
    %23 = arith.addf %9, %22 : vector<1x1x128xf32>
    %24 = vector.broadcast %23 : vector<1x1x128xf32> to vector<10x18x128xf32>
    %25 = arith.mulf %21, %24 : vector<10x18x128xf32>
    %26 = vector.broadcast %11 : vector<1x1x128xf32> to vector<10x18x128xf32>
    %27 = arith.addf %25, %26 : vector<10x18x128xf32>
    %cst_16 = arith.constant 0.000000e+00 : f32
    %28 = vector.broadcast %cst_16 : f32 to vector<10x18x128xf32>
    %29 = arith.maximumf %27, %28 : vector<10x18x128xf32>
    %30 = tpu.iota {dimensions = array<i32: 0>} : vector<10x18x128xi32>
    %c8_i32 = arith.constant 8 : i32
    %31 = arith.muli %arg1, %c8_i32 : i32
    %32 = vector.broadcast %31 : i32 to vector<10x18x128xi32>
    %33 = arith.addi %30, %32 : vector<10x18x128xi32>
    %c1_i32 = arith.constant 1 : i32
    %34 = vector.broadcast %c1_i32 : i32 to vector<10x18x128xi32>
    %35 = arith.subi %33, %34 : vector<10x18x128xi32>
    %36 = tpu.iota {dimensions = array<i32: 1>} : vector<10x18x128xi32>
    %c1_i32_17 = arith.constant 1 : i32
    %37 = vector.broadcast %c1_i32_17 : i32 to vector<10x18x128xi32>
    %38 = arith.subi %36, %37 : vector<10x18x128xi32>
    %c0_i32 = arith.constant 0 : i32
    %39 = vector.broadcast %c0_i32 : i32 to vector<10x18x128xi32>
    %40 = arith.cmpi sge, %35, %39 : vector<10x18x128xi32>
    %c16_i32 = arith.constant 16 : i32
    %41 = vector.broadcast %c16_i32 : i32 to vector<10x18x128xi32>
    %42 = arith.cmpi slt, %35, %41 : vector<10x18x128xi32>
    %43 = arith.andi %40, %42 : vector<10x18x128xi1>
    %c0_i32_18 = arith.constant 0 : i32
    %44 = vector.broadcast %c0_i32_18 : i32 to vector<10x18x128xi32>
    %45 = arith.cmpi sge, %38, %44 : vector<10x18x128xi32>
    %46 = arith.andi %43, %45 : vector<10x18x128xi1>
    %c16_i32_19 = arith.constant 16 : i32
    %47 = vector.broadcast %c16_i32_19 : i32 to vector<10x18x128xi32>
    %48 = arith.cmpi slt, %38, %47 : vector<10x18x128xi32>
    %49 = arith.andi %46, %48 : vector<10x18x128xi1>
    %cst_20 = arith.constant 0.000000e+00 : f32
    %50 = vector.broadcast %cst_20 : f32 to vector<10x18x128xf32>
    %51 = arith.select %49, %29, %50 : vector<10x18x128xi1>, vector<10x18x128xf32>
    %c0_21 = arith.constant 0 : index
    %c0_22 = arith.constant 0 : index
    %c0_23 = arith.constant 0 : index
    %52 = vector.load %arg11[%c0_21, %c0_22, %c0_23] : memref<10x18x128xf32, #tpu.memory_space<vmem>>, vector<10x18x128xf32>
    tpu.vector_store %arg11[%c0_21, %c0_22, %c0_23], %51 {strides = array<i32>} : memref<10x18x128xf32, #tpu.memory_space<vmem>>, vector<10x18x128xf32>,
    %cst_24 = arith.constant 0.000000e+00 : f32
    %53 = vector.broadcast %cst_24 : f32 to vector<128x128xf32>
    %c0_25 = arith.constant 0 : index
    %c0_26 = arith.constant 0 : index
    %c0_27 = arith.constant 0 : index
    %54 = vector.load %arg11[%c0_25, %c0_26, %c0_27] : memref<10x18x128xf32, #tpu.memory_space<vmem>>, vector<8x16x128xf32>
    %55 = vector.shape_cast %54 : vector<8x16x128xf32> to vector<128x128xf32>
    %c0_28 = arith.constant 0 : index
    %c0_29 = arith.constant 0 : index
    %c0_30 = arith.constant 0 : index
    %56 = vector.load %arg7[%c0_28, %c0_29, %c0_30] : memref<9x128x128xf32, #tpu.memory_space<vmem>>, vector<1x128x128xf32>
    %57 = vector.shape_cast %56 : vector<1x128x128xf32> to vector<128x128xf32>
    %cst_31 = arith.constant dense<0.000000e+00> : vector<128x128xf32>
    %58 = tpu.matmul %55, %57, %cst_31 {dimension_numbers = #tpu.dot_dimension_numbers<[1], [0], [0], [1], [0, 0, 1, 1], [], []>} : vector<128x128xf32>, vector<128x128xf32>, vector<128x128xf32> -> vector<128x128xf32>
    %59 = arith.addf %53, %58 : vector<128x128xf32>
    %c0_32 = arith.constant 0 : index
    %c1_33 = arith.constant 1 : index
    %c0_34 = arith.constant 0 : index
    %60 = vector.load %arg11[%c0_32, %c1_33, %c0_34] : memref<10x18x128xf32, #tpu.memory_space<vmem>>, vector<8x16x128xf32>
    %61 = vector.shape_cast %60 : vector<8x16x128xf32> to vector<128x128xf32>
    %c1_35 = arith.constant 1 : index
    %c0_36 = arith.constant 0 : index
    %c0_37 = arith.constant 0 : index
    %62 = vector.load %arg7[%c1_35, %c0_36, %c0_37] : memref<9x128x128xf32, #tpu.memory_space<vmem>>, vector<1x128x128xf32>
    %63 = vector.shape_cast %62 : vector<1x128x128xf32> to vector<128x128xf32>
    %cst_38 = arith.constant dense<0.000000e+00> : vector<128x128xf32>
    %64 = tpu.matmul %61, %63, %cst_38 {dimension_numbers = #tpu.dot_dimension_numbers<[1], [0], [0], [1], [0, 0, 1, 1], [], []>} : vector<128x128xf32>, vector<128x128xf32>, vector<128x128xf32> -> vector<128x128xf32>
    %65 = arith.addf %59, %64 : vector<128x128xf32>
    %c0_39 = arith.constant 0 : index
    %c2 = arith.constant 2 : index
    %c0_40 = arith.constant 0 : index
    %66 = vector.load %arg11[%c0_39, %c2, %c0_40] : memref<10x18x128xf32, #tpu.memory_space<vmem>>, vector<8x16x128xf32>
    %67 = vector.shape_cast %66 : vector<8x16x128xf32> to vector<128x128xf32>
    %c2_41 = arith.constant 2 : index
    %c0_42 = arith.constant 0 : index
    %c0_43 = arith.constant 0 : index
    %68 = vector.load %arg7[%c2_41, %c0_42, %c0_43] : memref<9x128x128xf32, #tpu.memory_space<vmem>>, vector<1x128x128xf32>
    %69 = vector.shape_cast %68 : vector<1x128x128xf32> to vector<128x128xf32>
    %cst_44 = arith.constant dense<0.000000e+00> : vector<128x128xf32>
    %70 = tpu.matmul %67, %69, %cst_44 {dimension_numbers = #tpu.dot_dimension_numbers<[1], [0], [0], [1], [0, 0, 1, 1], [], []>} : vector<128x128xf32>, vector<128x128xf32>, vector<128x128xf32> -> vector<128x128xf32>
    %71 = arith.addf %65, %70 : vector<128x128xf32>
    %c1_45 = arith.constant 1 : index
    %c0_46 = arith.constant 0 : index
    %c0_47 = arith.constant 0 : index
    %72 = vector.load %arg11[%c1_45, %c0_46, %c0_47] : memref<10x18x128xf32, #tpu.memory_space<vmem>>, vector<8x16x128xf32>
    %73 = vector.shape_cast %72 : vector<8x16x128xf32> to vector<128x128xf32>
    %c3 = arith.constant 3 : index
    %c0_48 = arith.constant 0 : index
    %c0_49 = arith.constant 0 : index
    %74 = vector.load %arg7[%c3, %c0_48, %c0_49] : memref<9x128x128xf32, #tpu.memory_space<vmem>>, vector<1x128x128xf32>
    %75 = vector.shape_cast %74 : vector<1x128x128xf32> to vector<128x128xf32>
    %cst_50 = arith.constant dense<0.000000e+00> : vector<128x128xf32>
    %76 = tpu.matmul %73, %75, %cst_50 {dimension_numbers = #tpu.dot_dimension_numbers<[1], [0], [0], [1], [0, 0, 1, 1], [], []>} : vector<128x128xf32>, vector<128x128xf32>, vector<128x128xf32> -> vector<128x128xf32>
    %77 = arith.addf %71, %76 : vector<128x128xf32>
    %c1_51 = arith.constant 1 : index
    %c1_52 = arith.constant 1 : index
    %c0_53 = arith.constant 0 : index
    %78 = vector.load %arg11[%c1_51, %c1_52, %c0_53] : memref<10x18x128xf32, #tpu.memory_space<vmem>>, vector<8x16x128xf32>
    %79 = vector.shape_cast %78 : vector<8x16x128xf32> to vector<128x128xf32>
    %c4 = arith.constant 4 : index
    %c0_54 = arith.constant 0 : index
    %c0_55 = arith.constant 0 : index
    %80 = vector.load %arg7[%c4, %c0_54, %c0_55] : memref<9x128x128xf32, #tpu.memory_space<vmem>>, vector<1x128x128xf32>
    %81 = vector.shape_cast %80 : vector<1x128x128xf32> to vector<128x128xf32>
    %cst_56 = arith.constant dense<0.000000e+00> : vector<128x128xf32>
    %82 = tpu.matmul %79, %81, %cst_56 {dimension_numbers = #tpu.dot_dimension_numbers<[1], [0], [0], [1], [0, 0, 1, 1], [], []>} : vector<128x128xf32>, vector<128x128xf32>, vector<128x128xf32> -> vector<128x128xf32>
    %83 = arith.addf %77, %82 : vector<128x128xf32>
    %c1_57 = arith.constant 1 : index
    %c2_58 = arith.constant 2 : index
    %c0_59 = arith.constant 0 : index
    %84 = vector.load %arg11[%c1_57, %c2_58, %c0_59] : memref<10x18x128xf32, #tpu.memory_space<vmem>>, vector<8x16x128xf32>
    %85 = vector.shape_cast %84 : vector<8x16x128xf32> to vector<128x128xf32>
    %c5 = arith.constant 5 : index
    %c0_60 = arith.constant 0 : index
    %c0_61 = arith.constant 0 : index
    %86 = vector.load %arg7[%c5, %c0_60, %c0_61] : memref<9x128x128xf32, #tpu.memory_space<vmem>>, vector<1x128x128xf32>
    %87 = vector.shape_cast %86 : vector<1x128x128xf32> to vector<128x128xf32>
    %cst_62 = arith.constant dense<0.000000e+00> : vector<128x128xf32>
    %88 = tpu.matmul %85, %87, %cst_62 {dimension_numbers = #tpu.dot_dimension_numbers<[1], [0], [0], [1], [0, 0, 1, 1], [], []>} : vector<128x128xf32>, vector<128x128xf32>, vector<128x128xf32> -> vector<128x128xf32>
    %89 = arith.addf %83, %88 : vector<128x128xf32>
    %c2_63 = arith.constant 2 : index
    %c0_64 = arith.constant 0 : index
    %c0_65 = arith.constant 0 : index
    %90 = vector.load %arg11[%c2_63, %c0_64, %c0_65] : memref<10x18x128xf32, #tpu.memory_space<vmem>>, vector<8x16x128xf32>
    %91 = vector.shape_cast %90 : vector<8x16x128xf32> to vector<128x128xf32>
    %c6 = arith.constant 6 : index
    %c0_66 = arith.constant 0 : index
    %c0_67 = arith.constant 0 : index
    %92 = vector.load %arg7[%c6, %c0_66, %c0_67] : memref<9x128x128xf32, #tpu.memory_space<vmem>>, vector<1x128x128xf32>
    %93 = vector.shape_cast %92 : vector<1x128x128xf32> to vector<128x128xf32>
    %cst_68 = arith.constant dense<0.000000e+00> : vector<128x128xf32>
    %94 = tpu.matmul %91, %93, %cst_68 {dimension_numbers = #tpu.dot_dimension_numbers<[1], [0], [0], [1], [0, 0, 1, 1], [], []>} : vector<128x128xf32>, vector<128x128xf32>, vector<128x128xf32> -> vector<128x128xf32>
    %95 = arith.addf %89, %94 : vector<128x128xf32>
    %c2_69 = arith.constant 2 : index
    %c1_70 = arith.constant 1 : index
    %c0_71 = arith.constant 0 : index
    %96 = vector.load %arg11[%c2_69, %c1_70, %c0_71] : memref<10x18x128xf32, #tpu.memory_space<vmem>>, vector<8x16x128xf32>
    %97 = vector.shape_cast %96 : vector<8x16x128xf32> to vector<128x128xf32>
    %c7 = arith.constant 7 : index
    %c0_72 = arith.constant 0 : index
    %c0_73 = arith.constant 0 : index
    %98 = vector.load %arg7[%c7, %c0_72, %c0_73] : memref<9x128x128xf32, #tpu.memory_space<vmem>>, vector<1x128x128xf32>
    %99 = vector.shape_cast %98 : vector<1x128x128xf32> to vector<128x128xf32>
    %cst_74 = arith.constant dense<0.000000e+00> : vector<128x128xf32>
    %100 = tpu.matmul %97, %99, %cst_74 {dimension_numbers = #tpu.dot_dimension_numbers<[1], [0], [0], [1], [0, 0, 1, 1], [], []>} : vector<128x128xf32>, vector<128x128xf32>, vector<128x128xf32> -> vector<128x128xf32>
    %101 = arith.addf %95, %100 : vector<128x128xf32>
    %c2_75 = arith.constant 2 : index
    %c2_76 = arith.constant 2 : index
    %c0_77 = arith.constant 0 : index
    %102 = vector.load %arg11[%c2_75, %c2_76, %c0_77] : memref<10x18x128xf32, #tpu.memory_space<vmem>>, vector<8x16x128xf32>
    %103 = vector.shape_cast %102 : vector<8x16x128xf32> to vector<128x128xf32>
    %c8 = arith.constant 8 : index
    %c0_78 = arith.constant 0 : index
    %c0_79 = arith.constant 0 : index
    %104 = vector.load %arg7[%c8, %c0_78, %c0_79] : memref<9x128x128xf32, #tpu.memory_space<vmem>>, vector<1x128x128xf32>
    %105 = vector.shape_cast %104 : vector<1x128x128xf32> to vector<128x128xf32>
    %cst_80 = arith.constant dense<0.000000e+00> : vector<128x128xf32>
    %106 = tpu.matmul %103, %105, %cst_80 {dimension_numbers = #tpu.dot_dimension_numbers<[1], [0], [0], [1], [0, 0, 1, 1], [], []>} : vector<128x128xf32>, vector<128x128xf32>, vector<128x128xf32> -> vector<128x128xf32>
    %107 = arith.addf %101, %106 : vector<128x128xf32>
    %c0_81 = arith.constant 0 : index
    %c0_82 = arith.constant 0 : index
    %108 = vector.load %arg8[%c0_81, %c0_82] : memref<1x128xf32, #tpu.memory_space<vmem>>, vector<1x128xf32>
    %109 = vector.broadcast %108 : vector<1x128xf32> to vector<128x128xf32>
    %110 = arith.addf %107, %109 : vector<128x128xf32>
    %111 = vector.shape_cast %110 : vector<128x128xf32> to vector<8x16x128xf32>
    %c0_83 = arith.constant 0 : index
    %c0_84 = arith.constant 0 : index
    %c0_85 = arith.constant 0 : index
    %c0_86 = arith.constant 0 : index
    %112 = vector.load %arg9[%c0_83, %c0_84, %c0_85, %c0_86] : memref<1x8x16x128xf32, #tpu.memory_space<vmem>>, vector<1x8x16x128xf32>
    %113 = vector.shape_cast %112 : vector<1x8x16x128xf32> to vector<8x16x128xf32>
    %114 = vector.shape_cast %111 : vector<8x16x128xf32> to vector<1x8x16x128xf32>
    tpu.vector_store %arg9[%c0_83, %c0_84, %c0_85, %c0_86], %114 {strides = array<i32>} : memref<1x8x16x128xf32, #tpu.memory_space<vmem>>, vector<1x8x16x128xf32>,
    %cst_87 = arith.constant dense<0.000000e+00> : vector<128xf32>
    %115 = vector.multi_reduction <add>, %110, %cst_87 [0] : vector<128x128xf32> to vector<128xf32>
    %116 = vector.shape_cast %115 : vector<128xf32> to vector<1x128xf32>
    %c0_88 = arith.constant 0 : index
    %c0_89 = arith.constant 0 : index
    %c0_90 = arith.constant 0 : index
    %c0_91 = arith.constant 0 : index
    %117 = vector.load %arg10[%c0_88, %c0_89, %c0_90, %c0_91] : memref<1x1x2x128xf32, #tpu.memory_space<vmem>>, vector<1x1x1x128xf32>
    %118 = vector.shape_cast %117 : vector<1x1x1x128xf32> to vector<1x128xf32>
    %119 = vector.shape_cast %116 : vector<1x128xf32> to vector<1x1x1x128xf32>
    tpu.vector_store %arg10[%c0_88, %c0_89, %c0_90, %c0_91], %119 {strides = array<i32>} : memref<1x1x2x128xf32, #tpu.memory_space<vmem>>, vector<1x1x1x128xf32>,
    %120 = arith.mulf %110, %110 : vector<128x128xf32>
    %cst_92 = arith.constant dense<0.000000e+00> : vector<128xf32>
    %121 = vector.multi_reduction <add>, %120, %cst_92 [0] : vector<128x128xf32> to vector<128xf32>
    %122 = vector.shape_cast %121 : vector<128xf32> to vector<1x128xf32>
    %c0_93 = arith.constant 0 : index
    %c0_94 = arith.constant 0 : index
    %c1_95 = arith.constant 1 : index
    %c0_96 = arith.constant 0 : index
    %123 = vector.load %arg10[%c0_93, %c0_94, %c1_95, %c0_96] : memref<1x1x2x128xf32, #tpu.memory_space<vmem>>, vector<1x1x1x128xf32>
    %124 = vector.shape_cast %123 : vector<1x1x1x128xf32> to vector<1x128xf32>
    %125 = vector.shape_cast %122 : vector<1x128xf32> to vector<1x1x1x128xf32>
    tpu.vector_store %arg10[%c0_93, %c0_94, %c1_95, %c0_96], %125 {strides = array<i32>} : memref<1x1x2x128xf32, #tpu.memory_space<vmem>>, vector<1x1x1x128xf32>,
    return
  }
  func.func @transform_0(%arg0: i32, %arg1: i32) -> (i32, i32, i32, i32, i32) {
    %c0_i32 = arith.constant 0 : i32
    %c0_i32_0 = arith.constant 0 : i32
    %c0_i32_1 = arith.constant 0 : i32
    %c0_i32_2 = arith.constant 0 : i32
    return %arg0, %arg1, %c0_i32, %c0_i32_0, %c0_i32_1 : i32, i32, i32, i32, i32
  }
  func.func @transform_1(%arg0: i32, %arg1: i32) -> (i32, i32) {
    %c0_i32 = arith.constant 0 : i32
    %c0_i32_0 = arith.constant 0 : i32
    %c0_i32_1 = arith.constant 0 : i32
    return %c0_i32, %c0_i32_0 : i32, i32
  }
  func.func @transform_2(%arg0: i32, %arg1: i32) -> (i32, i32, i32) {
    %c0_i32 = arith.constant 0 : i32
    %c0_i32_0 = arith.constant 0 : i32
    %c0_i32_1 = arith.constant 0 : i32
    return %arg0, %c0_i32, %c0_i32_0 : i32, i32, i32
  }
  func.func @transform_3(%arg0: i32, %arg1: i32) -> (i32, i32) {
    %c0_i32 = arith.constant 0 : i32
    %c0_i32_0 = arith.constant 0 : i32
    %c0_i32_1 = arith.constant 0 : i32
    return %c0_i32, %c0_i32_0 : i32, i32
  }
  func.func @transform_4(%arg0: i32, %arg1: i32) -> (i32, i32) {
    %c0_i32 = arith.constant 0 : i32
    %c0_i32_0 = arith.constant 0 : i32
    %c0_i32_1 = arith.constant 0 : i32
    return %c0_i32, %c0_i32_0 : i32, i32
  }
  func.func @transform_5(%arg0: i32, %arg1: i32) -> (i32, i32, i32) {
    %c0_i32 = arith.constant 0 : i32
    %c0_i32_0 = arith.constant 0 : i32
    %c0_i32_1 = arith.constant 0 : i32
    %c0_i32_2 = arith.constant 0 : i32
    return %c0_i32, %c0_i32_0, %c0_i32_1 : i32, i32, i32
  }
  func.func @transform_6(%arg0: i32, %arg1: i32) -> (i32, i32) {
    %c0_i32 = arith.constant 0 : i32
    %c0_i32_0 = arith.constant 0 : i32
    %c0_i32_1 = arith.constant 0 : i32
    return %c0_i32, %c0_i32_0 : i32, i32
  }
  func.func @transform_7(%arg0: i32, %arg1: i32) -> (i32, i32, i32, i32) {
    %c0_i32 = arith.constant 0 : i32
    %c0_i32_0 = arith.constant 0 : i32
    %c0_i32_1 = arith.constant 0 : i32
    return %arg0, %arg1, %c0_i32, %c0_i32_0 : i32, i32, i32, i32
  }
  func.func @transform_8(%arg0: i32, %arg1: i32) -> (i32, i32, i32, i32) {
    %c0_i32 = arith.constant 0 : i32
    %c0_i32_0 = arith.constant 0 : i32
    %c0_i32_1 = arith.constant 0 : i32
    return %arg0, %arg1, %c0_i32, %c0_i32_0 : i32, i32, i32, i32
  }
}

module attributes {stable_mosaic.version = 11 : i64} {
  func.func @_bn2_res_kernel(%arg0: i32, %arg1: i32, %arg2: memref<1x8x16x128xf32, #tpu.memory_space<vmem>>, %arg3: memref<2x128xf32, #tpu.memory_space<vmem>>, %arg4: memref<1x8x16x16xf32, #tpu.memory_space<vmem>>, %arg5: memref<16x128xf32, #tpu.memory_space<vmem>>, %arg6: memref<1x128xf32, #tpu.memory_space<vmem>>, %arg7: memref<1x8x16x128xf32, #tpu.memory_space<vmem>>) attributes {dimension_semantics = [#tpu.dimension_semantics<parallel>, #tpu.dimension_semantics<parallel>], iteration_bounds = array<i64: 2, 2>, scalar_prefetch = 0 : i64, scratch_operands = 0 : i64, tpu.core_type = #tpu.core_type<tc>, window_params = [{transform_indices = @transform_0, window_bounds = array<i64: 1, 8, 16, 128>}, {pipeline_mode = #tpu.pipeline_mode<synchronous>, transform_indices = @transform_1, window_bounds = array<i64: 2, 128>}, {transform_indices = @transform_2, window_bounds = array<i64: 1, 8, 16, 16>}, {pipeline_mode = #tpu.pipeline_mode<synchronous>, transform_indices = @transform_3, window_bounds = array<i64: 16, 128>}, {pipeline_mode = #tpu.pipeline_mode<synchronous>, transform_indices = @transform_4, window_bounds = array<i64: 1, 128>}, {transform_indices = @transform_5, window_bounds = array<i64: 1, 8, 16, 128>}]} {
    %c0 = arith.constant 0 : index
    %c0_0 = arith.constant 0 : index
    %0 = vector.load %arg3[%c0, %c0_0] : memref<2x128xf32, #tpu.memory_space<vmem>>, vector<1x128xf32>
    %1 = vector.shape_cast %0 : vector<1x128xf32> to vector<1x1x128xf32>
    %c1 = arith.constant 1 : index
    %c0_1 = arith.constant 0 : index
    %2 = vector.load %arg3[%c1, %c0_1] : memref<2x128xf32, #tpu.memory_space<vmem>>, vector<1x128xf32>
    %3 = vector.shape_cast %2 : vector<1x128xf32> to vector<1x1x128xf32>
    %c0_2 = arith.constant 0 : index
    %c0_3 = arith.constant 0 : index
    %c0_4 = arith.constant 0 : index
    %c0_5 = arith.constant 0 : index
    %4 = vector.load %arg2[%c0_2, %c0_3, %c0_4, %c0_5] : memref<1x8x16x128xf32, #tpu.memory_space<vmem>>, vector<1x8x16x128xf32>
    %5 = vector.shape_cast %4 : vector<1x8x16x128xf32> to vector<8x16x128xf32>
    %6 = vector.broadcast %1 : vector<1x1x128xf32> to vector<8x16x128xf32>
    %7 = arith.mulf %5, %6 : vector<8x16x128xf32>
    %8 = vector.broadcast %3 : vector<1x1x128xf32> to vector<8x16x128xf32>
    %9 = arith.addf %7, %8 : vector<8x16x128xf32>
    %cst = arith.constant 0.000000e+00 : f32
    %10 = vector.broadcast %cst : f32 to vector<8x16x128xf32>
    %11 = arith.maximumf %9, %10 : vector<8x16x128xf32>
    %c0_6 = arith.constant 0 : index
    %c0_7 = arith.constant 0 : index
    %c0_8 = arith.constant 0 : index
    %c0_9 = arith.constant 0 : index
    %12 = vector.load %arg4[%c0_6, %c0_7, %c0_8, %c0_9] : memref<1x8x16x16xf32, #tpu.memory_space<vmem>>, vector<1x8x16x16xf32>
    %13 = vector.shape_cast %12 : vector<1x8x16x16xf32> to vector<8x16x16xf32>
    %14 = vector.shape_cast %13 : vector<8x16x16xf32> to vector<128x16xf32>
    %c0_10 = arith.constant 0 : index
    %c0_11 = arith.constant 0 : index
    %15 = vector.load %arg5[%c0_10, %c0_11] : memref<16x128xf32, #tpu.memory_space<vmem>>, vector<16x128xf32>
    %cst_12 = arith.constant dense<0.000000e+00> : vector<128x128xf32>
    %16 = tpu.matmul %14, %15, %cst_12 {dimension_numbers = #tpu.dot_dimension_numbers<[1], [0], [0], [1], [0, 0, 1, 1], [], []>} : vector<128x16xf32>, vector<16x128xf32>, vector<128x128xf32> -> vector<128x128xf32>
    %c0_13 = arith.constant 0 : index
    %c0_14 = arith.constant 0 : index
    %17 = vector.load %arg6[%c0_13, %c0_14] : memref<1x128xf32, #tpu.memory_space<vmem>>, vector<1x128xf32>
    %18 = vector.broadcast %17 : vector<1x128xf32> to vector<128x128xf32>
    %19 = arith.addf %16, %18 : vector<128x128xf32>
    %20 = vector.shape_cast %19 : vector<128x128xf32> to vector<8x16x128xf32>
    %21 = arith.addf %11, %20 : vector<8x16x128xf32>
    %c0_15 = arith.constant 0 : index
    %c0_16 = arith.constant 0 : index
    %c0_17 = arith.constant 0 : index
    %c0_18 = arith.constant 0 : index
    %22 = vector.load %arg7[%c0_15, %c0_16, %c0_17, %c0_18] : memref<1x8x16x128xf32, #tpu.memory_space<vmem>>, vector<1x8x16x128xf32>
    %23 = vector.shape_cast %22 : vector<1x8x16x128xf32> to vector<8x16x128xf32>
    %24 = vector.shape_cast %21 : vector<8x16x128xf32> to vector<1x8x16x128xf32>
    tpu.vector_store %arg7[%c0_15, %c0_16, %c0_17, %c0_18], %24 {strides = array<i32>} : memref<1x8x16x128xf32, #tpu.memory_space<vmem>>, vector<1x8x16x128xf32>,
    return
  }
  func.func @transform_0(%arg0: i32, %arg1: i32) -> (i32, i32, i32, i32) {
    %c0_i32 = arith.constant 0 : i32
    %c0_i32_0 = arith.constant 0 : i32
    %c0_i32_1 = arith.constant 0 : i32
    return %arg0, %arg1, %c0_i32, %c0_i32_0 : i32, i32, i32, i32
  }
  func.func @transform_1(%arg0: i32, %arg1: i32) -> (i32, i32) {
    %c0_i32 = arith.constant 0 : i32
    %c0_i32_0 = arith.constant 0 : i32
    %c0_i32_1 = arith.constant 0 : i32
    return %c0_i32, %c0_i32_0 : i32, i32
  }
  func.func @transform_2(%arg0: i32, %arg1: i32) -> (i32, i32, i32, i32) {
    %c0_i32 = arith.constant 0 : i32
    %c0_i32_0 = arith.constant 0 : i32
    %c0_i32_1 = arith.constant 0 : i32
    return %arg0, %arg1, %c0_i32, %c0_i32_0 : i32, i32, i32, i32
  }
  func.func @transform_3(%arg0: i32, %arg1: i32) -> (i32, i32) {
    %c0_i32 = arith.constant 0 : i32
    %c0_i32_0 = arith.constant 0 : i32
    %c0_i32_1 = arith.constant 0 : i32
    return %c0_i32, %c0_i32_0 : i32, i32
  }
  func.func @transform_4(%arg0: i32, %arg1: i32) -> (i32, i32) {
    %c0_i32 = arith.constant 0 : i32
    %c0_i32_0 = arith.constant 0 : i32
    %c0_i32_1 = arith.constant 0 : i32
    return %c0_i32, %c0_i32_0 : i32, i32
  }
  func.func @transform_5(%arg0: i32, %arg1: i32) -> (i32, i32, i32, i32) {
    %c0_i32 = arith.constant 0 : i32
    %c0_i32_0 = arith.constant 0 : i32
    %c0_i32_1 = arith.constant 0 : i32
    return %arg0, %arg1, %c0_i32, %c0_i32_0 : i32, i32, i32, i32
  }
}

</mosaic_0001>

<bundles_post_ra>
// kernel: tile.8
= control target key start
LH: loop header
LB: loop body
LE: loop exit
PB: predicated region body
PF: predicated region fallthrough
CT: control target
= control target key end

     0   :  { %s22_s0 = inlined_call_operand.vmem [shape: f32[8], index: 0, kind: input, shape index: {}]   ;;  %s23_s1 = inlined_call_operand.vmem [shape: f32[4,8], index: 1, kind: output, shape index: {}]  }
   0x1   :  { %v4_v0 = vld [vmem:[%s22_s0] ss:$0 sm:$0xff] }
   0x2   :  { %5 = vst [vmem:[%s23_s1] sm:$0xf] %v4_v0 }

// kernel: tile.9
= control target key start
LH: loop header
LB: loop body
LE: loop exit
PB: predicated region body
PF: predicated region fallthrough
CT: control target
= control target key end

     0   :  { %s37_s8 = smov 8   ;;  %s38_s9 = smov 16   ;;  %vm7_vm0 = vcmask 64512   ;;  %vm13_vm1 = vcmask 261312   ;;  %vm19_vm2 = vcmask 195712   ;;  %vm25_vm3 = vcmask 130112   ;;  %s55_s0 = inlined_call_operand.vmem [shape: f32[4,8], index: 0, kind: input, shape index: {}]   ;;  %s56_s1 = inlined_call_operand.vmem [shape: f32[1,32], index: 1, kind: output, shape index: {}]  }
   0x1   :  { %v4_v0 = vld [vmem:[%s55_s0] sm:$0xf]  ;;  %s36_s0 = smov 24  }
   0x2   :  { %5 = vst [vmem:[#allocation1] sm:$0xf] %v4_v0 }
   0x9   :  { %v10_v1 = vld [vmem:[#allocation1 + $0x3] sm:$0x1]   ;;  %v22_v2 = vld [vmem:[#allocation1 + $0x1] sm:$0x1]   ;;  %v16_v3 = vld [vmem:[#allocation1 + $0x2] sm:$0x1]  }
   0xa   :  { %11 = vrot.lane.b32.xlu0 %v10_v1, %s36_s0  ;;  %23 = vrot.lane.b32.xlu1 %v22_v2, %s37_s8  ;;  %v6_v4 = vld [vmem:[#allocation1] sm:$0x1]  }
   0xb   :  { %8 = vst.msk [vmem:[#allocation0] sm:$0x1] %vm7_vm0, %v6_v4  }
  0x12   :  { %17 = vrot.lane.b32.xlu0 %v16_v3, %s38_s9 }
  0x7c   :  { %v12_v5 = vpop.permute.xlu0 %11   ;;  %v24_v6 = vpop.permute.xlu1 %23  }
  0x7d   :  { %14 = vst.msk [vmem:[#allocation0] sm:$0x1] %vm13_vm1, %v12_v5  }
  0x84   :  { %v18_v7 = vpop.permute.xlu0 %17  }
  0x85   :  { %20 = vst.msk [vmem:[#allocation0] sm:$0x1] %vm19_vm2, %v18_v7  }
  0x86   :  { %26 = vst.msk [vmem:[#allocation0] sm:$0x1] %vm25_vm3, %v24_v6  }
  0x8d   :  { %v29_v8 = vld [vmem:[#allocation0] sm:$0x1] }
  0x8e   :  { %32 = vst [vmem:[%s56_s1] sm:$0x1] %v29_v8 }

// kernel: unet_up_block_forward.4
= control target key start
LH: loop header
LB: loop body
LE: loop exit
PB: predicated region body
PF: predicated region fallthrough
CT: control target
= control target key end

     0   :  { %s450_s12 = smov 0   ;;  %s452_s13 = smov 0   ;;  %s518_s0 = inlined_call_operand.vmem [shape: f32[2,8,8,16], index: 0, kind: input, shape index: {}]   ;;  %s519_s1 = inlined_call_operand.vmem [shape: f32[16,32], index: 1, kind: input, shape index: {}]   ;;  %s520_s2 = inlined_call_operand.vmem [shape: f32[1,32], index: 2, kind: input, shape index: {}]   ;;  %s521_s3 = inlined_call_operand.vmem [shape: f32[2,16,8,16], index: 3, kind: output, shape index: {}]  }
   0x1   :  { %s454_s14 = smov 0   ;;  %s456_s15 = smov 0  }
   0x2   :  { %s458_s16 = smov 0  }
   0x3 LB: > { %s22_s17 = sadd.s32 1, %s419_s14  ;;  %s25_s18 = sadd.s32 1, %s423_s15  ;;  %s427_s16 = sphi %s458_s16, %s13_s16   ;;  %s423_s15 = sphi %s456_s15, %s525_s15   ;;  %s419_s14 = sphi %s454_s14, %s524_s14   ;;  %s415_s13 = sphi %s452_s13, %s523_s13   ;;  %s411_s12 = sphi %s450_s12, %s522_s12  }
   0x4   : > { %p23_p0 = scmp.ge.s32.totalorder %s22_s17, 8  ;;  %p337_p1 = scmp.ge.s32.totalorder %s427_s16, 1 }
   0x5   : > { %p156_p2 = scmp.lt.s32.totalorder %s427_s16, 17 }
   0x6   : > { %s527_s17 = smov (%p23_p0, %s22_s17), 0  ;;  %s529_s18 = smov (!%p23_p0, %s25_s18), %s423_s15 }
   0x7   : > { %p157_p3 = pnand %p337_p1, %p156_p2  ;;  %p27_p4 = scmp.ge.s32.totalorder %s529_s18, 2 }
   0x8   : > { %p187_p5 = scmp.lt.s32.totalorder (!%p157_p3), %s415_s13, 1  ;;  %p189_p6 = scmp.lt.s32.totalorder (!%p157_p3), %s411_s12, 7 }
   0x9   : > { %s531_s18 = smov (%p27_p4, %s529_s18), 0  ;;  %160 = sbr.rel (%p157_p3) target bundleno = 265 (0x109), region = 32 }
   0xa   : > { %s340_s30 = sshll.u32 (!%p157_p3), %s411_s12, 1  ;;  %s429_s19 = smov (!%p157_p3), 112  }
   0xb   : > { %p198_p7 = scmp.lt.s32.totalorder (!%p157_p3), %s340_s30, 15 }
   0xe   : > { %v207_v0 = vld [vmem:[%s519_s1 + $0x8] sm:$0xff]  ;;  %v206_v1 = vld [vmem:[%s519_s1] sm:$0xff]  ;;  %s533_s13 = smov (!%p187_p5, %s415_s13), 1  ;;  %vm212_vm0 = vcmask 130048   ;;  %s535_s30 = smov (!%p198_p7, %s340_s30), 15 }
   0xf   : > { %230 = vmatpush.msra.mxu0 %v207_v0  ;;  %s190_s23 = scalar_select %p189_p6, %s411_s12, 7  ;;  %v388_v3 = vld [vmem:[%s520_s2] ss:$0 sm:$0xff] }
  0x10   : > { %s338_s24 = sshll.u32 %s533_s13, 3  ;;  %s341_s4 = sshll.u32 %s533_s13, 4 }
  0x11   : > { %231 = vmatpush.msra.mxu0 %v206_v1  ;;  %s192_s25 = sadd.s32 %s338_s24, %s190_s23  ;;  %s201_s5 = sadd.s32 %s341_s4, %s535_s30 }
  0x12   : > { %s339_s26 = sshll.u32 %s192_s25, 3  ;;  %s342_s8 = sshll.u32 %s201_s5, 3 }
  0x13   : > { %s194_s29 = scalar_lea.vmem %s518_s0, %s339_s26  ;;  %s203_s11 = scalar_lea.vmem %s521_s3, %s342_s8 }
  0x14   : > { %v205_v2 = vld [vmem:[%s194_s29] sm:$0xff] }
  0x15   : > { %343 = vmatmul.msk.f32.vlgmr.msra.gmra.mxu0 %vm212_vm0, %v205_v2 }
  0x92   : > { %v233_v4 = vpop.f32.mrf.mxu0 }
  0x93   : > { %v234_v5 = vadd.f32 %v388_v3, %v233_v4 }
  0x95   : > { %238 = vrot.lane.b32.xlu0 %v234_v5, %s429_s19  ;;  %236 = vst.msk [vmem:[%s203_s11] sm:$0xff] %vm212_vm0, %v234_v5 }
 0x107   : > { %v239_v6 = vpop.permute.xlu0 %238 }
 0x108   : > { %344 = vst.msk [vmem:[%s203_s11 + $0x8] sm:$0xff] %vm212_vm0, %v239_v6 }
 0x109 PF: > { %s13_s16 = sadd.s32 1, %s427_s16   ;;  %s522_s12 = smov %s419_s14 }
 0x10a   : > { %p10_p8 = scmp.ge.s32.totalorder %s13_s16, 18   ;;  %s523_s13 = smov %s423_s15 }
 0x10b   : > { %s524_s14 = smov %s527_s17  ;;  %s525_s15 = smov %s531_s18 }
 0x10c   :  { %12 = sbr.rel (!%p10_p8) target bundleno = 3 (0x3), region = 63 }

// kernel: unet_up_block_forward.5
= control target key start
LH: loop header
LB: loop body
LE: loop exit
PB: predicated region body
PF: predicated region fallthrough
CT: control target
= control target key end

     0   :  { %s2186_s15 = smov 0   ;;  %s2188_s16 = smov 0   ;;  %s2841_s0 = inlined_call_operand.vmem [shape: f32[2,2,10,18,16], index: 0, kind: input, shape index: {}]   ;;  %s2842_s1 = inlined_call_operand.vmem [shape: f32[9,16,128], index: 1, kind: input, shape index: {}]   ;;  %s2843_s2 = inlined_call_operand.vmem [shape: f32[1,128], index: 2, kind: input, shape index: {}]   ;;  %s2844_s3 = inlined_call_operand.vmem [shape: f32[2,16,16,128], index: 3, kind: output, shape index: {0}]   ;;  %s2845_s4 = inlined_call_operand.vmem [shape: f32[2,2,2,128], index: 4, kind: output, shape index: {1}]  }
   0x1   :  { %s2190_s17 = smov 0   ;;  %s2192_s18 = smov 0  }
   0x2   :  { %s2194_s19 = smov 0  }
   0x3 LB: > { %s24_s20 = sadd.s32 1, %s2151_s17  ;;  %s27_s21 = sadd.s32 1, %s2155_s18  ;;  %s2159_s19 = sphi %s2194_s19, %s15_s19   ;;  %s2155_s18 = sphi %s2192_s18, %s2858_s18   ;;  %s2151_s17 = sphi %s2190_s17, %s2857_s17   ;;  %s2147_s16 = sphi %s2188_s16, %s2856_s16   ;;  %s2143_s15 = sphi %s2186_s15, %s2855_s15  }
   0x4   : > { %p25_p0 = scmp.ge.s32.totalorder %s24_s20, 2  ;;  %p1806_p1 = scmp.ge.s32.totalorder %s2159_s19, 1 }
   0x5   : > { %p187_p2 = scmp.lt.s32.totalorder %s2159_s19, 5 }
   0x6   : > { %s2860_s20 = smov (%p25_p0, %s24_s20), 0  ;;  %s2862_s21 = smov (!%p25_p0, %s27_s21), %s2155_s18 }
   0x7   : > { %p188_p3 = pnand %p1806_p1, %p187_p2  ;;  %p29_p4 = scmp.ge.s32.totalorder %s2862_s21, 2 }
   0x9   : > { %s2864_s21 = smov (%p29_p4, %s2862_s21), 0  ;;  %191 = sbr.rel (%p188_p3) target bundleno = 462 (0x1ce), region = 32 }
   0xe   : > { %v1815_v0 = vld [vmem:[%s2842_s1 + $0x18] sm:$0xff]  ;;  %v1814_v1 = vld [vmem:[%s2842_s1 + $0x10] sm:$0xff]  ;;  %p230_p5 = scmp.lt.s32.totalorder %s2147_s16, 1  ;;  %p232_p6 = scmp.lt.s32.totalorder %s2143_s15, 1  ;;  %v1849_v2 = vld [vmem:[%s2842_s1 + $0x28] sm:$0xff]  ;;  %vm295_vm0 = vcmask 130048  }
   0xf   : > { %2072 = vmatpush.msra.mxu1 %v1815_v0  ;;  %2073 = vmatpush.msra.mxu2 %v1815_v0  ;;  %v1883_v3 = vld [vmem:[%s2842_s1 + $0x38] sm:$0xff]  ;;  %v275_v4 = vld [vmem:[%s2842_s1 + $0x8] sm:$0xff]  ;;  %v1848_v5 = vld [vmem:[%s2842_s1 + $0x20] sm:$0xff]  ;;  %s1808_s29 = sshll.u32 %s2143_s15, 3 }
  0x10   : > { %2074 = vmatpush.msra.mxu3 %v1815_v0  ;;  %s2866_s16 = smov (!%p230_p5, %s2147_s16), 1  ;;  %358 = vmatpush.msra.mxu0 %v1815_v0  ;;  %v1917_v6 = vld [vmem:[%s2842_s1 + $0x48] sm:$0xff]  ;;  %v1882_v7 = vld [vmem:[%s2842_s1 + $0x30] sm:$0xff]  ;;  %v274_v8 = vld [vmem:[%s2842_s1] sm:$0xff]  ;;  %p242_p7 = scmp.lt.s32.totalorder %s1808_s29, 15 }
  0x11   : > { %2075 = vmatpush.msra.mxu1 %v1814_v1  ;;  %2076 = vmatpush.msra.mxu2 %v1814_v1  ;;  %s2237_s6 = scalar_select %p232_p6, %s2143_s15, 1  ;;  %v1916_v9 = vld [vmem:[%s2842_s1 + $0x40] sm:$0xff]  ;;  %v1985_v14 = vld [vmem:[%s2842_s1 + $0x68] sm:$0xff]  ;;  %v2019_v17 = vld [vmem:[%s2842_s1 + $0x78] sm:$0xff] }
  0x12   : > { %s2079_s9 = smul.u32 60, %s2866_s16  ;;  %2077 = vmatpush.msra.mxu3 %v1814_v1  ;;  %359 = vmatpush.msra.mxu0 %v1814_v1  ;;  %v1951_v20 = vld [vmem:[%s2842_s1 + $0x58] sm:$0xff]  ;;  %v2053_v21 = vld [vmem:[%s2842_s1 + $0x88] sm:$0xff]  ;;  %v1984_v42 = vld [vmem:[%s2842_s1 + $0x60] sm:$0xff]  ;;  %s2868_s29 = smov (!%p242_p7, %s1808_s29), 15 }
  0x13   : > { %603 = vmatpush.msrb.mxu2 %v1849_v2  ;;  %s2078_s14 = smul.u32 30, %s2237_s6  ;;  %471 = vmatpush.msrb.mxu1 %v275_v4  ;;  %v2018_v43 = vld [vmem:[%s2842_s1 + $0x70] sm:$0xff]  ;;  %v2052_v47 = vld [vmem:[%s2842_s1 + $0x80] sm:$0xff]  ;;  %s1809_s15 = sshll.u32 %s2868_s29, 1 }
  0x14   : > { %752 = vmatpush.msrb.mxu3 %v1883_v3  ;;  %900 = vmatpush.msrb.mxu0 %v1917_v6  ;;  %v1950_v44 = vld [vmem:[%s2842_s1 + $0x50] sm:$0xff]  ;;  %s1812_s13 = sshll.u32 %s2866_s16, 1 }
  0x15   : > { %604 = vmatpush.msrb.mxu2 %v1848_v5  ;;  %s236_s26 = sadd.s32 %s2079_s9, %s2078_s14  ;;  %472 = vmatpush.msrb.mxu1 %v274_v8  ;;  %s255_s14 = sadd.s32 %s1812_s13, %s2237_s6 }
  0x16   : > { %753 = vmatpush.msrb.mxu3 %v1882_v7  ;;  %s1807_s27 = sshll.u32 %s236_s26, 3  ;;  %901 = vmatpush.msrb.mxu0 %v1916_v9  ;;  %s1813_s22 = sshll.u32 %s255_s14, 1 }
  0x17   : > { %s2259_s30 = scalar_lea.vmem %s2841_s0, %s1807_s27  ;;  %s257_s25 = scalar_lea.vmem %s2845_s4, %s1813_s22 }
  0x18   : > { %v2262_v10 = vld [vmem:[%s2259_s30 + $0x31] sm:$0xff]  ;;  %v2265_v11 = vld [vmem:[%s2259_s30 + $0x61] sm:$0xff]  ;;  %v2282_v15 = vld [vmem:[%s2259_s30 + $0x39] sm:$0xff] }
  0x19   : > { %v2268_v12 = vld [vmem:[%s2259_s30 + $0x91] sm:$0xff]  ;;  %1820 = vmatmul.msk.f32.vlgmr.msra.gmra.mxu1 %vm295_vm0, %v2262_v10  ;;  %1824 = vmatmul.msk.f32.vlgmr.msra.gmra.mxu2 %vm295_vm0, %v2265_v11  ;;  %v276_v13 = vld [vmem:[%s2259_s30 + $0x1] sm:$0xff]  ;;  %v2285_v16 = vld [vmem:[%s2259_s30 + $0x69] sm:$0xff] }
  0x1a   : > { %1828 = vmatmul.msk.f32.vlgmr.msra.gmra.mxu3 %vm295_vm0, %v2268_v12  ;;  %1816 = vmatmul.msk.f32.vlgmr.msra.gmra.mxu0 %vm295_vm0, %v276_v13  ;;  %v2291_v18 = vld [vmem:[%s2259_s30 + $0x99] sm:$0xff]  ;;  %v277_v19 = vld [vmem:[%s2259_s30 + $0x9] sm:$0xff]  ;;  %v2325_v26 = vld [vmem:[%s2259_s30 + $0x51] sm:$0xff] }
  0x1b   : > { %1197 = vmatpush.msra.mxu2 %v1985_v14  ;;  %1345 = vmatpush.msra.mxu3 %v2019_v17  ;;  %v2308_v22 = vld [vmem:[%s2259_s30 + $0x49] sm:$0xff]  ;;  %v2311_v23 = vld [vmem:[%s2259_s30 + $0x79] sm:$0xff]  ;;  %v2328_v27 = vld [vmem:[%s2259_s30 + $0x81] sm:$0xff] }
  0x1c   : > { %1048 = vmatpush.msra.mxu1 %v1951_v20  ;;  %1493 = vmatpush.msra.mxu0 %v2053_v21  ;;  %v2314_v24 = vld [vmem:[%s2259_s30 + $0xa9] sm:$0xff]  ;;  %v278_v25 = vld [vmem:[%s2259_s30 + $0x19] sm:$0xff]  ;;  %v2331_v28 = vld [vmem:[%s2259_s30 + $0xb1] sm:$0xff] }
  0x1d   : > { %v279_v29 = vld [vmem:[%s2259_s30 + $0x21] sm:$0xff]  ;;  %v1866_v32 = vld [vmem:[%s2259_s30 + $0x18] sm:$0xff]  ;;  %v523_v34 = vld [vmem:[%s2259_s30 + $0xa] sm:$0xff]  ;;  %1198 = vmatpush.msra.mxu2 %v1984_v42  ;;  %1346 = vmatpush.msra.mxu3 %v2018_v43 }
  0x1e   : > { %v258_v30 = vld [vmem:[%s2259_s30] sm:$0xff]  ;;  %v259_v33 = vld [vmem:[%s2259_s30 + $0x8] sm:$0xff]  ;;  %v2359_v37 = vld [vmem:[%s2259_s30 + $0x30] sm:$0xff]  ;;  %1049 = vmatpush.msra.mxu1 %v1950_v44  ;;  %1494 = vmatpush.msra.mxu0 %v2052_v47 }
  0x1f   : > { %v522_v31 = vld [vmem:[%s2259_s30 + $0x2] sm:$0xff]  ;;  %v2356_v36 = vld [vmem:[%s2259_s30 + $0x1a] sm:$0xff]  ;;  %v2382_v40 = vld [vmem:[%s2259_s30 + $0x32] sm:$0xff] }
  0x20   : > { %v1867_v35 = vld [vmem:[%s2259_s30 + $0x20] sm:$0xff]  ;;  %v2372_v39 = vld [vmem:[%s2259_s30 + $0x38] sm:$0xff]  ;;  %v2385_v41 = vld [vmem:[%s2259_s30 + $0x48] sm:$0xff] }
  0x21   : > { %1821 = vmatmul.msk.f32.gmra.mxu1 %vm295_vm0, %v2282_v15  ;;  %1825 = vmatmul.msk.f32.gmra.mxu2 %vm295_vm0, %v2285_v16  ;;  %v2369_v38 = vld [vmem:[%s2259_s30 + $0x22] sm:$0xff]  ;;  %v2405_v45 = vld [vmem:[%s2259_s30 + $0x3a] sm:$0xff]  ;;  %v2408_v46 = vld [vmem:[%s2259_s30 + $0x50] sm:$0xff] }
  0x22   : > { %1829 = vmatmul.msk.f32.gmra.mxu3 %vm295_vm0, %v2291_v18  ;;  %1817 = vmatmul.msk.f32.gmra.mxu0 %vm295_vm0, %v277_v19  ;;  %v2422_v48 = vld [vmem:[%s2259_s30 + $0x4a] sm:$0xff]  ;;  %v2425_v49 = vld [vmem:[%s2259_s30 + $0x60] sm:$0xff]  ;;  %v2436_v50 = vld [vmem:[%s2259_s30 + $0x52] sm:$0xff] }
  0x23   : > { %v2439_v51 = vld [vmem:[%s2259_s30 + $0x68] sm:$0xff]  ;;  %v2453_v53 = vld [vmem:[%s2259_s30 + $0x78] sm:$0xff]  ;;  %v2467_v55 = vld [vmem:[%s2259_s30 + $0x80] sm:$0xff] }
  0x24   : > { %v2450_v52 = vld [vmem:[%s2259_s30 + $0x62] sm:$0xff]  ;;  %v2464_v54 = vld [vmem:[%s2259_s30 + $0x6a] sm:$0xff]  ;;  %v2478_v56 = vld [vmem:[%s2259_s30 + $0x7a] sm:$0xff] }
  0x25   : > { %v2481_v57 = vld [vmem:[%s2259_s30 + $0x90] sm:$0xff]  ;;  %v2492_v58 = vld [vmem:[%s2259_s30 + $0x82] sm:$0xff]  ;;  %v2495_v59 = vld [vmem:[%s2259_s30 + $0x98] sm:$0xff] }
  0x26   : > { %v2508_v61 = vld [vmem:[%s2259_s30 + $0x92] sm:$0xff]  ;;  %v2511_v62 = vld [vmem:[%s2259_s30 + $0xa8] sm:$0xff]  ;;  %v2528_v3 = vld [vmem:[%s2259_s30 + $0x9a] sm:$0xff] }
  0x27   : > { %v2531_v4 = vld [vmem:[%s2259_s30 + $0xb0] sm:$0xff]  ;;  %v2551_v13 = vld [vmem:[%s2259_s30 + $0xc0] sm:$0xff] }
  0x28   : > { %v2548_v9 = vld [vmem:[%s2259_s30 + $0xaa] sm:$0xff]  ;;  %v2554_v17 = vld [vmem:[%s2259_s30 + $0xc1] sm:$0xff] }
  0x29   : > { %1822 = vmatmul.msk.f32.gmra.mxu1 %vm295_vm0, %v2308_v22  ;;  %1826 = vmatmul.msk.f32.gmra.mxu2 %vm295_vm0, %v2311_v23 }
  0x2a   : > { %1830 = vmatmul.msk.f32.gmra.mxu3 %vm295_vm0, %v2314_v24  ;;  %1818 = vmatmul.msk.f32.gmra.mxu0 %vm295_vm0, %v278_v25 }
  0x31   : > { %1823 = vmatmul.msk.f32.gmra.mxu1 %vm295_vm0, %v2325_v26  ;;  %1827 = vmatmul.msk.f32.gmra.mxu2 %vm295_vm0, %v2328_v27 }
  0x32   : > { %1831 = vmatmul.msk.f32.gmra.mxu3 %vm295_vm0, %v2331_v28  ;;  %1819 = vmatmul.msk.f32.gmra.mxu0 %vm295_vm0, %v279_v29 }
  0x39   : > { %1832 = vmatmul.msk.f32.vlgmr.msrb.gmra.mxu1 %vm295_vm0, %v258_v30  ;;  %1850 = vmatmul.msk.f32.vlgmr.msrb.gmra.mxu2 %vm295_vm0, %v522_v31  ;;  %v2577_v31 = vld [vmem:[%s2259_s30 + $0xc9] sm:$0xff] }
  0x3a   : > { %1884 = vmatmul.msk.f32.vlgmr.msrb.gmra.mxu3 %vm295_vm0, %v1866_v32  ;;  %1918 = vmatmul.msk.f32.vlgmr.msrb.gmra.mxu0 %vm295_vm0, %v278_v25  ;;  %v2571_v25 = vld [vmem:[%s2259_s30 + $0xb2] sm:$0xff]  ;;  %2849 = vst [vmem:[#allocation4_spill] sm:$0xff] %v2577_v31 }
  0x41   : > { %1833 = vmatmul.msk.f32.gmra.mxu1 %vm295_vm0, %v259_v33  ;;  %1851 = vmatmul.msk.f32.gmra.mxu2 %vm295_vm0, %v523_v34 }
  0x42   : > { %1885 = vmatmul.msk.f32.gmra.mxu3 %vm295_vm0, %v1867_v35  ;;  %1919 = vmatmul.msk.f32.gmra.mxu0 %vm295_vm0, %v279_v29  ;;  %v2574_v29 = vld [vmem:[%s2259_s30 + $0xc8] sm:$0xff] }
  0x49   : > { %1834 = vmatmul.msk.f32.gmra.mxu1 %vm295_vm0, %v1866_v32  ;;  %1852 = vmatmul.msk.f32.gmra.mxu2 %vm295_vm0, %v2356_v36 }
  0x4a   : > { %1886 = vmatmul.msk.f32.gmra.mxu3 %vm295_vm0, %v2359_v37  ;;  %1920 = vmatmul.msk.f32.gmra.mxu0 %vm295_vm0, %v2262_v10 }
  0x51   : > { %1835 = vmatmul.msk.f32.gmra.mxu1 %vm295_vm0, %v1867_v35  ;;  %1853 = vmatmul.msk.f32.gmra.mxu2 %vm295_vm0, %v2369_v38 }
  0x52   : > { %1887 = vmatmul.msk.f32.gmra.mxu3 %vm295_vm0, %v2372_v39  ;;  %1921 = vmatmul.msk.f32.gmra.mxu0 %vm295_vm0, %v2282_v15 }
  0x59   : > { %1836 = vmatmul.msk.f32.gmra.mxu1 %vm295_vm0, %v2359_v37  ;;  %1854 = vmatmul.msk.f32.gmra.mxu2 %vm295_vm0, %v2382_v40 }
  0x5a   : > { %1888 = vmatmul.msk.f32.gmra.mxu3 %vm295_vm0, %v2385_v41  ;;  %1922 = vmatmul.msk.f32.gmra.mxu0 %vm295_vm0, %v2308_v22 }
  0x61   : > { %1837 = vmatmul.msk.f32.gmra.mxu1 %vm295_vm0, %v2372_v39  ;;  %1855 = vmatmul.msk.f32.gmra.mxu2 %vm295_vm0, %v2405_v45 }
  0x62   : > { %1889 = vmatmul.msk.f32.gmra.mxu3 %vm295_vm0, %v2408_v46  ;;  %1923 = vmatmul.msk.f32.gmra.mxu0 %vm295_vm0, %v2325_v26 }
  0x69   : > { %1838 = vmatmul.msk.f32.gmra.mxu1 %vm295_vm0, %v2385_v41  ;;  %1856 = vmatmul.msk.f32.gmra.mxu2 %vm295_vm0, %v2422_v48 }
  0x6a   : > { %1890 = vmatmul.msk.f32.gmra.mxu3 %vm295_vm0, %v2425_v49  ;;  %1924 = vmatmul.msk.f32.gmra.mxu0 %vm295_vm0, %v2265_v11 }
  0x71   : > { %1839 = vmatmul.msk.f32.gmra.mxu1 %vm295_vm0, %v2408_v46  ;;  %1857 = vmatmul.msk.f32.gmra.mxu2 %vm295_vm0, %v2436_v50 }
  0x72   : > { %1891 = vmatmul.msk.f32.gmra.mxu3 %vm295_vm0, %v2439_v51  ;;  %1925 = vmatmul.msk.f32.gmra.mxu0 %vm295_vm0, %v2285_v16 }
  0x79   : > { %1840 = vmatmul.msk.f32.gmra.mxu1 %vm295_vm0, %v2425_v49  ;;  %1858 = vmatmul.msk.f32.gmra.mxu2 %vm295_vm0, %v2450_v52 }
  0x7a   : > { %1892 = vmatmul.msk.f32.gmra.mxu3 %vm295_vm0, %v2453_v53  ;;  %1926 = vmatmul.msk.f32.gmra.mxu0 %vm295_vm0, %v2311_v23 }
  0x81   : > { %1841 = vmatmul.msk.f32.gmra.mxu1 %vm295_vm0, %v2439_v51  ;;  %1859 = vmatmul.msk.f32.gmra.mxu2 %vm295_vm0, %v2464_v54 }
  0x82   : > { %1893 = vmatmul.msk.f32.gmra.mxu3 %vm295_vm0, %v2467_v55  ;;  %1927 = vmatmul.msk.f32.gmra.mxu0 %vm295_vm0, %v2328_v27 }
  0x89   : > { %1842 = vmatmul.msk.f32.gmra.mxu1 %vm295_vm0, %v2453_v53  ;;  %1860 = vmatmul.msk.f32.gmra.mxu2 %vm295_vm0, %v2478_v56 }
  0x8a   : > { %1894 = vmatmul.msk.f32.gmra.mxu3 %vm295_vm0, %v2481_v57  ;;  %1928 = vmatmul.msk.f32.gmra.mxu0 %vm295_vm0, %v2268_v12 }
  0x91   : > { %1843 = vmatmul.msk.f32.gmra.mxu1 %vm295_vm0, %v2467_v55  ;;  %1861 = vmatmul.msk.f32.gmra.mxu2 %vm295_vm0, %v2492_v58 }
  0x92   : > { %1895 = vmatmul.msk.f32.gmra.mxu3 %vm295_vm0, %v2495_v59  ;;  %1929 = vmatmul.msk.f32.gmra.mxu0 %vm295_vm0, %v2291_v18 }
  0x96   : > { %v2505_v60 = vpop.f32.mrf.mxu1 }
  0x97   : > { %v361_v63 = vpop.f32.mrf.mxu0 }
  0x99   : > { %1844 = vmatmul.msk.f32.gmra.mxu1 %vm295_vm0, %v2481_v57  ;;  %1862 = vmatmul.msk.f32.gmra.mxu2 %vm295_vm0, %v2508_v61 }
  0x9a   : > { %1896 = vmatmul.msk.f32.gmra.mxu3 %vm295_vm0, %v2511_v62  ;;  %1930 = vmatmul.msk.f32.gmra.mxu0 %vm295_vm0, %v2314_v24 }
  0x9c   : > { %v2521_v0 = vpop.f32.mrf.mxu2 }
  0x9d   : > { %v2523_v1 = vpop.f32.mrf.mxu3 }
  0x9e   : > { %v2525_v2 = vpop.f32.mrf.mxu1 }
  0x9f   : > { %v364_v5 = vpop.f32.mrf.mxu0 }
  0xa1   : > { %1845 = vmatmul.msk.f32.gmra.mxu1 %vm295_vm0, %v2495_v59  ;;  %1863 = vmatmul.msk.f32.gmra.mxu2 %vm295_vm0, %v2528_v3 }
  0xa2   : > { %1897 = vmatmul.msk.f32.gmra.mxu3 %vm295_vm0, %v2531_v4  ;;  %1931 = vmatmul.msk.f32.gmra.mxu0 %vm295_vm0, %v2331_v28 }
  0xa4   : > { %v2541_v6 = vpop.f32.mrf.mxu2 }
  0xa5   : > { %v2543_v7 = vpop.f32.mrf.mxu3 }
  0xa6   : > { %2847 = vst [vmem:[#allocation2_spill] sm:$0xff] %v2543_v7  ;;  %v2545_v8 = vpop.f32.mrf.mxu1 }
  0xa7   : > { %v367_v14 = vpop.f32.mrf.mxu0 }
  0xa9   : > { %1846 = vmatmul.msk.f32.gmra.mxu1 %vm295_vm0, %v2511_v62  ;;  %1864 = vmatmul.msk.f32.gmra.mxu2 %vm295_vm0, %v2548_v9 }
  0xaa   : > { %1898 = vmatmul.msk.f32.gmra.mxu3 %vm295_vm0, %v2551_v13  ;;  %1932 = vmatmul.msk.f32.gmra.mxu0 %vm295_vm0, %v2554_v17 }
  0xac   : > { %v2564_v19 = vpop.f32.mrf.mxu2 }
  0xad   : > { %v2566_v20 = vpop.f32.mrf.mxu3 }
  0xae   : > { %2848 = vst [vmem:[#allocation3_spill] sm:$0xff] %v2566_v20  ;;  %v2568_v21 = vpop.f32.mrf.mxu1 }
  0xaf   : > { %v370_v30 = vpop.f32.mrf.mxu0 }
  0xb1   : > { %1847 = vmatmul.msk.f32.gmra.mxu1 %vm295_vm0, %v2531_v4  ;;  %1865 = vmatmul.msk.f32.gmra.mxu2 %vm295_vm0, %v2571_v25 }
  0xb2   : > { %1899 = vmatmul.msk.f32.gmra.mxu3 %vm295_vm0, %v2574_v29  ;;  %1933 = vmatmul.msk.f32.gmra.mxu0 %vm295_vm0, %v2577_v31 }
  0xb4   : > { %v2587_v32 = vpop.f32.mrf.mxu2 }
  0xb5   : > { %v2589_v33 = vpop.f32.mrf.mxu3 }
  0xb6   : > { %2850 = vst [vmem:[#allocation5_spill] sm:$0xff] %v2589_v33  ;;  %v474_v34 = vpop.f32.mrf.mxu1 }
  0xb7   : > { %v903_v35 = vpop.f32.mrf.mxu0  ;;  %v475_v42 = vadd.f32 %v474_v34, %v361_v63 }
  0xb9   : > { %1952 = vmatmul.msk.f32.vlgmr.msra.gmra.mxu1 %vm295_vm0, %v2356_v36  ;;  %1986 = vmatmul.msk.f32.vlgmr.msra.gmra.mxu2 %vm295_vm0, %v2359_v37 }
  0xba   : > { %2020 = vmatmul.msk.f32.vlgmr.msra.gmra.mxu3 %vm295_vm0, %v2262_v10  ;;  %2054 = vmatmul.msk.f32.vlgmr.msra.gmra.mxu0 %vm295_vm0, %v2382_v40 }
  0xbc   : > { %v606_v43 = vpop.f32.mrf.mxu2 }
  0xbd   : > { %v654_v44 = vadd.f32 %v606_v43, %v475_v42  ;;  %v755_v47 = vpop.f32.mrf.mxu3 }
  0xbe   : > { %v477_v20 = vpop.f32.mrf.mxu1 }
  0xbf   : > { %v803_v33 = vadd.f32 %v755_v47, %v654_v44  ;;  %v906_v7 = vpop.f32.mrf.mxu0  ;;  %v478_v10 = vadd.f32 %v477_v20, %v364_v5 }
  0xc1   : > { %v2599_v31 = vadd.f32 %v903_v35, %v803_v33  ;;  %1953 = vmatmul.msk.f32.gmra.mxu1 %vm295_vm0, %v2369_v38  ;;  %1987 = vmatmul.msk.f32.gmra.mxu2 %vm295_vm0, %v2372_v39 }
  0xc2   : > { %2021 = vmatmul.msk.f32.gmra.mxu3 %vm295_vm0, %v2282_v15  ;;  %2055 = vmatmul.msk.f32.gmra.mxu0 %vm295_vm0, %v2405_v45 }
  0xc4   : > { %v609_v36 = vpop.f32.mrf.mxu2 }
  0xc5   : > { %v655_v37 = vadd.f32 %v609_v36, %v478_v10  ;;  %v758_v63 = vpop.f32.mrf.mxu3 }
  0xc6   : > { %v480_v34 = vpop.f32.mrf.mxu1 }
  0xc7   : > { %v804_v42 = vadd.f32 %v758_v63, %v655_v37  ;;  %v909_v33 = vpop.f32.mrf.mxu0  ;;  %v481_v15 = vadd.f32 %v480_v34, %v367_v14 }
  0xc9   : > { %v2609_v35 = vadd.f32 %v906_v7, %v804_v42  ;;  %1954 = vmatmul.msk.f32.gmra.mxu1 %vm295_vm0, %v2382_v40  ;;  %1988 = vmatmul.msk.f32.gmra.mxu2 %vm295_vm0, %v2385_v41 }
  0xca   : > { %2022 = vmatmul.msk.f32.gmra.mxu3 %vm295_vm0, %v2308_v22  ;;  %2056 = vmatmul.msk.f32.gmra.mxu0 %vm295_vm0, %v2422_v48 }
  0xcc   : > { %v612_v38 = vpop.f32.mrf.mxu2 }
  0xcd   : > { %v656_v39 = vadd.f32 %v612_v38, %v481_v15  ;;  %v761_v5 = vpop.f32.mrf.mxu3 }
  0xce   : > { %v483_v20 = vpop.f32.mrf.mxu1 }
  0xcf   : > { %v805_v43 = vadd.f32 %v761_v5, %v656_v39  ;;  %v912_v7 = vpop.f32.mrf.mxu0  ;;  %v484_v22 = vadd.f32 %v483_v20, %v370_v30 }
  0xd1   : > { %v2619_v44 = vadd.f32 %v909_v33, %v805_v43  ;;  %1955 = vmatmul.msk.f32.gmra.mxu1 %vm295_vm0, %v2405_v45  ;;  %1989 = vmatmul.msk.f32.gmra.mxu2 %vm295_vm0, %v2408_v46 }
  0xd2   : > { %2023 = vmatmul.msk.f32.gmra.mxu3 %vm295_vm0, %v2325_v26  ;;  %2057 = vmatmul.msk.f32.gmra.mxu0 %vm295_vm0, %v2436_v50 }
  0xd4   : > { %v615_v40 = vpop.f32.mrf.mxu2 }
  0xd5   : > { %v657_v41 = vadd.f32 %v615_v40, %v484_v22  ;;  %v764_v14 = vpop.f32.mrf.mxu3 }
  0xd6   : > { %v486_v47 = vpop.f32.mrf.mxu1 }
  0xd7   : > { %v806_v10 = vadd.f32 %v764_v14, %v657_v41  ;;  %v915_v36 = vpop.f32.mrf.mxu0  ;;  %v487_v26 = vadd.f32 %v486_v47, %v2505_v60 }
  0xd9   : > { %v2629_v37 = vadd.f32 %v912_v7, %v806_v10  ;;  %1956 = vmatmul.msk.f32.gmra.mxu1 %vm295_vm0, %v2422_v48  ;;  %1990 = vmatmul.msk.f32.gmra.mxu2 %vm295_vm0, %v2425_v49 }
  0xda   : > { %2024 = vmatmul.msk.f32.gmra.mxu3 %vm295_vm0, %v2265_v11  ;;  %2058 = vmatmul.msk.f32.gmra.mxu0 %vm295_vm0, %v2450_v52 }
  0xdc   : > { %v618_v45 = vpop.f32.mrf.mxu2 }
  0xdd   : > { %v658_v46 = vadd.f32 %v618_v45, %v487_v26  ;;  %v767_v30 = vpop.f32.mrf.mxu3 }
  0xde   : > { %v489_v63 = vpop.f32.mrf.mxu1 }
  0xdf   : > { %v807_v34 = vadd.f32 %v767_v30, %v658_v46  ;;  %v918_v42 = vpop.f32.mrf.mxu0  ;;  %v490_v11 = vadd.f32 %v489_v63, %v2525_v2 }
  0xe1   : > { %v2640_v33 = vadd.f32 %v915_v36, %v807_v34  ;;  %1957 = vmatmul.msk.f32.gmra.mxu1 %vm295_vm0, %v2436_v50  ;;  %1991 = vmatmul.msk.f32.gmra.mxu2 %vm295_vm0, %v2439_v51 }
  0xe2   : > { %2025 = vmatmul.msk.f32.gmra.mxu3 %vm295_vm0, %v2285_v16  ;;  %2059 = vmatmul.msk.f32.gmra.mxu0 %vm295_vm0, %v2464_v54 }
  0xe4   : > { %v621_v48 = vpop.f32.mrf.mxu2 }
  0xe5   : > { %v659_v49 = vadd.f32 %v621_v48, %v490_v11  ;;  %v770_v60 = vpop.f32.mrf.mxu3 }
  0xe6   : > { %v492_v15 = vpop.f32.mrf.mxu1 }
  0xe7   : > { %v808_v38 = vadd.f32 %v770_v60, %v659_v49  ;;  %v921_v39 = vpop.f32.mrf.mxu0  ;;  %v493_v16 = vadd.f32 %v492_v15, %v2545_v8 }
  0xe9   : > { %v2651_v5 = vadd.f32 %v918_v42, %v808_v38  ;;  %1958 = vmatmul.msk.f32.gmra.mxu1 %vm295_vm0, %v2450_v52  ;;  %1992 = vmatmul.msk.f32.gmra.mxu2 %vm295_vm0, %v2453_v53 }
  0xea   : > { %2026 = vmatmul.msk.f32.gmra.mxu3 %vm295_vm0, %v2311_v23  ;;  %2060 = vmatmul.msk.f32.gmra.mxu0 %vm295_vm0, %v2478_v56 }
  0xec   : > { %v624_v50 = vpop.f32.mrf.mxu2 }
  0xed   : > { %v660_v51 = vadd.f32 %v624_v50, %v493_v16  ;;  %v773_v2 = vpop.f32.mrf.mxu3 }
  0xee   : > { %v495_v20 = vpop.f32.mrf.mxu1 }
  0xef   : > { %v809_v43 = vadd.f32 %v773_v2, %v660_v51  ;;  %v924_v7 = vpop.f32.mrf.mxu0  ;;  %v496_v23 = vadd.f32 %v495_v20, %v2568_v21 }
  0xf1   : > { %v2662_v22 = vadd.f32 %v921_v39, %v809_v43  ;;  %1959 = vmatmul.msk.f32.gmra.mxu1 %vm295_vm0, %v2464_v54  ;;  %1993 = vmatmul.msk.f32.gmra.mxu2 %vm295_vm0, %v2467_v55  ;;  %v2048_v39 = vld [vmem:[%s2259_s30 + $0xc2] sm:$0xff] }
  0xf2   : > { %2027 = vmatmul.msk.f32.gmra.mxu3 %vm295_vm0, %v2328_v27  ;;  %2061 = vmatmul.msk.f32.gmra.mxu0 %vm295_vm0, %v2492_v58 }
  0xf4   : > { %v627_v52 = vpop.f32.mrf.mxu2 }
  0xf5   : > { %v661_v53 = vadd.f32 %v627_v52, %v496_v23  ;;  %v776_v8 = vpop.f32.mrf.mxu3 }
  0xf6   : > { %v498_v40 = vpop.f32.mrf.mxu1 }
  0xf7   : > { %v810_v41 = vadd.f32 %v776_v8, %v661_v53  ;;  %v927_v14 = vpop.f32.mrf.mxu0  ;;  %v499_v27 = vadd.f32 %v498_v40, %v2521_v0  ;;  %v1982_v53 = vld [vmem:[%s2259_s30 + $0xd8] sm:$0xff] }
  0xf8   : > { %v2016_v40 = vld [vmem:[%s2259_s30 + $0xd9] sm:$0xff] }
  0xf9   : > { %v2673_v47 = vadd.f32 %v924_v7, %v810_v41  ;;  %1960 = vmatmul.msk.f32.gmra.mxu1 %vm295_vm0, %v2478_v56  ;;  %1994 = vmatmul.msk.f32.gmra.mxu2 %vm295_vm0, %v2481_v57  ;;  %v2050_v41 = vld [vmem:[%s2259_s30 + $0xda] sm:$0xff] }
  0xfa   : > { %2028 = vmatmul.msk.f32.gmra.mxu3 %vm295_vm0, %v2268_v12  ;;  %2062 = vmatmul.msk.f32.gmra.mxu0 %vm295_vm0, %v2508_v61 }
  0xfc   : > { %v630_v54 = vpop.f32.mrf.mxu2 }
  0xfd   : > { %v662_v55 = vadd.f32 %v630_v54, %v499_v27  ;;  %v779_v21 = vpop.f32.mrf.mxu3 }
  0xfe   : > { %v501_v10 = vpop.f32.mrf.mxu1 }
  0xff   : > { %v811_v36 = vadd.f32 %v779_v21, %v662_v55  ;;  %v930_v26 = vpop.f32.mrf.mxu0  ;;  %v502_v12 = vadd.f32 %v501_v10, %v2541_v6 }
 0x101   : > { %v2684_v45 = vadd.f32 %v927_v14, %v811_v36  ;;  %1961 = vmatmul.msk.f32.gmra.mxu1 %vm295_vm0, %v2492_v58  ;;  %1995 = vmatmul.msk.f32.gmra.mxu2 %vm295_vm0, %v2495_v59  ;;  %v2853_v14 = vld [vmem:[#allocation3_spill] sm:$0xff]  ;;  %v1983_v36 = vld [vmem:[%s2259_s30 + $0xe0] sm:$0xff] }
 0x102   : > { %2029 = vmatmul.msk.f32.gmra.mxu3 %vm295_vm0, %v2291_v18  ;;  %2063 = vmatmul.msk.f32.gmra.mxu0 %vm295_vm0, %v2528_v3 }
 0x104   : > { %v633_v56 = vpop.f32.mrf.mxu2 }
 0x105   : > { %v663_v57 = vadd.f32 %v633_v56, %v502_v12  ;;  %v782_v0 = vpop.f32.mrf.mxu3  ;;  %v2017_v12 = vld [vmem:[%s2259_s30 + $0xe1] sm:$0xff] }
 0x106   : > { %v504_v46 = vpop.f32.mrf.mxu1 }
 0x107   : > { %v812_v30 = vadd.f32 %v782_v0, %v663_v57  ;;  %v933_v63 = vpop.f32.mrf.mxu0  ;;  %v505_v18 = vadd.f32 %v504_v46, %v2564_v19  ;;  %v2051_v57 = vld [vmem:[%s2259_s30 + $0xe2] sm:$0xff]  ;;  %v2854_v46 = vld [vmem:[#allocation5_spill] sm:$0xff] }
 0x109   : > { %v2695_v34 = vadd.f32 %v930_v26, %v812_v30  ;;  %1962 = vmatmul.msk.f32.gmra.mxu1 %vm295_vm0, %v2508_v61  ;;  %1996 = vmatmul.msk.f32.gmra.mxu2 %vm295_vm0, %v2511_v62 }
 0x10a   : > { %2030 = vmatmul.msk.f32.gmra.mxu3 %vm295_vm0, %v2314_v24  ;;  %2064 = vmatmul.msk.f32.gmra.mxu0 %vm295_vm0, %v2548_v9 }
 0x10c   : > { %v636_v58 = vpop.f32.mrf.mxu2 }
 0x10d   : > { %v664_v59 = vadd.f32 %v636_v58, %v505_v18  ;;  %v785_v6 = vpop.f32.mrf.mxu3 }
 0x10e   : > { %v507_v42 = vpop.f32.mrf.mxu1 }
 0x10f   : > { %v813_v11 = vadd.f32 %v785_v6, %v664_v59  ;;  %v936_v48 = vpop.f32.mrf.mxu0  ;;  %v508_v24 = vadd.f32 %v507_v42, %v2587_v32 }
 0x111   : > { %v2706_v49 = vadd.f32 %v933_v63, %v813_v11  ;;  %1963 = vmatmul.msk.f32.gmra.mxu1 %vm295_vm0, %v2528_v3  ;;  %1997 = vmatmul.msk.f32.gmra.mxu2 %vm295_vm0, %v2531_v4 }
 0x112   : > { %2031 = vmatmul.msk.f32.gmra.mxu3 %vm295_vm0, %v2331_v28  ;;  %2065 = vmatmul.msk.f32.gmra.mxu0 %vm295_vm0, %v2571_v25 }
 0x114   : > { %v639_v61 = vpop.f32.mrf.mxu2 }
 0x115   : > { %v665_v62 = vadd.f32 %v639_v61, %v508_v24  ;;  %v788_v19 = vpop.f32.mrf.mxu3 }
 0x116   : > { %v510_v60 = vpop.f32.mrf.mxu1 }
 0x117   : > { %v814_v15 = vadd.f32 %v788_v19, %v665_v62  ;;  %v939_v38 = vpop.f32.mrf.mxu0  ;;  %v511_v28 = vadd.f32 %v510_v60, %v2523_v1  ;;  %v2852_v1 = vld [vmem:[#allocation2_spill] sm:$0xff] }
 0x119   : > { %v2718_v3 = vadd.f32 %v936_v48, %v814_v15  ;;  %1964 = vmatmul.msk.f32.gmra.mxu1 %vm295_vm0, %v2548_v9  ;;  %1998 = vmatmul.msk.f32.gmra.mxu2 %vm295_vm0, %v2551_v13  ;;  %v2049_v9 = vld [vmem:[%s2259_s30 + $0xca] sm:$0xff]  ;;  %s1810_s30 = sshll.u32 %s2866_s16, 5  ;;  %v2767_v15 = vld [vmem:[%s2843_s2] ss:$0 sm:$0xff] }
 0x11a   : > { %2032 = vmatmul.msk.f32.gmra.mxu3 %vm295_vm0, %v2554_v17  ;;  %2066 = vmatmul.msk.f32.gmra.mxu0 %vm295_vm0, %v2048_v39  ;;  %v2851_v13 = vld [vmem:[#allocation4_spill] sm:$0xff]  ;;  %s246_s5 = sadd.s32 %s1810_s30, %s1809_s15 }
 0x11b   : > { %s1811_s7 = sshll.u32 %s246_s5, 3 }
 0x11c   : > { %v642_v4 = vpop.f32.mrf.mxu2  ;;  %s2772_s12 = scalar_lea.vmem %s2844_s3, %s1811_s7 }
 0x11d   : > { %v666_v32 = vadd.f32 %v642_v4, %v511_v28  ;;  %v791_v16 = vpop.f32.mrf.mxu3 }
 0x11e   : > { %v513_v50 = vpop.f32.mrf.mxu1 }
 0x11f   : > { %v815_v51 = vadd.f32 %v791_v16, %v666_v32  ;;  %v942_v2 = vpop.f32.mrf.mxu0  ;;  %v514_v17 = vadd.f32 %v513_v50, %v2852_v1 }
 0x121   : > { %v2729_v20 = vadd.f32 %v939_v38, %v815_v51  ;;  %1965 = vmatmul.msk.f32.gmra.mxu1 %vm295_vm0, %v2571_v25  ;;  %1999 = vmatmul.msk.f32.gmra.mxu2 %vm295_vm0, %v2574_v29 }
 0x122   : > { %2033 = vmatmul.msk.f32.gmra.mxu3 %vm295_vm0, %v2851_v13  ;;  %2067 = vmatmul.msk.f32.gmra.mxu0 %vm295_vm0, %v2049_v9 }
 0x124   : > { %v645_v43 = vpop.f32.mrf.mxu2 }
 0x125   : > { %v667_v7 = vadd.f32 %v645_v43, %v514_v17  ;;  %v794_v23 = vpop.f32.mrf.mxu3 }
 0x126   : > { %v516_v52 = vpop.f32.mrf.mxu1 }
 0x127   : > { %v816_v8 = vadd.f32 %v794_v23, %v667_v7  ;;  %v945_v25 = vpop.f32.mrf.mxu0  ;;  %v517_v27 = vadd.f32 %v516_v52, %v2853_v14 }
 0x129   : > { %v2742_v29 = vadd.f32 %v942_v2, %v816_v8  ;;  %1966 = vmatmul.msk.f32.gmra.mxu1 %vm295_vm0, %v2048_v39  ;;  %2000 = vmatmul.msk.f32.gmra.mxu2 %vm295_vm0, %v1982_v53 }
 0x12a   : > { %2034 = vmatmul.msk.f32.gmra.mxu3 %vm295_vm0, %v2016_v40  ;;  %2068 = vmatmul.msk.f32.gmra.mxu0 %vm295_vm0, %v2050_v41 }
 0x12c   : > { %v648_v54 = vpop.f32.mrf.mxu2 }
 0x12d   : > { %v668_v55 = vadd.f32 %v648_v54, %v517_v27  ;;  %v797_v21 = vpop.f32.mrf.mxu3 }
 0x12e   : > { %v519_v10 = vpop.f32.mrf.mxu1 }
 0x12f   : > { %v817_v26 = vadd.f32 %v797_v21, %v668_v55  ;;  %v948_v56 = vpop.f32.mrf.mxu0  ;;  %v520_v30 = vadd.f32 %v519_v10, %v2854_v46 }
 0x131   : > { %v2753_v0 = vadd.f32 %v945_v25, %v817_v26  ;;  %1967 = vmatmul.msk.f32.gmra.mxu1 %vm295_vm0, %v2049_v9  ;;  %2001 = vmatmul.msk.f32.gmra.mxu2 %vm295_vm0, %v1983_v36 }
 0x132   : > { %2035 = vmatmul.msk.f32.gmra.mxu3 %vm295_vm0, %v2017_v12  ;;  %2069 = vmatmul.msk.f32.gmra.mxu0 %vm295_vm0, %v2051_v57 }
 0x134   : > { %v651_v63 = vpop.f32.mrf.mxu2 }
 0x135   : > { %v669_v18 = vadd.f32 %v651_v63, %v520_v30  ;;  %v800_v58 = vpop.f32.mrf.mxu3 }
 0x136   : > { %v1051_v59 = vpop.f32.mrf.mxu1 }
 0x137   : > { %v818_v6 = vadd.f32 %v800_v58, %v669_v18  ;;  %v1496_v42 = vpop.f32.mrf.mxu0  ;;  %v1099_v48 = vadd.f32 %v1051_v59, %v2599_v31 }
 0x139   : > { %v2760_v11 = vadd.f32 %v948_v56, %v818_v6 }
 0x13c   : > { %v1200_v24 = vpop.f32.mrf.mxu2 }
 0x13d   : > { %v1248_v61 = vadd.f32 %v1200_v24, %v1099_v48  ;;  %v1348_v62 = vpop.f32.mrf.mxu3 }
 0x13e   : > { %v1054_v19 = vpop.f32.mrf.mxu1 }
 0x13f   : > { %v1396_v60 = vadd.f32 %v1348_v62, %v1248_v61  ;;  %v1499_v38 = vpop.f32.mrf.mxu0  ;;  %v1100_v31 = vadd.f32 %v1054_v19, %v2609_v35 }
 0x141   : > { %v1544_v39 = vadd.f32 %v1496_v42, %v1396_v60 }
 0x143   : > { %v1564_v28 = vadd.f32 %v2767_v15, %v1544_v39 }
 0x144   : > { %v1203_v4 = vpop.f32.mrf.mxu2 }
 0x145   : > { %1580 = vst [vmem:[%s2772_s12] sm:$0xff] %v1564_v28  ;;  %v1249_v32 = vadd.f32 %v1203_v4, %v1100_v31  ;;  %v1351_v16 = vpop.f32.mrf.mxu3  ;;  %v1618_v43 = vmul.f32 %v1564_v28, %v1564_v28 }
 0x146   : > { %v1057_v50 = vpop.f32.mrf.mxu1 }
 0x147   : > { %v1397_v51 = vadd.f32 %v1351_v16, %v1249_v32  ;;  %v1502_v2 = vpop.f32.mrf.mxu0  ;;  %v1101_v13 = vadd.f32 %v1057_v50, %v2619_v44 }
 0x149   : > { %v1545_v9 = vadd.f32 %v1499_v38, %v1397_v51 }
 0x14b   : > { %v1565_v1 = vadd.f32 %v2767_v15, %v1545_v9 }
 0x14c   : > { %v1206_v17 = vpop.f32.mrf.mxu2 }
 0x14d   : > { %1581 = vst [vmem:[%s2772_s12 + $0x8] sm:$0xff] %v1565_v1  ;;  %v1596_v7 = vadd.f32 %v1565_v1, %v1564_v28  ;;  %v1619_v35 = vmul.f32 %v1565_v1, %v1565_v1  ;;  %v1250_v23 = vadd.f32 %v1206_v17, %v1101_v13  ;;  %v1354_v52 = vpop.f32.mrf.mxu3 }
 0x14e   : > { %v1060_v53 = vpop.f32.mrf.mxu1 }
 0x14f   : > { %v1634_v8 = vadd.f32 %v1619_v35, %v1618_v43  ;;  %v1398_v40 = vadd.f32 %v1354_v52, %v1250_v23  ;;  %v1505_v25 = vpop.f32.mrf.mxu0  ;;  %v1102_v14 = vadd.f32 %v1060_v53, %v2629_v37 }
 0x151   : > { %v1546_v41 = vadd.f32 %v1502_v2, %v1398_v40 }
 0x153   : > { %v1566_v44 = vadd.f32 %v2767_v15, %v1546_v41 }
 0x154   : > { %v1209_v27 = vpop.f32.mrf.mxu2 }
 0x155   : > { %1582 = vst [vmem:[%s2772_s12 + $0x10] sm:$0xff] %v1566_v44  ;;  %v1597_v54 = vadd.f32 %v1596_v7, %v1566_v44  ;;  %v1620_v55 = vmul.f32 %v1566_v44, %v1566_v44  ;;  %v1251_v21 = vadd.f32 %v1209_v27, %v1102_v14  ;;  %v1357_v10 = vpop.f32.mrf.mxu3 }
 0x156   : > { %v1063_v36 = vpop.f32.mrf.mxu1 }
 0x157   : > { %v1635_v26 = vadd.f32 %v1634_v8, %v1620_v55  ;;  %v1399_v12 = vadd.f32 %v1357_v10, %v1251_v21  ;;  %v1508_v56 = vpop.f32.mrf.mxu0  ;;  %v1103_v46 = vadd.f32 %v1063_v36, %v2640_v33 }
 0x159   : > { %v1547_v57 = vadd.f32 %v1505_v25, %v1399_v12 }
 0x15b   : > { %v1567_v30 = vadd.f32 %v2767_v15, %v1547_v57 }
 0x15c   : > { %v1212_v37 = vpop.f32.mrf.mxu2 }
 0x15d   : > { %1583 = vst [vmem:[%s2772_s12 + $0x18] sm:$0xff] %v1567_v30  ;;  %v1598_v63 = vadd.f32 %v1597_v54, %v1567_v30  ;;  %v1621_v18 = vmul.f32 %v1567_v30, %v1567_v30  ;;  %v1252_v58 = vadd.f32 %v1212_v37, %v1103_v46  ;;  %v1360_v59 = vpop.f32.mrf.mxu3 }
 0x15e   : > { %v1066_v6 = vpop.f32.mrf.mxu1 }
 0x15f   : > { %v1636_v42 = vadd.f32 %v1635_v26, %v1621_v18  ;;  %v1400_v48 = vadd.f32 %v1360_v59, %v1252_v58  ;;  %v1511_v24 = vpop.f32.mrf.mxu0  ;;  %v1104_v62 = vadd.f32 %v1066_v6, %v2651_v5 }
 0x161   : > { %v1548_v61 = vadd.f32 %v1508_v56, %v1400_v48 }
 0x163   : > { %v1568_v19 = vadd.f32 %v2767_v15, %v1548_v61 }
 0x164   : > { %v1215_v33 = vpop.f32.mrf.mxu2 }
 0x165   : > { %1584 = vst [vmem:[%s2772_s12 + $0x20] sm:$0xff] %v1568_v19  ;;  %v1599_v60 = vadd.f32 %v1598_v63, %v1568_v19  ;;  %v1622_v38 = vmul.f32 %v1568_v19, %v1568_v19  ;;  %v1253_v39 = vadd.f32 %v1215_v33, %v1104_v62  ;;  %v1363_v31 = vpop.f32.mrf.mxu3 }
 0x166   : > { %v1069_v28 = vpop.f32.mrf.mxu1 }
 0x167   : > { %v1637_v4 = vadd.f32 %v1636_v42, %v1622_v38  ;;  %v1401_v32 = vadd.f32 %v1363_v31, %v1253_v39  ;;  %v1514_v16 = vpop.f32.mrf.mxu0  ;;  %v1105_v51 = vadd.f32 %v1069_v28, %v2662_v22 }
 0x169   : > { %v1549_v50 = vadd.f32 %v1511_v24, %v1401_v32 }
 0x16b   : > { %v1569_v2 = vadd.f32 %v2767_v15, %v1549_v50 }
 0x16c   : > { %v1218_v5 = vpop.f32.mrf.mxu2 }
 0x16d   : > { %1585 = vst [vmem:[%s2772_s12 + $0x28] sm:$0xff] %v1569_v2  ;;  %v1600_v9 = vadd.f32 %v1599_v60, %v1569_v2  ;;  %v1623_v13 = vmul.f32 %v1569_v2, %v1569_v2  ;;  %v1254_v1 = vadd.f32 %v1218_v5, %v1105_v51  ;;  %v1366_v17 = vpop.f32.mrf.mxu3 }
 0x16e   : > { %v1072_v43 = vpop.f32.mrf.mxu1 }
 0x16f   : > { %v1638_v7 = vadd.f32 %v1637_v4, %v1623_v13  ;;  %v1402_v35 = vadd.f32 %v1366_v17, %v1254_v1  ;;  %v1517_v23 = vpop.f32.mrf.mxu0  ;;  %v1106_v53 = vadd.f32 %v1072_v43, %v2673_v47 }
 0x171   : > { %v1550_v52 = vadd.f32 %v1514_v16, %v1402_v35 }
 0x173   : > { %v1570_v8 = vadd.f32 %v2767_v15, %v1550_v52 }
 0x174   : > { %v1221_v22 = vpop.f32.mrf.mxu2 }
 0x175   : > { %1586 = vst [vmem:[%s2772_s12 + $0x30] sm:$0xff] %v1570_v8  ;;  %v1601_v40 = vadd.f32 %v1600_v9, %v1570_v8  ;;  %v1624_v25 = vmul.f32 %v1570_v8, %v1570_v8  ;;  %v1255_v41 = vadd.f32 %v1221_v22, %v1106_v53  ;;  %v1369_v14 = vpop.f32.mrf.mxu3 }
 0x176   : > { %v1075_v44 = vpop.f32.mrf.mxu1 }
 0x177   : > { %v1639_v27 = vadd.f32 %v1638_v7, %v1624_v25  ;;  %v1403_v54 = vadd.f32 %v1369_v14, %v1255_v41  ;;  %v1520_v55 = vpop.f32.mrf.mxu0  ;;  %v1107_v10 = vadd.f32 %v1075_v44, %v2684_v45 }
 0x179   : > { %v1551_v21 = vadd.f32 %v1517_v23, %v1403_v54 }
 0x17b   : > { %v1571_v36 = vadd.f32 %v2767_v15, %v1551_v21 }
 0x17c   : > { %v1224_v47 = vpop.f32.mrf.mxu2 }
 0x17d   : > { %1587 = vst [vmem:[%s2772_s12 + $0x38] sm:$0xff] %v1571_v36  ;;  %v1602_v26 = vadd.f32 %v1601_v40, %v1571_v36  ;;  %v1625_v12 = vmul.f32 %v1571_v36, %v1571_v36  ;;  %v1256_v56 = vadd.f32 %v1224_v47, %v1107_v10  ;;  %v1372_v57 = vpop.f32.mrf.mxu3 }
 0x17e   : > { %v1078_v46 = vpop.f32.mrf.mxu1 }
 0x17f   : > { %v1640_v30 = vadd.f32 %v1639_v27, %v1625_v12  ;;  %v1404_v37 = vadd.f32 %v1372_v57, %v1256_v56  ;;  %v1523_v63 = vpop.f32.mrf.mxu0  ;;  %v1108_v58 = vadd.f32 %v1078_v46, %v2695_v34 }
 0x181   : > { %v1552_v18 = vadd.f32 %v1520_v55, %v1404_v37 }
 0x183   : > { %v1572_v59 = vadd.f32 %v2767_v15, %v1552_v18 }
 0x184   : > { %v1227_v45 = vpop.f32.mrf.mxu2 }
 0x185   : > { %1588 = vst [vmem:[%s2772_s12 + $0x40] sm:$0xff] %v1572_v59  ;;  %v1603_v6 = vadd.f32 %v1602_v26, %v1572_v59  ;;  %v1626_v42 = vmul.f32 %v1572_v59, %v1572_v59  ;;  %v1257_v48 = vadd.f32 %v1227_v45, %v1108_v58  ;;  %v1375_v24 = vpop.f32.mrf.mxu3 }
 0x186   : > { %v1081_v61 = vpop.f32.mrf.mxu1 }
 0x187   : > { %v1641_v62 = vadd.f32 %v1640_v30, %v1626_v42  ;;  %v1405_v19 = vadd.f32 %v1375_v24, %v1257_v48  ;;  %v1526_v33 = vpop.f32.mrf.mxu0  ;;  %v1109_v38 = vadd.f32 %v1081_v61, %v2706_v49 }
 0x189   : > { %v1553_v60 = vadd.f32 %v1523_v63, %v1405_v19 }
 0x18b   : > { %v1573_v39 = vadd.f32 %v2767_v15, %v1553_v60 }
 0x18c   : > { %v1230_v34 = vpop.f32.mrf.mxu2 }
 0x18d   : > { %1589 = vst [vmem:[%s2772_s12 + $0x48] sm:$0xff] %v1573_v39  ;;  %v1604_v31 = vadd.f32 %v1603_v6, %v1573_v39  ;;  %v1627_v28 = vmul.f32 %v1573_v39, %v1573_v39  ;;  %v1258_v4 = vadd.f32 %v1230_v34, %v1109_v38  ;;  %v1378_v32 = vpop.f32.mrf.mxu3 }
 0x18e   : > { %v1084_v16 = vpop.f32.mrf.mxu1 }
 0x18f   : > { %v1642_v50 = vadd.f32 %v1641_v62, %v1627_v28  ;;  %v1406_v51 = vadd.f32 %v1378_v32, %v1258_v4  ;;  %v1529_v2 = vpop.f32.mrf.mxu0  ;;  %v1110_v9 = vadd.f32 %v1084_v16, %v2718_v3 }
 0x191   : > { %v1554_v5 = vadd.f32 %v1526_v33, %v1406_v51 }
 0x193   : > { %v1574_v13 = vadd.f32 %v2767_v15, %v1554_v5 }
 0x194   : > { %v1233_v49 = vpop.f32.mrf.mxu2 }
 0x195   : > { %1590 = vst [vmem:[%s2772_s12 + $0x50] sm:$0xff] %v1574_v13  ;;  %v1605_v1 = vadd.f32 %v1604_v31, %v1574_v13  ;;  %v1628_v17 = vmul.f32 %v1574_v13, %v1574_v13  ;;  %v1259_v43 = vadd.f32 %v1233_v49, %v1110_v9  ;;  %v1381_v7 = vpop.f32.mrf.mxu3 }
 0x196   : > { %v1087_v35 = vpop.f32.mrf.mxu1 }
 0x197   : > { %v1643_v23 = vadd.f32 %v1642_v50, %v1628_v17  ;;  %v1407_v52 = vadd.f32 %v1381_v7, %v1259_v43  ;;  %v1532_v53 = vpop.f32.mrf.mxu0  ;;  %v1111_v22 = vadd.f32 %v1087_v35, %v2729_v20 }
 0x199   : > { %v1555_v8 = vadd.f32 %v1529_v2, %v1407_v52 }
 0x19b   : > { %v1575_v40 = vadd.f32 %v2767_v15, %v1555_v8 }
 0x19c   : > { %v1236_v3 = vpop.f32.mrf.mxu2 }
 0x19d   : > { %1591 = vst [vmem:[%s2772_s12 + $0x58] sm:$0xff] %v1575_v40  ;;  %v1606_v25 = vadd.f32 %v1605_v1, %v1575_v40  ;;  %v1629_v41 = vmul.f32 %v1575_v40, %v1575_v40  ;;  %v1260_v14 = vadd.f32 %v1236_v3, %v1111_v22  ;;  %v1384_v44 = vpop.f32.mrf.mxu3 }
 0x19e   : > { %v1090_v27 = vpop.f32.mrf.mxu1 }
 0x19f   : > { %v1644_v54 = vadd.f32 %v1643_v23, %v1629_v41  ;;  %v1408_v55 = vadd.f32 %v1384_v44, %v1260_v14  ;;  %v1535_v10 = vpop.f32.mrf.mxu0  ;;  %v1112_v36 = vadd.f32 %v1090_v27, %v2742_v29 }
 0x1a1   : > { %v1556_v21 = vadd.f32 %v1532_v53, %v1408_v55 }
 0x1a3   : > { %v1576_v47 = vadd.f32 %v2767_v15, %v1556_v21 }
 0x1a4   : > { %v1239_v20 = vpop.f32.mrf.mxu2 }
 0x1a5   : > { %1592 = vst [vmem:[%s2772_s12 + $0x60] sm:$0xff] %v1576_v47  ;;  %v1607_v26 = vadd.f32 %v1606_v25, %v1576_v47  ;;  %v1630_v12 = vmul.f32 %v1576_v47, %v1576_v47  ;;  %v1261_v56 = vadd.f32 %v1239_v20, %v1112_v36  ;;  %v1387_v57 = vpop.f32.mrf.mxu3 }
 0x1a6   : > { %v1093_v46 = vpop.f32.mrf.mxu1 }
 0x1a7   : > { %v1645_v30 = vadd.f32 %v1644_v54, %v1630_v12  ;;  %v1409_v37 = vadd.f32 %v1387_v57, %v1261_v56  ;;  %v1113_v18 = vadd.f32 %v1093_v46, %v2753_v0  ;;  %v1538_v29 = vpop.f32.mrf.mxu0 }
 0x1a9   : > { %v1557_v63 = vadd.f32 %v1535_v10, %v1409_v37 }
 0x1ab   : > { %v1577_v58 = vadd.f32 %v2767_v15, %v1557_v63 }
 0x1ac   : > { %v1242_v59 = vpop.f32.mrf.mxu2 }
 0x1ad   : > { %1593 = vst [vmem:[%s2772_s12 + $0x68] sm:$0xff] %v1577_v58  ;;  %v1608_v45 = vadd.f32 %v1607_v26, %v1577_v58  ;;  %v1631_v6 = vmul.f32 %v1577_v58, %v1577_v58  ;;  %v1262_v42 = vadd.f32 %v1242_v59, %v1113_v18  ;;  %v1390_v48 = vpop.f32.mrf.mxu3 }
 0x1ae   : > { %v1096_v62 = vpop.f32.mrf.mxu1 }
 0x1af   : > { %v1646_v24 = vadd.f32 %v1645_v30, %v1631_v6  ;;  %v1410_v61 = vadd.f32 %v1390_v48, %v1262_v42  ;;  %v1114_v33 = vadd.f32 %v1096_v62, %v2760_v11  ;;  %v1541_v28 = vpop.f32.mrf.mxu0 }
 0x1b1   : > { %v1558_v19 = vadd.f32 %v1538_v29, %v1410_v61 }
 0x1b3   : > { %v1578_v0 = vadd.f32 %v2767_v15, %v1558_v19 }
 0x1b4   : > { %v1245_v60 = vpop.f32.mrf.mxu2 }
 0x1b5   : > { %1594 = vst [vmem:[%s2772_s12 + $0x70] sm:$0xff] %v1578_v0  ;;  %v1609_v38 = vadd.f32 %v1608_v45, %v1578_v0  ;;  %v1632_v39 = vmul.f32 %v1578_v0, %v1578_v0  ;;  %v1263_v34 = vadd.f32 %v1245_v60, %v1114_v33  ;;  %v1393_v31 = vpop.f32.mrf.mxu3 }
 0x1b7   : > { %v1647_v4 = vadd.f32 %v1646_v24, %v1632_v39  ;;  %v1411_v32 = vadd.f32 %v1393_v31, %v1263_v34 }
 0x1b9   : > { %v1559_v16 = vadd.f32 %v1541_v28, %v1411_v32 }
 0x1bb   : > { %v1579_v50 = vadd.f32 %v2767_v15, %v1559_v16 }
 0x1bd   : > { %1595 = vst [vmem:[%s2772_s12 + $0x78] sm:$0xff] %v1579_v50  ;;  %v1610_v51 = vadd.f32 %v1609_v38, %v1579_v50  ;;  %v1633_v2 = vmul.f32 %v1579_v50, %v1579_v50 }
 0x1bf   : > { %v1611_v11 = vrot.slane %v1610_v51, 4  ;;  %v1648_v5 = vadd.f32 %v1647_v4, %v1633_v2 }
 0x1c1   : > { %v1612_v9 = vadd.f32 %v1611_v11, %v1610_v51  ;;  %v1649_v13 = vrot.slane %v1648_v5, 4 }
 0x1c3   : > { %v1613_v49 = vrot.slane %v1612_v9, 2  ;;  %v1650_v1 = vadd.f32 %v1649_v13, %v1648_v5 }
 0x1c5   : > { %v1614_v17 = vadd.f32 %v1613_v49, %v1612_v9  ;;  %v1651_v43 = vrot.slane %v1650_v1, 2 }
 0x1c7   : > { %v1615_v7 = vrot.slane %v1614_v17, 1  ;;  %v1652_v35 = vadd.f32 %v1651_v43, %v1650_v1 }
 0x1c9   : > { %v1616_v15 = vadd.f32 %v1615_v7, %v1614_v17  ;;  %v1653_v23 = vrot.slane %v1652_v35, 1 }
 0x1cb   : > { %1617 = vst [vmem:[%s257_s25] sm:$0x1] %v1616_v15  ;;  %v1654_v52 = vadd.f32 %v1653_v23, %v1652_v35 }
 0x1cd   : > { %1655 = vst [vmem:[%s257_s25 + $0x1] sm:$0x1] %v1654_v52 }
 0x1ce PF: > { %s15_s19 = sadd.s32 1, %s2159_s19   ;;  %s2855_s15 = smov %s2151_s17 }
 0x1cf   : > { %p12_p8 = scmp.ge.s32.totalorder %s15_s19, 6   ;;  %s2856_s16 = smov %s2155_s18 }
 0x1d0   : > { %s2857_s17 = smov %s2860_s20  ;;  %s2858_s18 = smov %s2864_s21 }
 0x1d1   :  { %14 = sbr.rel (!%p12_p8) target bundleno = 3 (0x3), region = 84 }

// kernel: unet_up_block_forward.7
= control target key start
LH: loop header
LB: loop body
LE: loop exit
PB: predicated region body
PF: predicated region fallthrough
CT: control target
= control target key end

     0   :  { %s818_s18 = smov 0   ;;  %s820_s19 = smov 0   ;;  %s998_s0 = inlined_call_operand.vmem [shape: f32[2,16,16,128], index: 0, kind: input, shape index: {}]   ;;  %s999_s1 = inlined_call_operand.vmem [shape: f32[2,128], index: 1, kind: input, shape index: {}]   ;;  %s1000_s2 = inlined_call_operand.vmem [shape: f32[2,16,16,16], index: 2, kind: input, shape index: {}]   ;;  %s1001_s3 = inlined_call_operand.vmem [shape: f32[16,128], index: 3, kind: input, shape index: {}]   ;;  %s1002_s4 = inlined_call_operand.vmem [shape: f32[1,128], index: 4, kind: input, shape index: {}]   ;;  %s1003_s5 = inlined_call_operand.vmem [shape: f32[2,16,16,128], index: 5, kind: output, shape index: {}]  }
   0x1   :  { %s822_s20 = smov 0   ;;  %s824_s21 = smov 0  }
   0x2   :  { %s826_s22 = smov 0  }
   0x3 LB: > { %s24_s23 = sadd.s32 1, %s778_s20  ;;  %s27_s24 = sadd.s32 1, %s782_s21  ;;  %s786_s22 = sphi %s826_s22, %s15_s22   ;;  %s782_s21 = sphi %s824_s21, %s1007_s21   ;;  %s778_s20 = sphi %s822_s20, %s1006_s20   ;;  %s774_s19 = sphi %s820_s19, %s1005_s19   ;;  %s770_s18 = sphi %s818_s18, %s1004_s18  }
   0x4   : > { %p25_p0 = scmp.ge.s32.totalorder %s24_s23, 2  ;;  %p668_p1 = scmp.ge.s32.totalorder %s786_s22, 1 }
   0x5   : > { %p227_p2 = scmp.lt.s32.totalorder %s786_s22, 5 }
   0x6   : > { %s1009_s23 = smov (%p25_p0, %s24_s23), 0  ;;  %s1011_s24 = smov (!%p25_p0, %s27_s24), %s782_s21 }
   0x7   : > { %p228_p3 = pnand %p668_p1, %p227_p2  ;;  %p29_p4 = scmp.ge.s32.totalorder %s1011_s24, 2 }
   0x8   : > { %s669_s29 = sshll.u32 (!%p228_p3), %s770_s18, 3  ;;  %p276_p5 = scmp.lt.s32.totalorder (!%p228_p3), %s774_s19, 1 }
   0x9   : > { %s1013_s24 = smov (%p29_p4, %s1011_s24), 0  ;;  %231 = sbr.rel (%p228_p3) target bundleno = 182 (0xb6), region = 40 }
   0xa   : > { %p278_p6 = scmp.lt.s32.totalorder (!%p228_p3), %s669_s29, 15 }
   0xe   : > { %v393_v0 = vld [vmem:[%s1001_s3 + $0x8] sm:$0xff]  ;;  %v392_v1 = vld [vmem:[%s1001_s3] sm:$0xff]  ;;  %s1015_s19 = smov (!%p276_p5, %s774_s19), 1  ;;  %s1017_s29 = smov (!%p278_p6, %s669_s29), 15  ;;  %vm398_vm0 = vcmask 130048  }
   0xf   : > { %700 = vmatpush.msra.mxu2 %v393_v0  ;;  %701 = vmatpush.msra.mxu3 %v393_v0  ;;  %s671_s30 = sshll.u32 %s1015_s19, 5  ;;  %s670_s6 = sshll.u32 %s1017_s29, 1  ;;  %v885_v18 = vld [vmem:[%s999_s1] ss:$0 sm:$0xff]  ;;  %v893_v22 = vld [vmem:[%s999_s1 + $0x1] ss:$0 sm:$0xff] }
  0x10   : > { %461 = vmatpush.msra.mxu0 %v393_v0  ;;  %699 = vmatpush.msra.mxu1 %v393_v0  ;;  %s282_s7 = sadd.s32 %s671_s30, %s670_s6  ;;  %v907_v32 = vld [vmem:[%s1002_s4] ss:$0 sm:$0xff] }
  0x11   : > { %703 = vmatpush.msra.mxu2 %v392_v1  ;;  %704 = vmatpush.msra.mxu3 %v392_v1  ;;  %s854_s8 = sshll.u32 %s282_s7, 3 }
  0x12   : > { %462 = vmatpush.msra.mxu0 %v392_v1  ;;  %702 = vmatpush.msra.mxu1 %v392_v1  ;;  %s295_s11 = scalar_lea.vmem %s1000_s2, %s854_s8  ;;  %s880_s14 = scalar_lea.vmem %s998_s0, %s854_s8 }
  0x13   : > { %v384_v2 = vld [vmem:[%s295_s11 + $0x40] sm:$0xff]  ;;  %v385_v6 = vld [vmem:[%s295_s11 + $0x48] sm:$0xff]  ;;  %v386_v10 = vld [vmem:[%s295_s11 + $0x50] sm:$0xff]  ;;  %s921_s28 = scalar_lea.vmem %s1003_s5, %s854_s8 }
  0x14   : > { %v388_v3 = vld [vmem:[%s295_s11 + $0x60] sm:$0xff]  ;;  %689 = vmatmul.msk.f32.vlgmr.msra.gmra.mxu2 %vm398_vm0, %v384_v2  ;;  %v389_v7 = vld [vmem:[%s295_s11 + $0x68] sm:$0xff]  ;;  %v390_v11 = vld [vmem:[%s295_s11 + $0x70] sm:$0xff] }
  0x15   : > { %v376_v4 = vld [vmem:[%s295_s11] sm:$0xff]  ;;  %693 = vmatmul.msk.f32.vlgmr.msra.gmra.mxu3 %vm398_vm0, %v388_v3  ;;  %v377_v8 = vld [vmem:[%s295_s11 + $0x8] sm:$0xff]  ;;  %v378_v12 = vld [vmem:[%s295_s11 + $0x10] sm:$0xff] }
  0x16   : > { %v380_v5 = vld [vmem:[%s295_s11 + $0x20] sm:$0xff]  ;;  %681 = vmatmul.msk.f32.vlgmr.msra.gmra.mxu0 %vm398_vm0, %v376_v4  ;;  %v381_v9 = vld [vmem:[%s295_s11 + $0x28] sm:$0xff]  ;;  %v382_v13 = vld [vmem:[%s295_s11 + $0x30] sm:$0xff] }
  0x17   : > { %685 = vmatmul.msk.f32.vlgmr.msra.gmra.mxu1 %vm398_vm0, %v380_v5  ;;  %v387_v14 = vld [vmem:[%s295_s11 + $0x58] sm:$0xff]  ;;  %v310_v19 = vld [vmem:[%s880_s14] sm:$0xff]  ;;  %v311_v30 = vld [vmem:[%s880_s14 + $0x8] sm:$0xff] }
  0x18   : > { %v391_v15 = vld [vmem:[%s295_s11 + $0x78] sm:$0xff]  ;;  %v314_v20 = vld [vmem:[%s880_s14 + $0x20] sm:$0xff]  ;;  %v327_v21 = vmul.f32 %v885_v18, %v310_v19  ;;  %v315_v31 = vld [vmem:[%s880_s14 + $0x28] sm:$0xff]  ;;  %v328_v35 = vmul.f32 %v885_v18, %v311_v30 }
  0x19   : > { %v379_v16 = vld [vmem:[%s295_s11 + $0x18] sm:$0xff]  ;;  %v331_v23 = vmul.f32 %v885_v18, %v314_v20  ;;  %v318_v24 = vld [vmem:[%s880_s14 + $0x40] sm:$0xff]  ;;  %v332_v36 = vmul.f32 %v885_v18, %v315_v31  ;;  %v319_v43 = vld [vmem:[%s880_s14 + $0x48] sm:$0xff] }
  0x1a   : > { %v383_v17 = vld [vmem:[%s295_s11 + $0x38] sm:$0xff]  ;;  %v322_v25 = vld [vmem:[%s880_s14 + $0x60] sm:$0xff]  ;;  %v344_v26 = vadd.f32 %v893_v22, %v327_v21  ;;  %v335_v28 = vmul.f32 %v885_v18, %v318_v24  ;;  %v323_v44 = vld [vmem:[%s880_s14 + $0x68] sm:$0xff]  ;;  %v345_v47 = vadd.f32 %v893_v22, %v328_v35  ;;  %v336_v51 = vmul.f32 %v885_v18, %v319_v43 }
  0x1b   : > { %v348_v27 = vadd.f32 %v893_v22, %v331_v23  ;;  %v339_v29 = vmul.f32 %v885_v18, %v322_v25  ;;  %v349_v48 = vadd.f32 %v893_v22, %v332_v36  ;;  %v340_v52 = vmul.f32 %v885_v18, %v323_v44  ;;  %v312_v53 = vld [vmem:[%s880_s14 + $0x10] sm:$0xff]  ;;  %v317_v19 = vld [vmem:[%s880_s14 + $0x38] sm:$0xff] }
  0x1c   : > { %690 = vmatmul.msk.f32.gmra.mxu2 %vm398_vm0, %v385_v6  ;;  %v360_v33 = vmax.f32 %v344_v26, 0.0  ;;  %v352_v39 = vadd.f32 %v893_v22, %v335_v28  ;;  %v316_v54 = vld [vmem:[%s880_s14 + $0x30] sm:$0xff]  ;;  %v361_v59 = vmax.f32 %v345_v47, 0.0  ;;  %v329_v61 = vmul.f32 %v885_v18, %v312_v53 }
  0x1d   : > { %694 = vmatmul.msk.f32.gmra.mxu3 %vm398_vm0, %v389_v7  ;;  %v364_v34 = vmax.f32 %v348_v27, 0.0  ;;  %v356_v40 = vadd.f32 %v893_v22, %v339_v29  ;;  %v365_v60 = vmax.f32 %v349_v48, 0.0  ;;  %v333_v62 = vmul.f32 %v885_v18, %v316_v54  ;;  %v320_v7 = vld [vmem:[%s880_s14 + $0x50] sm:$0xff] }
  0x1e   : > { %682 = vmatmul.msk.f32.gmra.mxu0 %vm398_vm0, %v377_v8  ;;  %v368_v49 = vmax.f32 %v352_v39, 0.0  ;;  %v353_v3 = vadd.f32 %v893_v22, %v336_v51  ;;  %v357_v4 = vadd.f32 %v893_v22, %v340_v52  ;;  %v324_v8 = vld [vmem:[%s880_s14 + $0x70] sm:$0xff]  ;;  %v334_v28 = vmul.f32 %v885_v18, %v317_v19  ;;  %v325_v39 = vld [vmem:[%s880_s14 + $0x78] sm:$0xff] }
  0x1f   : > { %686 = vmatmul.msk.f32.gmra.mxu1 %vm398_vm0, %v381_v9  ;;  %v372_v50 = vmax.f32 %v356_v40, 0.0  ;;  %v342_v47 = vmul.f32 %v885_v18, %v325_v39 }
  0x20   : > { %v351_v43 = vadd.f32 %v893_v22, %v334_v28 }
  0x22   : > { %v367_v53 = vmax.f32 %v351_v43, 0.0 }
  0x24   : > { %691 = vmatmul.msk.f32.gmra.mxu2 %vm398_vm0, %v386_v10 }
  0x25   : > { %695 = vmatmul.msk.f32.gmra.mxu3 %vm398_vm0, %v390_v11  ;;  %v346_v11 = vadd.f32 %v893_v22, %v329_v61 }
  0x26   : > { %683 = vmatmul.msk.f32.gmra.mxu0 %vm398_vm0, %v378_v12  ;;  %v350_v12 = vadd.f32 %v893_v22, %v333_v62 }
  0x27   : > { %687 = vmatmul.msk.f32.gmra.mxu1 %vm398_vm0, %v382_v13  ;;  %v369_v13 = vmax.f32 %v353_v3, 0.0  ;;  %v362_v25 = vmax.f32 %v346_v11, 0.0 }
  0x28   : > { %v366_v26 = vmax.f32 %v350_v12, 0.0 }
  0x2c   : > { %692 = vmatmul.msk.f32.gmra.mxu2 %vm398_vm0, %v387_v14  ;;  %v373_v14 = vmax.f32 %v357_v4, 0.0 }
  0x2d   : > { %696 = vmatmul.msk.f32.gmra.mxu3 %vm398_vm0, %v391_v15  ;;  %v337_v15 = vmul.f32 %v885_v18, %v320_v7 }
  0x2e   : > { %684 = vmatmul.msk.f32.gmra.mxu0 %vm398_vm0, %v379_v16  ;;  %v341_v16 = vmul.f32 %v885_v18, %v324_v8 }
  0x2f   : > { %688 = vmatmul.msk.f32.gmra.mxu1 %vm398_vm0, %v383_v17  ;;  %v313_v17 = vld [vmem:[%s880_s14 + $0x18] sm:$0xff] }
  0x30   : > { %v330_v27 = vmul.f32 %v885_v18, %v313_v17  ;;  %v358_v35 = vadd.f32 %v893_v22, %v341_v16 }
  0x93   : > { %v464_v37 = vpop.f32.mrf.mxu0 }
  0x94   : > { %v476_v38 = vpop.f32.mrf.mxu1  ;;  %v465_v41 = vadd.f32 %v907_v32, %v464_v37 }
  0x95   : > { %v477_v42 = vadd.f32 %v907_v32, %v476_v38  ;;  %v321_v38 = vld [vmem:[%s880_s14 + $0x58] sm:$0xff] }
  0x96   : > { %v512_v45 = vadd.f32 %v465_v41, %v360_v33 }
  0x97   : > { %v516_v46 = vadd.f32 %v477_v42, %v364_v34  ;;  %v488_v55 = vpop.f32.mrf.mxu2  ;;  %v354_v34 = vadd.f32 %v893_v22, %v337_v15  ;;  %v347_v42 = vadd.f32 %v893_v22, %v330_v27 }
  0x98   : > { %528 = vst [vmem:[%s921_s28] sm:$0xff] %v512_v45  ;;  %v500_v56 = vpop.f32.mrf.mxu3  ;;  %v489_v57 = vadd.f32 %v907_v32, %v488_v55  ;;  %v374_v45 = vmax.f32 %v358_v35, 0.0 }
  0x99   : > { %532 = vst [vmem:[%s921_s28 + $0x20] sm:$0xff] %v516_v46  ;;  %v501_v58 = vadd.f32 %v907_v32, %v500_v56  ;;  %v370_v44 = vmax.f32 %v354_v34, 0.0  ;;  %v338_v46 = vmul.f32 %v885_v18, %v321_v38  ;;  %v363_v52 = vmax.f32 %v347_v42, 0.0 }
  0x9a   : > { %v520_v63 = vadd.f32 %v489_v57, %v368_v49 }
  0x9b   : > { %v524_v0 = vadd.f32 %v501_v58, %v372_v50  ;;  %v467_v1 = vpop.f32.mrf.mxu0  ;;  %v355_v18 = vadd.f32 %v893_v22, %v338_v46  ;;  %v359_v58 = vadd.f32 %v893_v22, %v342_v47 }
  0x9c   : > { %v479_v2 = vpop.f32.mrf.mxu1  ;;  %v468_v5 = vadd.f32 %v907_v32, %v467_v1  ;;  %536 = vst [vmem:[%s921_s28 + $0x40] sm:$0xff] %v520_v63 }
  0x9d   : > { %v480_v6 = vadd.f32 %v907_v32, %v479_v2  ;;  %540 = vst [vmem:[%s921_s28 + $0x60] sm:$0xff] %v524_v0  ;;  %v371_v63 = vmax.f32 %v355_v18, 0.0  ;;  %v375_v0 = vmax.f32 %v359_v58, 0.0 }
  0x9e   : > { %v513_v9 = vadd.f32 %v468_v5, %v361_v59 }
  0x9f   : > { %v517_v10 = vadd.f32 %v480_v6, %v365_v60  ;;  %v491_v20 = vpop.f32.mrf.mxu2 }
  0xa0   : > { %529 = vst [vmem:[%s921_s28 + $0x8] sm:$0xff] %v513_v9  ;;  %v503_v21 = vpop.f32.mrf.mxu3  ;;  %v492_v23 = vadd.f32 %v907_v32, %v491_v20 }
  0xa1   : > { %533 = vst [vmem:[%s921_s28 + $0x28] sm:$0xff] %v517_v10  ;;  %v504_v24 = vadd.f32 %v907_v32, %v503_v21 }
  0xa2   : > { %v521_v29 = vadd.f32 %v492_v23, %v369_v13 }
  0xa3   : > { %v525_v30 = vadd.f32 %v504_v24, %v373_v14  ;;  %v470_v31 = vpop.f32.mrf.mxu0 }
  0xa4   : > { %v482_v33 = vpop.f32.mrf.mxu1  ;;  %v471_v36 = vadd.f32 %v907_v32, %v470_v31  ;;  %537 = vst [vmem:[%s921_s28 + $0x48] sm:$0xff] %v521_v29 }
  0xa5   : > { %v483_v37 = vadd.f32 %v907_v32, %v482_v33  ;;  %541 = vst [vmem:[%s921_s28 + $0x68] sm:$0xff] %v525_v30 }
  0xa6   : > { %v514_v40 = vadd.f32 %v471_v36, %v362_v25 }
  0xa7   : > { %v518_v41 = vadd.f32 %v483_v37, %v366_v26  ;;  %v494_v48 = vpop.f32.mrf.mxu2 }
  0xa8   : > { %530 = vst [vmem:[%s921_s28 + $0x10] sm:$0xff] %v514_v40  ;;  %v506_v49 = vpop.f32.mrf.mxu3  ;;  %v495_v50 = vadd.f32 %v907_v32, %v494_v48 }
  0xa9   : > { %534 = vst [vmem:[%s921_s28 + $0x30] sm:$0xff] %v518_v41  ;;  %v507_v51 = vadd.f32 %v907_v32, %v506_v49 }
  0xaa   : > { %v522_v54 = vadd.f32 %v495_v50, %v370_v44 }
  0xab   : > { %v526_v55 = vadd.f32 %v507_v51, %v374_v45  ;;  %v473_v56 = vpop.f32.mrf.mxu0 }
  0xac   : > { %v485_v57 = vpop.f32.mrf.mxu1  ;;  %v474_v59 = vadd.f32 %v907_v32, %v473_v56  ;;  %538 = vst [vmem:[%s921_s28 + $0x50] sm:$0xff] %v522_v54 }
  0xad   : > { %v486_v60 = vadd.f32 %v907_v32, %v485_v57  ;;  %542 = vst [vmem:[%s921_s28 + $0x70] sm:$0xff] %v526_v55 }
  0xae   : > { %v515_v61 = vadd.f32 %v474_v59, %v363_v52 }
  0xaf   : > { %v519_v62 = vadd.f32 %v486_v60, %v367_v53  ;;  %v497_v1 = vpop.f32.mrf.mxu2 }
  0xb0   : > { %531 = vst [vmem:[%s921_s28 + $0x18] sm:$0xff] %v515_v61  ;;  %v509_v2 = vpop.f32.mrf.mxu3  ;;  %v498_v3 = vadd.f32 %v907_v32, %v497_v1 }
  0xb1   : > { %535 = vst [vmem:[%s921_s28 + $0x38] sm:$0xff] %v519_v62  ;;  %v510_v22 = vadd.f32 %v907_v32, %v509_v2 }
  0xb2   : > { %v523_v4 = vadd.f32 %v498_v3, %v371_v63 }
  0xb3   : > { %v527_v5 = vadd.f32 %v510_v22, %v375_v0 }
  0xb4   : > { %539 = vst [vmem:[%s921_s28 + $0x58] sm:$0xff] %v523_v4 }
  0xb5   : > { %543 = vst [vmem:[%s921_s28 + $0x78] sm:$0xff] %v527_v5 }
  0xb6 PF: > { %s15_s22 = sadd.s32 1, %s786_s22   ;;  %s1004_s18 = smov %s778_s20 }
  0xb7   : > { %p12_p7 = scmp.ge.s32.totalorder %s15_s22, 6   ;;  %s1005_s19 = smov %s782_s21 }
  0xb8   : > { %s1006_s20 = smov %s1009_s23  ;;  %s1007_s21 = smov %s1013_s24 }
  0xb9   :  { %14 = sbr.rel (!%p12_p7) target bundleno = 3 (0x3), region = 73 }

// kernel: unet_up_block_forward.6
= control target key start
LH: loop header
LB: loop body
LE: loop exit
PB: predicated region body
PF: predicated region fallthrough
CT: control target
= control target key end

     0   :  { %s2424_s27 = smov 0   ;;  %s2426_s28 = smov 0   ;;  %s4036_s0 = inlined_call_operand.vmem [shape: f32[2,2,10,18,128], index: 0, kind: input, shape index: {}]   ;;  %s4037_s1 = inlined_call_operand.vmem [shape: f32[2,128], index: 1, kind: input, shape index: {}]   ;;  %s4038_s2 = inlined_call_operand.vmem [shape: f32[2,1,16], index: 2, kind: input, shape index: {}]   ;;  %s4039_s3 = inlined_call_operand.vmem [shape: f32[16,256], index: 3, kind: input, shape index: {}]   ;;  %s4040_s4 = inlined_call_operand.vmem [shape: f32[1,256], index: 4, kind: input, shape index: {}]   ;;  %s4041_s5 = inlined_call_operand.vmem [shape: f32[9,128,128], index: 5, kind: input, shape index: {}]   ;;  %s4042_s6 = inlined_call_operand.vmem [shape: f32[1,128], index: 6, kind: input, shape index: {}]   ;;  %s4043_s7 = inlined_call_operand.vmem [shape: f32[2,16,16,128], index: 7, kind: output, shape index: {0}]   ;;  %s4044_s8 = inlined_call_operand.vmem [shape: f32[2,2,2,128], index: 8, kind: output, shape index: {1}]  }
   0x1   :  { %s2428_s29 = smov 0   ;;  %s2430_s30 = smov 0  }
   0x2   :  { %s2432_s9 = smov 0  }
   0x3 LB: > { %s28_s10 = sadd.s32 1, %s2369_s29  ;;  %s31_s11 = sadd.s32 1, %s2373_s30  ;;  %s2377_s9 = sphi %s2432_s9, %s19_s9   ;;  %s2373_s30 = sphi %s2430_s30, %s4171_s30   ;;  %s2369_s29 = sphi %s2428_s29, %s4170_s29   ;;  %s2365_s28 = sphi %s2426_s28, %s4169_s28   ;;  %s2361_s27 = sphi %s2424_s27, %s4168_s27  }
   0x4   : > { %p29_p0 = scmp.ge.s32.totalorder %s28_s10, 2  ;;  %p2055_p1 = scmp.ge.s32.totalorder %s2377_s9, 1 }
   0x5   : > { %p295_p2 = scmp.lt.s32.totalorder %s2377_s9, 5 }
   0x6   : > { %s4173_s10 = smov (%p29_p0, %s28_s10), 0  ;;  %s4175_s11 = smov (!%p29_p0, %s31_s11), %s2373_s30 }
   0x7   : > { %p296_p3 = pnand %p2055_p1, %p295_p2  ;;  %p33_p4 = scmp.ge.s32.totalorder %s4175_s11, 2 }
   0x9   : > { %s4177_s11 = smov (%p33_p4, %s4175_s11), 0  ;;  %299 = sbr.rel (%p296_p3) target bundleno = 626 (0x272), region = 48 }
   0xe   : > { %v384_v0 = vld [vmem:[%s4039_s3 + $0x10] sm:$0xff]  ;;  %v382_v1 = vld [vmem:[%s4039_s3] sm:$0xff]  ;;  %p349_p5 = scmp.lt.s32.totalorder %s2365_s28, 1  ;;  %v385_v2 = vld [vmem:[%s4039_s3 + $0x18] sm:$0xff]  ;;  %vm392_vm0 = vcmask 130048   ;;  %p351_p6 = scmp.lt.s32.totalorder %s2361_s27, 1  ;;  %v642_v31 = vlaneseq }
   0xf   : > { %410 = vmatpush.msra.mxu0 %v384_v0  ;;  %430 = vmatpush.msra.mxu1 %v385_v2  ;;  %v383_v3 = vld [vmem:[%s4039_s3 + $0x8] sm:$0xff]  ;;  %v2093_v4 = vld [vmem:[%s4041_s5 + $0xf8] sm:$0xff]  ;;  %v2092_v5 = vld [vmem:[%s4041_s5 + $0xf0] sm:$0xff]  ;;  %s2543_s25 = sshll.u32 %s2361_s27, 3 }
  0x10   : > { %s4179_s28 = smov (!%p349_p5, %s2365_s28), 1  ;;  %2209 = vmatpush.msra.mxu2 %v2093_v4  ;;  %2210 = vmatpush.msra.mxu3 %v2093_v4  ;;  %v2091_v8 = vld [vmem:[%s4041_s5 + $0xe8] sm:$0xff]  ;;  %v2090_v9 = vld [vmem:[%s4041_s5 + $0xe0] sm:$0xff]  ;;  %v2089_v10 = vld [vmem:[%s4041_s5 + $0xd8] sm:$0xff]  ;;  %v2559_v30 = vstv %s2543_s25  ;;  %v643_v44 = vshrl.u32 %v642_v31, 7  ;;  %p364_p7 = scmp.lt.s32.totalorder %s2543_s25, 15 }
  0x11   : > { %411 = vmatpush.msra.mxu0 %v382_v1  ;;  %431 = vmatpush.msra.mxu1 %v383_v3  ;;  %s360_s26 = scalar_lea.vmem %s4038_s2, %s4179_s28  ;;  %v2088_v11 = vld [vmem:[%s4041_s5 + $0xd0] sm:$0xff]  ;;  %v2087_v12 = vld [vmem:[%s4041_s5 + $0xc8] sm:$0xff]  ;;  %v2086_v13 = vld [vmem:[%s4041_s5 + $0xc0] sm:$0xff]  ;;  %s2257_s18 = smul.u32 60, %s4179_s28  ;;  %v625_v42 = vadd.s32 2, %v2559_v30  ;;  %v2585_v43 = vadd.s32 4294967295, %v2559_v30 }
  0x12   : > { %v380_v6 = vld [vmem:[%s360_s26] sm:$0x1]  ;;  %2212 = vmatpush.msra.mxu2 %v2092_v5  ;;  %2213 = vmatpush.msra.mxu3 %v2092_v5  ;;  %v2085_v14 = vld [vmem:[%s4041_s5 + $0xb8] sm:$0xff]  ;;  %v2084_v15 = vld [vmem:[%s4041_s5 + $0xb0] sm:$0xff]  ;;  %s2512_s17 = scalar_select %p351_p6, %s2361_s27, 1  ;;  %v626_v50 = vadd.s32 3, %v2559_v30 }
  0x13   : > { %2208 = vmatpush.msrb.mxu1 %v2093_v4  ;;  %870 = vmatpush.msrb.mxu0 %v2093_v4  ;;  %v381_v7 = vmax.f32 %v380_v6, 0.0  ;;  %v2083_v16 = vld [vmem:[%s4041_s5 + $0xa8] sm:$0xff]  ;;  %v2082_v17 = vld [vmem:[%s4041_s5 + $0xa0] sm:$0xff]  ;;  %v2081_v18 = vld [vmem:[%s4041_s5 + $0x98] sm:$0xff]  ;;  %v2597_v53 = vadd.s32 4294967295, %v643_v44  ;;  %v2607_v58 = vadd.s32 4294967295, %v625_v42 }
  0x14   : > { %2215 = vmatpush.msra.mxu2 %v2091_v8  ;;  %2216 = vmatpush.msra.mxu3 %v2091_v8  ;;  %s2256_s21 = smul.u32 30, %s2512_s17  ;;  %v2080_v19 = vld [vmem:[%s4041_s5 + $0x90] sm:$0xff]  ;;  %v2079_v20 = vld [vmem:[%s4041_s5 + $0x88] sm:$0xff]  ;;  %v2078_v21 = vld [vmem:[%s4041_s5 + $0x80] sm:$0xff]  ;;  %v628_v59 = vadd.s32 5, %v2559_v30  ;;  %vm649_vm1 = vcmp.ge.s32.totalorder %v2585_v43, 0 }
  0x15   : > { %2211 = vmatpush.msrb.mxu1 %v2092_v5  ;;  %871 = vmatpush.msrb.mxu0 %v2092_v5  ;;  %v2125_v22 = vld [vmem:[%s4041_s5 + $0x1f8] sm:$0xff]  ;;  %v2124_v23 = vld [vmem:[%s4041_s5 + $0x1f0] sm:$0xff]  ;;  %v2123_v24 = vld [vmem:[%s4041_s5 + $0x1e8] sm:$0xff]  ;;  %vm659_vm2 = vcmp.lt.s32.totalorder %v2585_v43, 16  ;;  %v2629_v5 = vadd.s32 4294967295, %v626_v50  ;;  %vm4045_vm3 = vcmp.ge.s32.totalorder %v2597_v53, 0 }
  0x16   : > { %2063 = vmatmul.msk.f32.vlgmr.msra.gmra.mxu0 %vm392_vm0, %v381_v7  ;;  %2064 = vmatmul.msk.f32.vlgmr.msra.gmra.mxu1 %vm392_vm0, %v381_v7  ;;  %s355_s26 = sadd.s32 %s2257_s18, %s2256_s21  ;;  %v2122_v25 = vld [vmem:[%s4041_s5 + $0x1e0] sm:$0xff]  ;;  %v2121_v26 = vld [vmem:[%s4041_s5 + $0x1d8] sm:$0xff]  ;;  %v2120_v32 = vld [vmem:[%s4041_s5 + $0x1d0] sm:$0xff]  ;;  %vm651_vm4 = vcmp.ge.s32.totalorder %v2607_v58, 0  ;;  %vm661_vm5 = vcmp.lt.s32.totalorder %v2607_v58, 16  ;;  %v630_v43 = vadd.s32 7, %v2559_v30 }
  0x17   : > { %2214 = vmatpush.msrb.mxu1 %v2091_v8  ;;  %872 = vmatpush.msrb.mxu0 %v2091_v8  ;;  %s2056_s18 = sshll.u32 %s355_s26, 3  ;;  %v2554_v27 = vld [vmem:[%s4037_s1] ss:$0 sm:$0xff]  ;;  %v2119_v38 = vld [vmem:[%s4041_s5 + $0x1c8] sm:$0xff]  ;;  %v2581_v41 = vld [vmem:[%s4037_s1 + $0x1] ss:$0 sm:$0xff] }
  0x18   : > { %2218 = vmatpush.msra.mxu2 %v2090_v9  ;;  %2219 = vmatpush.msra.mxu3 %v2090_v9  ;;  %s2540_s24 = scalar_lea.vmem %s4036_s0, %s2056_s18  ;;  %v2571_v37 = vld [vmem:[%s4040_s4] sm:$0x3]  ;;  %vm652_vm6 = vcmp.ge.s32.totalorder %v2629_v5, 0  ;;  %vm662_vm7 = vcmp.lt.s32.totalorder %v2629_v5, 16  ;;  %v836_v50 = vld [vmem:[%s4041_s5 + $0x78] sm:$0xff]  ;;  %vm2746_vm10 = vmand %vm649_vm1, %vm659_vm2  ;;  %vm660_vm0 = vcmp.lt.s32.totalorder %v2559_v30, 16 }
  0x19   : > { %2217 = vmatpush.msrb.mxu1 %v2090_v9  ;;  %873 = vmatpush.msrb.mxu0 %v2090_v9  ;;  %v438_v28 = vld [vmem:[%s2540_s24] sm:$0xff]  ;;  %v439_v29 = vld [vmem:[%s2540_s24 + $0x8] sm:$0xff]  ;;  %v444_v33 = vld [vmem:[%s2540_s24 + $0x30] sm:$0xff]  ;;  %v388_v51 = vperm.slane %v2571_v37, 0  ;;  %v389_v52 = vperm.slane %v2571_v37, 1  ;;  %s4181_s25 = smov (!%p364_p7, %s2543_s25), 15 }
  0x1a   : > { %2221 = vmatpush.msra.mxu2 %v2089_v10  ;;  %2222 = vmatpush.msra.mxu3 %v2089_v10  ;;  %v445_v34 = vld [vmem:[%s2540_s24 + $0x38] sm:$0xff]  ;;  %v447_v35 = vld [vmem:[%s2540_s24 + $0x48] sm:$0xff]  ;;  %v448_v36 = vld [vmem:[%s2540_s24 + $0x50] sm:$0xff]  ;;  %v469_v39 = vmul.f32 %v2554_v27, %v438_v28  ;;  %v470_v40 = vmul.f32 %v2554_v27, %v439_v29  ;;  %v475_v45 = vmul.f32 %v2554_v27, %v444_v33  ;;  %v627_v28 = vadd.s32 4, %v2559_v30  ;;  %s2058_s27 = sshll.u32 %s4181_s25, 1  ;;  %s2059_s19 = sshll.u32 %s4179_s28, 5 }
  0x1b   : > { %2220 = vmatpush.msrb.mxu1 %v2089_v10  ;;  %874 = vmatpush.msrb.mxu0 %v2089_v10  ;;  %v476_v46 = vmul.f32 %v2554_v27, %v445_v34  ;;  %v2118_v47 = vld [vmem:[%s4041_s5 + $0x1c0] sm:$0xff]  ;;  %v478_v48 = vmul.f32 %v2554_v27, %v447_v35  ;;  %v479_v49 = vmul.f32 %v2554_v27, %v448_v36  ;;  %v455_v55 = vld [vmem:[%s2540_s24 + $0x88] sm:$0x3]  ;;  %v440_v60 = vld [vmem:[%s2540_s24 + $0x10] sm:$0x3]  ;;  %s368_s18 = sadd.s32 %s2059_s19, %s2058_s27 }
  0x1c   : > { %2224 = vmatpush.msra.mxu2 %v2088_v11  ;;  %2225 = vmatpush.msra.mxu3 %v2088_v11  ;;  %v454_v54 = vld [vmem:[%s2540_s24 + $0x80] sm:$0xff]  ;;  %v2602_v56 = vadd.f32 %v2581_v41, %v469_v39  ;;  %v2605_v57 = vadd.f32 %v2581_v41, %v470_v40  ;;  %v2615_v62 = vadd.f32 %v2581_v41, %v475_v45  ;;  %v449_v0 = vld [vmem:[%s2540_s24 + $0x58] sm:$0x3]  ;;  %v456_v1 = vld [vmem:[%s2540_s24 + $0x90] sm:$0xff]  ;;  %s2060_s20 = sshll.u32 %s368_s18, 3 }
  0x1d   : > { %2223 = vmatpush.msrb.mxu1 %v2088_v11  ;;  %875 = vmatpush.msrb.mxu0 %v2088_v11  ;;  %v446_v61 = vld [vmem:[%s2540_s24 + $0x40] sm:$0x3]  ;;  %v2618_v63 = vadd.f32 %v2581_v41, %v476_v46  ;;  %v457_v2 = vld [vmem:[%s2540_s24 + $0x98] sm:$0xff]  ;;  %v2624_v3 = vadd.f32 %v2581_v41, %v478_v48  ;;  %v2627_v4 = vadd.f32 %v2581_v41, %v479_v49  ;;  %v645_v11 = vadd.s32 16, %v643_v44  ;;  %v452_v31 = vld [vmem:[%s2540_s24 + $0x70] sm:$0x3]  ;;  %s3967_s26 = scalar_lea.vmem %s4043_s7, %s2060_s20 }
  0x1e   : > { %2227 = vmatpush.msra.mxu2 %v2087_v12  ;;  %2228 = vmatpush.msra.mxu3 %v2087_v12  ;;  %v485_v6 = vmul.f32 %v2554_v27, %v454_v54  ;;  %v441_v7 = vld [vmem:[%s2540_s24 + $0x18] sm:$0xff]  ;;  %v442_v8 = vld [vmem:[%s2540_s24 + $0x20] sm:$0xff]  ;;  %v486_v10 = vmul.f32 %v2554_v27, %v455_v55  ;;  %v463_v48 = vld [vmem:[%s2540_s24 + $0xc8] sm:$0xff] }
  0x1f   : > { %2226 = vmatpush.msrb.mxu1 %v2087_v12  ;;  %876 = vmatpush.msrb.mxu0 %v2087_v12  ;;  %v450_v9 = vld [vmem:[%s2540_s24 + $0x60] sm:$0xff]  ;;  %v471_v12 = vmul.f32 %v2554_v27, %v440_v60  ;;  %v2664_v34 = vadd.s32 4294967295, %v645_v11  ;;  %v453_v39 = vld [vmem:[%s2540_s24 + $0x78] sm:$0xff]  ;;  %v464_v49 = vld [vmem:[%s2540_s24 + $0xd0] sm:$0x3] }
  0x20   : > { %2230 = vmatpush.msra.mxu2 %v2086_v13  ;;  %2231 = vmatpush.msra.mxu3 %v2086_v13  ;;  %v2662_v33 = vadd.f32 %v2581_v41, %v486_v10  ;;  %v461_v40 = vld [vmem:[%s2540_s24 + $0xb8] sm:$0x3]  ;;  %v483_v10 = vmul.f32 %v2554_v27, %v452_v31  ;;  %v834_v11 = vld [vmem:[%s4041_s5 + $0x68] sm:$0xff]  ;;  %v2106_v31 = vld [vmem:[%s4041_s5 + $0x160] sm:$0xff] }
  0x21   : > { %2229 = vmatpush.msrb.mxu1 %v2086_v13  ;;  %877 = vmatpush.msrb.mxu0 %v2086_v13  ;;  %v477_v13 = vmul.f32 %v2554_v27, %v446_v61  ;;  %v2667_v35 = vadd.f32 %v2581_v41, %v471_v12  ;;  %v2109_v54 = vld [vmem:[%s4041_s5 + $0x178] sm:$0xff]  ;;  %v2107_v12 = vld [vmem:[%s4041_s5 + $0x168] sm:$0xff]  ;;  %vm4048_vm11 = vcmp.lt.s32.totalorder %v2664_v34, 16  ;;  %v2114_v37 = vld [vmem:[%s4041_s5 + $0x1a0] sm:$0xff] }
  0x22   : > { %2233 = vmatpush.msra.mxu2 %v2085_v14  ;;  %2234 = vmatpush.msra.mxu3 %v2085_v14  ;;  %v2117_v55 = vld [vmem:[%s4041_s5 + $0x1b8] sm:$0xff]  ;;  %vm2795_vm12 = vmand %vm2746_vm10, %vm4045_vm3  ;;  %v2190_v5 = vld [vmem:[%s4041_s5 + $0x400] sm:$0xff] }
  0x23   : > { %2232 = vmatpush.msrb.mxu1 %v2085_v14  ;;  %878 = vmatpush.msrb.mxu0 %v2085_v14  ;;  %v451_v14 = vld [vmem:[%s2540_s24 + $0x68] sm:$0xff]  ;;  %v2676_v42 = vadd.f32 %v2581_v41, %v477_v13  ;;  %vm2836_vm1 = vmand %vm651_vm4, %vm661_vm5 }
  0x24   : > { %2236 = vmatpush.msra.mxu2 %v2084_v15  ;;  %2237 = vmatpush.msra.mxu3 %v2084_v15  ;;  %vm2869_vm2 = vmand %vm652_vm6, %vm662_vm7 }
  0x25   : > { %2235 = vmatpush.msrb.mxu1 %v2084_v15  ;;  %879 = vmatpush.msrb.mxu0 %v2084_v15  ;;  %v458_v15 = vld [vmem:[%s2540_s24 + $0xa0] sm:$0x3]  ;;  %vm2910_vm5 = vmand %vm2836_vm1, %vm4045_vm3 }
  0x26   : > { %2239 = vmatpush.msra.mxu2 %v2083_v16  ;;  %2240 = vmatpush.msra.mxu3 %v2083_v16  ;;  %v489_v29 = vmul.f32 %v2554_v27, %v458_v15  ;;  %vm2984_vm6 = vmand %vm2746_vm10, %vm4048_vm11 }
  0x27   : > { %2238 = vmatpush.msrb.mxu1 %v2083_v16  ;;  %880 = vmatpush.msrb.mxu0 %v2083_v16  ;;  %v2640_v16 = vadd.s32 4294967295, %v628_v59  ;;  %vm3009_vm7 = vmand %vm2836_vm1, %vm4048_vm11 }
  0x28   : > { %2242 = vmatpush.msra.mxu2 %v2082_v17  ;;  %2243 = vmatpush.msra.mxu3 %v2082_v17 }
  0x29   : > { %2241 = vmatpush.msrb.mxu1 %v2082_v17  ;;  %881 = vmatpush.msrb.mxu0 %v2082_v17  ;;  %v480_v17 = vmul.f32 %v2554_v27, %v449_v0  ;;  %vm654_vm8 = vcmp.ge.s32.totalorder %v2640_v16, 0  ;;  %vm664_vm9 = vcmp.lt.s32.totalorder %v2640_v16, 16 }
  0x2a   : > { %2245 = vmatpush.msra.mxu2 %v2081_v18  ;;  %2246 = vmatpush.msra.mxu3 %v2081_v18  ;;  %vm2888_vm4 = vmand %vm654_vm8, %vm664_vm9 }
  0x2b   : > { %2244 = vmatpush.msrb.mxu1 %v2081_v18  ;;  %882 = vmatpush.msrb.mxu0 %v2081_v18  ;;  %v487_v18 = vmul.f32 %v2554_v27, %v456_v1  ;;  %v2679_v44 = vadd.f32 %v2581_v41, %v480_v17  ;;  %v835_v1 = vld [vmem:[%s4041_s5 + $0x70] sm:$0xff]  ;;  %v484_v17 = vmul.f32 %v2554_v27, %v453_v39  ;;  %v466_v39 = vld [vmem:[%s2540_s24 + $0xe0] sm:$0xff]  ;;  %vm2928_vm8 = vmand %vm2869_vm2, %vm4045_vm3  ;;  %vm4091_vm3 = vcmp.ge.s32.totalorder %v2559_v30, 0 }
  0x2c   : > { %2248 = vmatpush.msra.mxu2 %v2080_v19  ;;  %2249 = vmatpush.msra.mxu3 %v2080_v19  ;;  %vm2950_vm9 = vmand %vm2888_vm4, %vm4048_vm11 }
  0x2d   : > { %2247 = vmatpush.msrb.mxu1 %v2080_v19  ;;  %883 = vmatpush.msrb.mxu0 %v2080_v19  ;;  %v488_v19 = vmul.f32 %v2554_v27, %v457_v2  ;;  %v2682_v45 = vadd.f32 %v2581_v41, %v487_v18  ;;  %v2108_v2 = vld [vmem:[%s4041_s5 + $0x170] sm:$0xff]  ;;  %vm3041_vm15 = vmand %vm4091_vm3, %vm660_vm0 }
  0x2e   : > { %2251 = vmatpush.msra.mxu2 %v2079_v20  ;;  %2252 = vmatpush.msra.mxu3 %v2079_v20  ;;  %vm3058_vm3 = vmand %vm2869_vm2, %vm4048_vm11 }
  0x2f   : > { %2250 = vmatpush.msrb.mxu1 %v2079_v20  ;;  %884 = vmatpush.msrb.mxu0 %v2079_v20  ;;  %v443_v20 = vld [vmem:[%s2540_s24 + $0x28] sm:$0x3]  ;;  %v2685_v46 = vadd.f32 %v2581_v41, %v488_v19 }
  0x30   : > { %2254 = vmatpush.msra.mxu2 %v2078_v21  ;;  %2255 = vmatpush.msra.mxu3 %v2078_v21  ;;  %v474_v36 = vmul.f32 %v2554_v27, %v443_v20  ;;  %v2200_v20 = vld [vmem:[%s4041_s5 + $0x450] sm:$0xff] }
  0x31   : > { %2253 = vmatpush.msrb.mxu1 %v2078_v21  ;;  %885 = vmatpush.msrb.mxu0 %v2078_v21  ;;  %v629_v21 = vadd.s32 6, %v2559_v30 }
  0x32   : > { %935 = vmatpush.msrb.mxu3 %v836_v50  ;;  %v2737_v13 = vadd.f32 %v2581_v41, %v474_v36  ;;  %v495_v36 = vmul.f32 %v2554_v27, %v464_v49 }
  0x33   : > { %1148 = vmatpush.msra.mxu1 %v2125_v22  ;;  %v472_v22 = vmul.f32 %v2554_v27, %v441_v7  ;;  %v2701_v59 = vadd.s32 4294967295, %v629_v21  ;;  %1033 = vmatpush.msra.mxu0 %v2109_v54  ;;  %v2115_v21 = vld [vmem:[%s4041_s5 + $0x1a8] sm:$0xff]  ;;  %v2788_v54 = vadd.f32 %v2581_v41, %v484_v17  ;;  %v2105_v17 = vld [vmem:[%s4041_s5 + $0x158] sm:$0xff] }
  0x34   : > { %936 = vmatpush.msrb.mxu3 %v835_v1  ;;  %v2201_v1 = vld [vmem:[%s4041_s5 + $0x458] sm:$0xff] }
  0x35   : > { %1149 = vmatpush.msra.mxu1 %v2124_v23  ;;  %v473_v23 = vmul.f32 %v2554_v27, %v442_v8  ;;  %v2704_v60 = vadd.f32 %v2581_v41, %v472_v22  ;;  %v2724_v8 = vadd.s32 4294967295, %v627_v28  ;;  %1034 = vmatpush.msra.mxu0 %v2108_v2  ;;  %v2141_v22 = vld [vmem:[%s4041_s5 + $0x278] sm:$0xff]  ;;  %vm655_vm13 = vcmp.ge.s32.totalorder %v2701_v59, 0 }
  0x36   : > { %1262 = vmatpush.msrb.mxu2 %v2141_v22  ;;  %937 = vmatpush.msrb.mxu3 %v834_v11  ;;  %vm665_vm14 = vcmp.lt.s32.totalorder %v2701_v59, 16  ;;  %v2801_v2 = vadd.s32 4294967295, %v630_v43  ;;  %v2140_v43 = vld [vmem:[%s4041_s5 + $0x270] sm:$0xff]  ;;  %v829_v59 = vld [vmem:[%s4041_s5 + $0x40] sm:$0xff] }
  0x37   : > { %1150 = vmatpush.msra.mxu1 %v2123_v24  ;;  %v481_v24 = vmul.f32 %v2554_v27, %v450_v9  ;;  %v2707_v61 = vadd.f32 %v2581_v41, %v473_v23  ;;  %v2727_v9 = vadd.f32 %v2581_v41, %v489_v29  ;;  %v492_v23 = vmul.f32 %v2554_v27, %v461_v40  ;;  %v2196_v22 = vld [vmem:[%s4041_s5 + $0x430] sm:$0xff] }
  0x38   : > { %1035 = vmatpush.msra.mxu0 %v2107_v12  ;;  %v497_v40 = vmul.f32 %v2554_v27, %v466_v39  ;;  %1263 = vmatpush.msrb.mxu2 %v2140_v43  ;;  %v2138_v43 = vld [vmem:[%s4041_s5 + $0x260] sm:$0xff]  ;;  %vm4103_vm0 = vcmp.ge.s32.totalorder %v2724_v8, 0 }
  0x39   : > { %1151 = vmatpush.msra.mxu1 %v2122_v25  ;;  %v2652_v25 = vadd.f32 %v2581_v41, %v485_v6  ;;  %v2710_v0 = vadd.f32 %v2581_v41, %v481_v24  ;;  %v2116_v6 = vld [vmem:[%s4041_s5 + $0x1b0] sm:$0xff] }
  0x3a   : > { %1036 = vmatpush.msra.mxu0 %v2106_v31 }
  0x3b   : > { %1152 = vmatpush.msra.mxu1 %v2121_v26  ;;  %v482_v26 = vmul.f32 %v2554_v27, %v451_v14 }
  0x3c   : > { %1037 = vmatpush.msra.mxu0 %v2105_v17 }
  0x3d   : > { %1153 = vmatpush.msra.mxu1 %v2120_v32  ;;  %v459_v32 = vld [vmem:[%s2540_s24 + $0xa8] sm:$0xff]  ;;  %v2722_v7 = vadd.f32 %v2581_v41, %v482_v26  ;;  %v494_v26 = vmul.f32 %v2554_v27, %v463_v48 }
  0x3e   : > { %v490_v14 = vmul.f32 %v2554_v27, %v459_v32  ;;  %v631_v32 = vadd.s32 8, %v2559_v30 }
  0x3f   : > { %1154 = vmatpush.msra.mxu1 %v2119_v38  ;;  %v460_v38 = vld [vmem:[%s2540_s24 + $0xb0] sm:$0xff]  ;;  %v2810_v11 = vadd.f32 %v2581_v41, %v494_v26  ;;  %v2850_v26 = vadd.f32 %v2581_v41, %v497_v40  ;;  %v2103_v40 = vld [vmem:[%s4041_s5 + $0x148] sm:$0xff] }
  0x40   : > { %v491_v15 = vmul.f32 %v2554_v27, %v460_v38  ;;  %v465_v38 = vld [vmem:[%s2540_s24 + $0xd8] sm:$0xff]  ;;  %v2782_v49 = vadd.f32 %v2581_v41, %v490_v14 }
  0x41   : > { %1155 = vmatpush.msra.mxu1 %v2118_v47  ;;  %v462_v47 = vld [vmem:[%s2540_s24 + $0xc0] sm:$0xff] }
  0x42   : > { %v493_v24 = vmul.f32 %v2554_v27, %v462_v47  ;;  %v632_v47 = vadd.s32 9, %v2559_v30  ;;  %v2785_v50 = vadd.f32 %v2581_v41, %v491_v15  ;;  %v833_v15 = vld [vmem:[%s4041_s5 + $0x60] sm:$0xff] }
  0x43   : > { %1156 = vmatpush.msra.mxu1 %v2117_v55  ;;  %v467_v55 = vld [vmem:[%s2540_s24 + $0xe8] sm:$0x3]  ;;  %938 = vmatpush.msrb.mxu3 %v833_v15  ;;  %s2061_s24 = sshll.u32 %s4179_s28, 1 }
  0x44   : > { %v2852_v58 = vadd.s32 4294967295, %v632_v47  ;;  %s377_s12 = sadd.s32 %s2061_s24, %s2512_s17 }
  0x45   : > { %1157 = vmatpush.msra.mxu1 %v2116_v6  ;;  %v2804_v6 = vadd.f32 %v2581_v41, %v492_v23  ;;  %v832_v23 = vld [vmem:[%s4041_s5 + $0x58] sm:$0xff]  ;;  %s2062_s13 = sshll.u32 %s377_s12, 1 }
  0x46   : > { %939 = vmatpush.msrb.mxu3 %v832_v23  ;;  %s379_s16 = scalar_lea.vmem %s4044_s8, %s2062_s13 }
  0x47   : > { %1158 = vmatpush.msra.mxu1 %v2115_v21  ;;  %v2830_v21 = vadd.f32 %v2581_v41, %v495_v36 }
  0x49   : > { %1159 = vmatpush.msra.mxu1 %v2114_v37  ;;  %v2197_v37 = vld [vmem:[%s4041_s5 + $0x438] sm:$0xff] }
  0x93   : > { %v413_v18 = vpop.f32.mrf.mxu0  ;;  %v433_v19 = vpop.f32.mrf.mxu1 }
  0x94   : > { %v414_v28 = vadd.f32 %v413_v18, %v388_v51  ;;  %v434_v29 = vadd.f32 %v433_v19, %v389_v52  ;;  %v2776_v51 = vadd.f32 %v2581_v41, %v483_v10  ;;  %v496_v52 = vmul.f32 %v2554_v27, %v465_v38  ;;  %v2113_v18 = vld [vmem:[%s4041_s5 + $0x198] sm:$0xff] }
  0x95   : > { %v2807_v10 = vadd.f32 %v2581_v41, %v493_v24  ;;  %v2827_v19 = vadd.s32 4294967295, %v631_v32  ;;  %v4074_v38 = vmov 0  ;;  %1160 = vmatpush.msra.mxu1 %v2113_v18  ;;  %v2111_v18 = vld [vmem:[%s4041_s5 + $0x188] sm:$0xff] }
  0x96   : > { %v530_v48 = vadd.f32 1.0, %v414_v28  ;;  %v2814_v14 = vperm.slane %v434_v29, 0  ;;  %v2847_v24 = vadd.f32 %v2581_v41, %v496_v52  ;;  %v2855_v28 = vmul.f32 %v2554_v27, %v467_v55  ;;  %v2104_v27 = vld [vmem:[%s4041_s5 + $0x150] sm:$0xff]  ;;  %v2195_v55 = vld [vmem:[%s4041_s5 + $0x428] sm:$0xff] }
  0x97   : > { %v4075_v38 = vsel %vm2869_vm2, 4294967295, %v4074_v38  ;;  %v831_v52 = vld [vmem:[%s4041_s5 + $0x50] sm:$0xff]  ;;  %1038 = vmatpush.msra.mxu0 %v2104_v27  ;;  %v830_v27 = vld [vmem:[%s4041_s5 + $0x48] sm:$0xff] }
  0x98   : > { %v2812_v12 = vperm.slane %v530_v48, 0  ;;  %940 = vmatpush.msrb.mxu3 %v831_v52 }
  0x99   : > { %1039 = vmatpush.msra.mxu0 %v2103_v40  ;;  %v2110_v40 = vld [vmem:[%s4041_s5 + $0x180] sm:$0xff] }
  0x9a   : > { %v532_v29 = vmul.f32 %v2812_v12, %v2602_v56  ;;  %v533_v31 = vmul.f32 %v2812_v12, %v2605_v57  ;;  %v538_v32 = vmul.f32 %v2812_v12, %v2615_v62  ;;  %v539_v36 = vmul.f32 %v2812_v12, %v2618_v63  ;;  %941 = vmatpush.msrb.mxu3 %v830_v27 }
  0x9b   : > { %v541_v56 = vmul.f32 %v2812_v12, %v2624_v3  ;;  %v542_v57 = vmul.f32 %v2812_v12, %v2627_v4  ;;  %v548_v62 = vmul.f32 %v2812_v12, %v2652_v25  ;;  %v549_v63 = vmul.f32 %v2812_v12, %v2662_v33  ;;  %v2112_v3 = vld [vmem:[%s4041_s5 + $0x190] sm:$0xff]  ;;  %v2139_v4 = vld [vmem:[%s4041_s5 + $0x268] sm:$0xff] }
  0x9c   : > { %v2899_v25 = vadd.f32 %v2814_v14, %v532_v29  ;;  %v2902_v33 = vadd.f32 %v2814_v14, %v533_v31  ;;  %v569_v16 = vadd.f32 %v2814_v14, %v538_v32  ;;  %v570_v39 = vadd.f32 %v2814_v14, %v539_v36  ;;  %1161 = vmatpush.msra.mxu1 %v2112_v3 }
  0x9d   : > { %v572_v47 = vadd.f32 %v2814_v14, %v541_v56  ;;  %v573_v48 = vadd.f32 %v2814_v14, %v542_v57  ;;  %v579_v15 = vadd.f32 %v2814_v14, %v548_v62  ;;  %v580_v17 = vadd.f32 %v2814_v14, %v549_v63  ;;  %1264 = vmatpush.msrb.mxu2 %v2139_v4  ;;  %v2102_v56 = vld [vmem:[%s4041_s5 + $0x140] sm:$0xff] }
  0x9e   : > { %v4047_v23 = vmax.f32 %v2899_v25, 0.0  ;;  %v4046_v29 = vmax.f32 %v2902_v33, 0.0  ;;  %v2942_v31 = vmax.f32 %v569_v16, 0.0  ;;  %v2944_v32 = vmax.f32 %v570_v39, 0.0  ;;  %1162 = vmatpush.msra.mxu1 %v2111_v18  ;;  %1040 = vmatpush.msra.mxu0 %v2102_v56 }
  0x9f   : > { %v2960_v57 = vmax.f32 %v572_v47, 0.0  ;;  %v2962_v62 = vmax.f32 %v573_v48, 0.0  ;;  %v2964_v63 = vmax.f32 %v579_v15, 0.0  ;;  %v610_v16 = vmax.f32 %v580_v17, 0.0  ;;  %1265 = vmatpush.msrb.mxu2 %v2138_v43  ;;  %v2137_v48 = vld [vmem:[%s4041_s5 + $0x258] sm:$0xff]  ;;  %942 = vmatpush.msrb.mxu3 %v829_v59  ;;  %v827_v59 = vld [vmem:[%s4041_s5 + $0x30] sm:$0xff] }
  0xa0   : > { %v745_v3 = vsel %vm2795_vm12, %v4047_v23, 0.0  ;;  %v746_v4 = vsel %vm2746_vm10, %v4046_v29, 0.0  ;;  %v751_v39 = vsel %vm2910_vm5, %v2942_v31, 0.0  ;;  %v752_v47 = vsel %vm2836_vm1, %v2944_v32, 0.0  ;;  %1163 = vmatpush.msra.mxu1 %v2110_v40 }
  0xa1   : > { %4084 = vst [vmem:[#allocation3_spill] sm:$0xff] %v2964_v63  ;;  %v754_v15 = vsel %vm2928_vm8, %v2960_v57, 0.0  ;;  %v755_v17 = vsel %vm2869_vm2, %v2962_v62, 0.0  ;;  %v761_v18 = vsel %vm2888_vm4, %v2964_v63, 0.0  ;;  %v762_v43 = vsel %vm2950_vm9, %v610_v16, 0.0  ;;  %vm3027_vm9 = vmand %vm655_vm13, %vm665_vm14  ;;  %1266 = vmatpush.msrb.mxu2 %v2137_v48  ;;  %v2135_v63 = vld [vmem:[%s4041_s5 + $0x248] sm:$0xff] }
  0xa2   : > { %775 = vst [vmem:[#allocation2] sm:$0xff] %v745_v3  ;;  %v534_v29 = vmul.f32 %v2812_v12, %v2667_v35  ;;  %v540_v36 = vmul.f32 %v2812_v12, %v2676_v42  ;;  %v543_v16 = vmul.f32 %v2812_v12, %v2679_v44  ;;  %v550_v23 = vmul.f32 %v2812_v12, %v2682_v45  ;;  %v2198_v45 = vld [vmem:[%s4041_s5 + $0x440] sm:$0xff] }
  0xa3   : > { %776 = vst [vmem:[#allocation2 + $0x8] sm:$0xff] %v746_v4  ;;  %v4089_v27 = vmov 0  ;;  %v551_v35 = vmul.f32 %v2812_v12, %v2685_v46  ;;  %v535_v42 = vmul.f32 %v2812_v12, %v2704_v60  ;;  %v536_v44 = vmul.f32 %v2812_v12, %v2707_v61  ;;  %v2101_v46 = vld [vmem:[%s4041_s5 + $0x138] sm:$0xff] }
  0xa4   : > { %v4090_v27 = vsel %vm3027_vm9, 4294967295, %v4089_v27  ;;  %781 = vst [vmem:[#allocation2 + $0x30] sm:$0xff] %v751_v39  ;;  %v565_v60 = vadd.f32 %v2814_v14, %v534_v29  ;;  %v571_v61 = vadd.f32 %v2814_v14, %v540_v36  ;;  %v574_v30 = vadd.f32 %v2814_v14, %v543_v16  ;;  %v2136_v39 = vld [vmem:[%s4041_s5 + $0x250] sm:$0xff]  ;;  %v828_v36 = vld [vmem:[%s4041_s5 + $0x38] sm:$0xff]  ;;  %1041 = vmatpush.msra.mxu0 %v2101_v46 }
  0xa5   : > { %782 = vst [vmem:[#allocation2 + $0x38] sm:$0xff] %v752_v47  ;;  %v581_v4 = vadd.f32 %v2814_v14, %v550_v23  ;;  %v582_v29 = vadd.f32 %v2814_v14, %v551_v35  ;;  %vm4096_vm13 = vcmp.ge.s32.totalorder %v2597_v53, 0  ;;  %v4097_v47 = vmov 0  ;;  %1267 = vmatpush.msrb.mxu2 %v2136_v39  ;;  %943 = vmatpush.msrb.mxu3 %v828_v36  ;;  %v2134_v39 = vld [vmem:[%s4041_s5 + $0x240] sm:$0xff] }
  0xa6   : > { %784 = vst [vmem:[#allocation2 + $0x48] sm:$0xff] %v754_v15  ;;  %vm3071_vm14 = vmand %vm3027_vm9, %vm4096_vm13  ;;  %v566_v40 = vadd.f32 %v2814_v14, %v535_v42  ;;  %v567_v48 = vadd.f32 %v2814_v14, %v536_v44  ;;  %v544_v23 = vmul.f32 %v2812_v12, %v2710_v0  ;;  %v2100_v15 = vld [vmem:[%s4041_s5 + $0x130] sm:$0xff]  ;;  %v595_v16 = vmax.f32 %v565_v60, 0.0  ;;  %v2199_v0 = vld [vmem:[%s4041_s5 + $0x448] sm:$0xff] }
  0xa7   : > { %v4098_v47 = vsel %vm3071_vm14, 4294967295, %v4097_v47  ;;  %785 = vst [vmem:[#allocation2 + $0x50] sm:$0xff] %v755_v17  ;;  %v601_v35 = vmax.f32 %v571_v61, 0.0  ;;  %v604_v42 = vmax.f32 %v574_v30, 0.0  ;;  %v3087_v44 = vmax.f32 %v581_v4, 0.0  ;;  %vm4099_vm11 = vmmov %vm4096_vm13  ;;  %1042 = vmatpush.msra.mxu0 %v2100_v15  ;;  %1268 = vmatpush.msrb.mxu2 %v2135_v63  ;;  %v2098_v63 = vld [vmem:[%s4041_s5 + $0x120] sm:$0xff] }
  0xa8   : > { %vm3093_vm2 = vmand %vm3041_vm15, %vm4099_vm11  ;;  %791 = vst [vmem:[#allocation2 + $0x80] sm:$0xff] %v761_v18  ;;  %v3100_v17 = vmax.f32 %v582_v29, 0.0  ;;  %v3102_v60 = vmax.f32 %v566_v40, 0.0  ;;  %v3104_v61 = vmax.f32 %v567_v48, 0.0  ;;  %v545_v30 = vmul.f32 %v2812_v12, %v2722_v7  ;;  %v2099_v18 = vld [vmem:[%s4041_s5 + $0x128] sm:$0xff]  ;;  %944 = vmatpush.msrb.mxu3 %v827_v59 }
  0xa9   : > { %vm4102_vm11 = vcmp.lt.s32.totalorder %v2724_v8, 16  ;;  %v4104_v46 = vmov 0  ;;  %792 = vst [vmem:[#allocation2 + $0x88] sm:$0x3] %v762_v43  ;;  %v747_v7 = vsel %vm2984_vm6, %v595_v16, 0.0  ;;  %v753_v8 = vsel %vm3009_vm7, %v601_v35, 0.0  ;;  %1043 = vmatpush.msra.mxu0 %v2099_v18  ;;  %1269 = vmatpush.msrb.mxu2 %v2134_v39 }
  0xaa   : > { %vm3112_vm13 = vmand %vm4103_vm0, %vm4102_vm11  ;;  %v756_v4 = vsel %vm3058_vm3, %v604_v42, 0.0  ;;  %v3133_v29 = vadd.f32 %v2581_v41, %v2855_v28  ;;  %v837_v43 = vld [vmem:[#allocation2 + $0x1] sm:$0xff]  ;;  %777 = vst [vmem:[#allocation2 + $0x10] sm:$0x3] %v747_v7  ;;  %v763_v52 = vsel %vm3071_vm14, %v3087_v44, 0.0  ;;  %v764_v3 = vsel %vm3027_vm9, %v3100_v17, 0.0 }
  0xab   : > { %v4105_v46 = vsel %vm3112_vm13, 4294967295, %v4104_v46  ;;  %v748_v56 = vsel %vm3093_vm2, %v3102_v60, 0.0  ;;  %v575_v40 = vadd.f32 %v2814_v14, %v544_v23  ;;  %886 = vmatmul.f32.vlgmr.msrb.gmra.mxu0 %v837_v43  ;;  %783 = vst [vmem:[#allocation2 + $0x40] sm:$0x3] %v753_v8  ;;  %v576_v41 = vadd.f32 %v2814_v14, %v545_v30  ;;  %v826_v15 = vld [vmem:[%s4041_s5 + $0x28] sm:$0xff]  ;;  %v2133_v18 = vld [vmem:[%s4041_s5 + $0x238] sm:$0xff] }
  0xac   : > { %vm4106_vm6 = vcmp.ge.s32.totalorder %v2597_v53, 0  ;;  %v552_v48 = vmul.f32 %v2812_v12, %v2727_v9  ;;  %v537_v23 = vmul.f32 %v2812_v12, %v2737_v13  ;;  %v3164_v36 = vld [vmem:[#allocation2 + $0x31] sm:$0xff]  ;;  %786 = vst [vmem:[#allocation2 + $0x58] sm:$0x3] %v756_v4  ;;  %v749_v16 = vsel %vm3041_vm15, %v3104_v61, 0.0  ;;  %1044 = vmatpush.msra.mxu0 %v2098_v63  ;;  %945 = vmatpush.msrb.mxu3 %v826_v15 }
  0xad   : > { %vm3150_vm7 = vmand %vm3112_vm13, %vm4106_vm6  ;;  %v3169_v9 = vmax.f32 %v575_v40, 0.0  ;;  %vm4109_vm3 = vcmp.lt.s32.totalorder %v2664_v34, 16  ;;  %v546_v13 = vmul.f32 %v2812_v12, %v2776_v51  ;;  %v553_v42 = vmul.f32 %v2812_v12, %v2782_v49  ;;  %898 = vmatmul.f32.vlgmr.msrb.gmra.mxu1 %v3164_v36  ;;  %793 = vst [vmem:[#allocation2 + $0x90] sm:$0xff] %v763_v52  ;;  %v2097_v49 = vld [vmem:[%s4041_s5 + $0x118] sm:$0xff]  ;;  %v2132_v63 = vld [vmem:[%s4041_s5 + $0x230] sm:$0xff]  ;;  %1270 = vmatpush.msrb.mxu2 %v2133_v18 }
  0xae   : > { %vm3175_vm0 = vmand %vm3027_vm9, %vm4109_vm3  ;;  %v3184_v30 = vmax.f32 %v576_v41, 0.0  ;;  %v583_v59 = vadd.f32 %v2814_v14, %v552_v48  ;;  %v568_v7 = vadd.f32 %v2814_v14, %v537_v23  ;;  %v554_v8 = vmul.f32 %v2812_v12, %v2785_v50  ;;  %v3204_v4 = vld [vmem:[#allocation2 + $0x49] sm:$0xff]  ;;  %794 = vst [vmem:[#allocation2 + $0x98] sm:$0xff] %v764_v3  ;;  %1045 = vmatpush.msra.mxu0 %v2097_v49  ;;  %v2094_v41 = vld [vmem:[%s4041_s5 + $0x100] sm:$0xff] }
  0xaf   : > { %vm4112_vm11 = vcmp.lt.s32.totalorder %v2801_v2, 16  ;;  %vm4113_vm6 = vcmp.ge.s32.totalorder %v2801_v2, 0  ;;  %v4114_v51 = vmov 0  ;;  %v757_v50 = vsel %vm3150_vm7, %v3169_v9, 0.0  ;;  %904 = vmatmul.f32.vlgmr.msra.gmra.mxu2 %v3204_v4  ;;  %778 = vst [vmem:[#allocation2 + $0x18] sm:$0xff] %v748_v56  ;;  %v2096_v56 = vld [vmem:[%s4041_s5 + $0x110] sm:$0xff] }
  0xb0   : > { %vm3194_vm3 = vmand %vm4113_vm6, %vm4112_vm11  ;;  %vm4116_vm11 = vcmp.lt.s32.totalorder %v2664_v34, 16  ;;  %v577_v39 = vadd.f32 %v2814_v14, %v546_v13  ;;  %v584_v43 = vadd.f32 %v2814_v14, %v553_v42  ;;  %v758_v52 = vsel %vm3112_vm13, %v3184_v30, 0.0  ;;  %v3239_v23 = vld [vmem:[#allocation2 + $0x81] sm:$0xff]  ;;  %779 = vst [vmem:[#allocation2 + $0x20] sm:$0xff] %v749_v16  ;;  %1046 = vmatpush.msra.mxu0 %v2096_v56  ;;  %1271 = vmatpush.msrb.mxu2 %v2132_v63 }
  0xb1   : > { %v4115_v51 = vsel %vm3194_vm3, 4294967295, %v4114_v51  ;;  %vm3213_vm6 = vmand %vm3041_vm15, %vm4116_vm11  ;;  %v613_v3 = vmax.f32 %v583_v59, 0.0  ;;  %v598_v40 = vmax.f32 %v568_v7, 0.0  ;;  %v585_v48 = vadd.f32 %v2814_v14, %v554_v8  ;;  %v825_v59 = vld [vmem:[%s4041_s5 + $0x20] sm:$0xff]  ;;  %919 = vmatmul.f32.vlgmr.msra.gmra.mxu3 %v3239_v23  ;;  %787 = vst [vmem:[#allocation2 + $0x60] sm:$0xff] %v757_v50  ;;  %v838_v50 = vld [vmem:[#allocation2 + $0x9] sm:$0xff] }
  0xb2   : > { %vm3228_vm14 = vmand %vm3112_vm13, %vm4116_vm11  ;;  %v607_v15 = vmax.f32 %v577_v39, 0.0  ;;  %v3241_v13 = vmax.f32 %v584_v43, 0.0  ;;  %vm4121_vm11 = vcmp.ge.s32.totalorder %v2597_v53, 0  ;;  %v4122_v42 = vmov 0  ;;  %v2095_v39 = vld [vmem:[%s4041_s5 + $0x108] sm:$0xff]  ;;  %788 = vst [vmem:[#allocation2 + $0x68] sm:$0xff] %v758_v52  ;;  %946 = vmatpush.msrb.mxu3 %v825_v59 }
  0xb3   : > { %vm3247_vm9 = vmand %vm3194_vm3, %vm4121_vm11  ;;  %v547_v16 = vmul.f32 %v2812_v12, %v2788_v54  ;;  %v555_v7 = vmul.f32 %v2812_v12, %v2804_v6  ;;  %v765_v8 = vsel %vm3175_vm0, %v613_v3, 0.0  ;;  %v750_v49 = vsel %vm3213_vm6, %v598_v40, 0.0  ;;  %v2131_v54 = vld [vmem:[%s4041_s5 + $0x228] sm:$0xff]  ;;  %v824_v43 = vld [vmem:[%s4041_s5 + $0x18] sm:$0xff]  ;;  %889 = vmatmul.f32.gmra.mxu0 %v838_v50 }
  0xb4   : > { %v4123_v42 = vsel %vm3247_vm9, 4294967295, %v4122_v42  ;;  %v3263_v18 = vmax.f32 %v585_v48, 0.0  ;;  %v556_v6 = vmul.f32 %v2812_v12, %v2807_v10  ;;  %vm4124_vm11 = vcmp.lt.s32.totalorder %v2827_v19, 16  ;;  %795 = vst [vmem:[#allocation2 + $0xa0] sm:$0x3] %v765_v8  ;;  %v2130_v48 = vld [vmem:[%s4041_s5 + $0x220] sm:$0xff]  ;;  %1047 = vmatpush.msra.mxu0 %v2095_v39  ;;  %1272 = vmatpush.msrb.mxu2 %v2131_v54 }
  0xb5   : > { %vm4125_vm0 = vcmp.ge.s32.totalorder %v2827_v19, 0  ;;  %v4126_v35 = vmov 0  ;;  %v759_v2 = vsel %vm3228_vm14, %v607_v15, 0.0  ;;  %v578_v10 = vadd.f32 %v2814_v14, %v547_v16  ;;  %v3320_v59 = vld [vmem:[#allocation2 + $0x39] sm:$0xff]  ;;  %780 = vst [vmem:[#allocation2 + $0x28] sm:$0x3] %v750_v49  ;;  %947 = vmatpush.msrb.mxu3 %v824_v43 }
  0xb6   : > { %vm3277_vm13 = vmand %vm4125_vm0, %vm4124_vm11  ;;  %vm4128_vm6 = vcmp.ge.s32.totalorder %v2597_v53, 0  ;;  %v586_v52 = vadd.f32 %v2814_v14, %v555_v7  ;;  %v766_v3 = vsel %vm3247_vm9, %v3241_v13, 0.0  ;;  %v767_v40 = vsel %vm3194_vm3, %v3263_v18, 0.0  ;;  %v823_v8 = vld [vmem:[%s4041_s5 + $0x10] sm:$0xff]  ;;  %901 = vmatmul.f32.gmra.mxu1 %v3320_v59  ;;  %789 = vst [vmem:[#allocation2 + $0x70] sm:$0x3] %v759_v2  ;;  %1048 = vmatpush.msra.mxu0 %v2094_v41 }
  0xb7   : > { %v4127_v35 = vsel %vm3277_vm13, 4294967295, %v4126_v35  ;;  %vm3291_vm11 = vmand %vm2888_vm4, %vm4128_vm6  ;;  %vm4131_vm0 = vcmp.lt.s32.totalorder %v2664_v34, 16  ;;  %v587_v63 = vadd.f32 %v2814_v14, %v556_v6  ;;  %v557_v15 = vmul.f32 %v2812_v12, %v2810_v11  ;;  %v2129_v39 = vld [vmem:[%s4041_s5 + $0x218] sm:$0xff]  ;;  %796 = vst [vmem:[#allocation2 + $0xa8] sm:$0xff] %v766_v3  ;;  %1273 = vmatpush.msrb.mxu2 %v2130_v48  ;;  %948 = vmatpush.msrb.mxu3 %v823_v8  ;;  %v2128_v3 = vld [vmem:[%s4041_s5 + $0x210] sm:$0xff] }
  0xb8   : > { %vm3313_vm6 = vmand %vm3194_vm3, %vm4131_vm0  ;;  %v3322_v16 = vmax.f32 %v578_v10, 0.0  ;;  %v616_v7 = vmax.f32 %v586_v52, 0.0  ;;  %vm4134_vm0 = vcmp.ge.s32.totalorder %v2597_v53, 0  ;;  %v558_v11 = vmul.f32 %v2812_v12, %v2830_v21  ;;  %797 = vst [vmem:[#allocation2 + $0xb0] sm:$0xff] %v767_v40  ;;  %v822_v52 = vld [vmem:[%s4041_s5 + $0x8] sm:$0xff] }
  0xb9   : > { %vm3331_vm14 = vmand %vm3277_vm13, %vm4134_vm0  ;;  %v559_v49 = vmul.f32 %v2812_v12, %v2847_v24  ;;  %v3343_v54 = vmax.f32 %v587_v63, 0.0  ;;  %v588_v50 = vadd.f32 %v2814_v14, %v557_v15  ;;  %v560_v10 = vmul.f32 %v2812_v12, %v2850_v26  ;;  %v3356_v24 = vld [vmem:[#allocation2 + $0x51] sm:$0xff]  ;;  %1274 = vmatpush.msrb.mxu2 %v2129_v39  ;;  %v3414_v39 = vld [vmem:[#allocation2 + $0x19] sm:$0xff]  ;;  %949 = vmatpush.msrb.mxu3 %v822_v52 }
  0xba   : > { %vm4137_vm0 = vcmp.lt.s32.totalorder %v2852_v58, 16  ;;  %vm4138_vm3 = vcmp.ge.s32.totalorder %v2852_v58, 0  ;;  %v4139_v21 = vmov 0  ;;  %v760_v2 = vsel %vm3291_vm11, %v3322_v16, 0.0  ;;  %907 = vmatmul.f32.gmra.mxu2 %v3356_v24  ;;  %v3392_v15 = vld [vmem:[#allocation2 + $0x91] sm:$0xff] }
  0xbb   : > { %vm3352_vm9 = vmand %vm4138_vm3, %vm4137_vm0  ;;  %v768_v26 = vsel %vm3313_vm6, %v616_v7, 0.0  ;;  %v589_v43 = vadd.f32 %v2814_v14, %v558_v11  ;;  %v3365_v58 = vadd.f32 %v2814_v14, %v559_v49  ;;  %v769_v41 = vsel %vm3331_vm14, %v3343_v54, 0.0  ;;  %790 = vst [vmem:[#allocation2 + $0x78] sm:$0xff] %v760_v2  ;;  %922 = vmatmul.f32.gmra.mxu3 %v3392_v15  ;;  %1275 = vmatpush.msrb.mxu2 %v2128_v3  ;;  %v2205_v52 = vld [vmem:[%s4041_s5 + $0x478] sm:$0xff] }
  0xbc   : > { %v4140_v21 = vsel %vm3352_vm9, 4294967295, %v4139_v21  ;;  %v3377_v48 = vmax.f32 %v588_v50, 0.0  ;;  %vm4142_vm3 = vcmp.lt.s32.totalorder %v2664_v34, 16  ;;  %v3388_v56 = vadd.f32 %v2814_v14, %v560_v10  ;;  %798 = vst [vmem:[#allocation2 + $0xb8] sm:$0x3] %v768_v26  ;;  %v2157_v50 = vld [vmem:[%s4041_s5 + $0x2f8] sm:$0xff]  ;;  %892 = vmatmul.f32.gmra.mxu0 %v3414_v39 }
  0xbd   : > { %4141 = vst [vmem:[#allocation4_spill] sm:$0xff] %v4140_v21  ;;  %vm3383_vm6 = vmand %vm3277_vm13, %vm4142_vm3  ;;  %v561_v63 = vmul.f32 %v2812_v12, %v3133_v29  ;;  %v619_v7 = vmax.f32 %v589_v43, 0.0  ;;  %v4066_v8 = vmax.f32 %v3365_v58, 0.0  ;;  %vm4145_vm0 = vcmp.ge.s32.totalorder %v2597_v53, 0  ;;  %v2127_v12 = vld [vmem:[%s4041_s5 + $0x208] sm:$0xff]  ;;  %v821_v29 = vld [vmem:[%s4041_s5] sm:$0xff] }
  0xbe   : > { %vm3399_vm3 = vmand %vm3352_vm9, %vm4145_vm0  ;;  %v770_v53 = vsel %vm3277_vm13, %v3377_v48, 0.0  ;;  %799 = vst [vmem:[#allocation2 + $0xc0] sm:$0xff] %v769_v41  ;;  %v4065_v2 = vmax.f32 %v3388_v56, 0.0  ;;  %vm4148_vm0 = vcmp.lt.s32.totalorder %v2664_v34, 16  ;;  %1276 = vmatpush.msrb.mxu2 %v2127_v12  ;;  %950 = vmatpush.msrb.mxu3 %v821_v29  ;;  %v3444_v41 = vld [vmem:[#allocation2 + $0x61] sm:$0xff]  ;;  %v3447_v40 = vld [vmem:[#allocation2 + $0x99] sm:$0xff] }
  0xbf   : > { %v592_v49 = vadd.f32 %v2814_v14, %v561_v63  ;;  %v771_v10 = vsel %vm3383_vm6, %v619_v7, 0.0  ;;  %vm744_vm13 = vmand %vm3352_vm9, %vm4148_vm0  ;;  %v2126_v14 = vld [vmem:[%s4041_s5 + $0x200] sm:$0xff]  ;;  %800 = vst [vmem:[#allocation2 + $0xc8] sm:$0xff] %v770_v53  ;;  %v772_v26 = vsel %vm3399_vm3, %v4066_v8, 0.0  ;;  %2301 = vmatmul.msk.f32.vlgmr.msra.gmra.mxu1 %vm3093_vm2, %v3102_v60  ;;  %v2156_v63 = vld [vmem:[%s4041_s5 + $0x2f0] sm:$0xff] }
  0xc0   : > { %801 = vst [vmem:[#allocation2 + $0xd0] sm:$0x3] %v771_v10  ;;  %v773_v34 = vsel %vm3352_vm9, %v4065_v2, 0.0  ;;  %1376 = vmatpush.msra.mxu3 %v2157_v50  ;;  %1277 = vmatpush.msrb.mxu2 %v2126_v14  ;;  %v2173_v7 = vld [vmem:[%s4041_s5 + $0x378] sm:$0xff]  ;;  %v840_v29 = vld [vmem:[#allocation2 + $0x21] sm:$0xff]  ;;  %v2204_v53 = vld [vmem:[%s4041_s5 + $0x470] sm:$0xff] }
  0xc1   : > { %v622_v43 = vmax.f32 %v592_v49, 0.0  ;;  %802 = vst [vmem:[#allocation2 + $0xd8] sm:$0xff] %v772_v26  ;;  %v2189_v12 = vld [vmem:[%s4041_s5 + $0x3f8] sm:$0xff]  ;;  %1491 = vmatpush.msrb.mxu0 %v2173_v7  ;;  %v3465_v49 = vld [vmem:[#allocation2 + $0x69] sm:$0xff] }
  0xc2   : > { %803 = vst [vmem:[#allocation2 + $0xe0] sm:$0xff] %v773_v34  ;;  %910 = vmatmul.f32.gmra.mxu2 %v3444_v41  ;;  %1377 = vmatpush.msra.mxu3 %v2156_v63  ;;  %v3468_v50 = vld [vmem:[#allocation2 + $0xa9] sm:$0xff]  ;;  %v2154_v63 = vld [vmem:[%s4041_s5 + $0x2e0] sm:$0xff] }
  0xc3   : > { %v774_v3 = vsel %vm744_vm13, %v622_v43, 0.0  ;;  %1719 = vmatpush.msra.mxu2 %v2205_v52  ;;  %925 = vmatmul.f32.gmra.mxu3 %v3447_v40  ;;  %v2155_v10 = vld [vmem:[%s4041_s5 + $0x2e8] sm:$0xff]  ;;  %v2172_v14 = vld [vmem:[%s4041_s5 + $0x370] sm:$0xff]  ;;  %v3486_v52 = vld [vmem:[#allocation2 + $0x79] sm:$0xff] }
  0xc4   : > { %804 = vst [vmem:[#allocation2 + $0xe8] sm:$0x3] %v774_v3  ;;  %895 = vmatmul.f32.gmra.mxu0 %v840_v29  ;;  %1605 = vmatpush.msrb.mxu1 %v2189_v12  ;;  %v2188_v26 = vld [vmem:[%s4041_s5 + $0x3f0] sm:$0xff]  ;;  %v1000_v43 = vld [vmem:[#allocation2 + $0x2] sm:$0xff] }
  0xc5   : > { %1720 = vmatpush.msra.mxu2 %v2204_v53  ;;  %1378 = vmatpush.msra.mxu3 %v2155_v10  ;;  %v2203_v34 = vld [vmem:[%s4041_s5 + $0x468] sm:$0xff]  ;;  %v3489_v3 = vld [vmem:[#allocation2 + $0xb1] sm:$0xff]  ;;  %v2202_v10 = vld [vmem:[%s4041_s5 + $0x460] sm:$0xff] }
  0xc6   : > { %1492 = vmatpush.msrb.mxu0 %v2172_v14  ;;  %1606 = vmatpush.msrb.mxu1 %v2188_v26  ;;  %v2171_v7 = vld [vmem:[%s4041_s5 + $0x368] sm:$0xff]  ;;  %v4149_v14 = vmax.f32 %v2899_v25, 0.0  ;;  %v2153_v26 = vld [vmem:[%s4041_s5 + $0x2d8] sm:$0xff]  ;;  %v4150_v25 = vmax.f32 %v2902_v33, 0.0 }
  0xc7   : > { %2302 = vmatmul.msk.f32.gmra.mxu1 %vm3041_vm15, %v3104_v61  ;;  %1721 = vmatpush.msra.mxu2 %v2203_v34  ;;  %v2187_v12 = vld [vmem:[%s4041_s5 + $0x3e8] sm:$0xff]  ;;  %v2186_v34 = vld [vmem:[%s4041_s5 + $0x3e0] sm:$0xff] }
  0xc8   : > { %v1001_v53 = vld [vmem:[#allocation2 + $0xa] sm:$0xff]  ;;  %1379 = vmatpush.msra.mxu3 %v2154_v63  ;;  %1493 = vmatpush.msrb.mxu0 %v2171_v7  ;;  %v3521_v63 = vld [vmem:[#allocation2 + $0x1a] sm:$0xff] }
  0xc9   : > { %1607 = vmatpush.msrb.mxu1 %v2187_v12  ;;  %1722 = vmatpush.msra.mxu2 %v2202_v10  ;;  %v2169_v7 = vld [vmem:[%s4041_s5 + $0x358] sm:$0xff]  ;;  %v2151_v33 = vld [vmem:[%s4041_s5 + $0x2c8] sm:$0xff]  ;;  %v2184_v10 = vld [vmem:[%s4041_s5 + $0x3d0] sm:$0xff] }
  0xca   : > { %913 = vmatmul.f32.gmra.mxu2 %v3465_v49  ;;  %1380 = vmatpush.msra.mxu3 %v2153_v26  ;;  %v2185_v12 = vld [vmem:[%s4041_s5 + $0x3d8] sm:$0xff]  ;;  %v2183_v26 = vld [vmem:[%s4041_s5 + $0x3c8] sm:$0xff] }
  0xcb   : > { %928 = vmatmul.f32.gmra.mxu3 %v3468_v50  ;;  %1608 = vmatpush.msrb.mxu1 %v2186_v34  ;;  %v2182_v34 = vld [vmem:[%s4041_s5 + $0x3c0] sm:$0xff]  ;;  %v1460_v2 = vld [vmem:[#allocation2 + $0x48] sm:$0xff] }
  0xcc   : > { %1049 = vmatmul.f32.vlgmr.msra.gmra.mxu0 %v1000_v43  ;;  %v2170_v43 = vld [vmem:[%s4041_s5 + $0x360] sm:$0xff]  ;;  %1723 = vmatpush.msra.mxu2 %v2201_v1  ;;  %v3609_v1 = vld [vmem:[#allocation2 + $0x4a] sm:$0xff] }
  0xcd   : > { %1494 = vmatpush.msrb.mxu0 %v2170_v43  ;;  %1609 = vmatpush.msrb.mxu1 %v2185_v12  ;;  %v3587_v43 = vld [vmem:[#allocation2 + $0x3a] sm:$0xff]  ;;  %v2180_v12 = vld [vmem:[%s4041_s5 + $0x3b0] sm:$0xff] }
  0xce   : > { %1724 = vmatpush.msra.mxu2 %v2200_v20  ;;  %v3653_v20 = vld [vmem:[#allocation2 + $0x62] sm:$0xff] }
  0xcf   : > { %2303 = vmatmul.msk.f32.gmra.mxu1 %vm2910_vm5, %v2942_v31  ;;  %1495 = vmatpush.msrb.mxu0 %v2169_v7  ;;  %v2164_v7 = vld [vmem:[%s4041_s5 + $0x330] sm:$0xff] }
  0xd0   : > { %1610 = vmatpush.msrb.mxu1 %v2184_v10  ;;  %1725 = vmatpush.msra.mxu2 %v2199_v0  ;;  %v3675_v10 = vld [vmem:[#allocation2 + $0x6a] sm:$0xff]  ;;  %v2145_v0 = vld [vmem:[%s4041_s5 + $0x298] sm:$0xff] }
  0xd2   : > { %916 = vmatmul.f32.gmra.mxu2 %v3486_v52  ;;  %1611 = vmatpush.msrb.mxu1 %v2183_v26  ;;  %v3700_v26 = vld [vmem:[#allocation2 + $0x7a] sm:$0xff] }
  0xd3   : > { %931 = vmatmul.f32.gmra.mxu3 %v3489_v3  ;;  %1726 = vmatpush.msra.mxu2 %v2198_v45  ;;  %v2176_v45 = vld [vmem:[%s4041_s5 + $0x390] sm:$0xff] }
  0xd4   : > { %1052 = vmatmul.f32.gmra.mxu0 %v1001_v53  ;;  %v3543_v53 = vld [vmem:[#allocation2 + $0x22] sm:$0xff]  ;;  %1612 = vmatpush.msrb.mxu1 %v2182_v34 }
  0xd5   : > { %1727 = vmatpush.msra.mxu2 %v2197_v37  ;;  %v2174_v34 = vld [vmem:[%s4041_s5 + $0x380] sm:$0xff]  ;;  %v2144_v37 = vld [vmem:[%s4041_s5 + $0x290] sm:$0xff] }
  0xd7   : > { %2304 = vmatmul.msk.f32.gmra.mxu1 %vm2836_vm1, %v2944_v32  ;;  %1728 = vmatpush.msra.mxu2 %v2196_v22 }
  0xd9   : > { %1729 = vmatpush.msra.mxu2 %v2195_v55 }
  0xda   : > { %1278 = vmatmul.f32.vlgmr.msrb.gmra.mxu2 %v3414_v39  ;;  %v2152_v39 = vld [vmem:[%s4041_s5 + $0x2d0] sm:$0xff] }
  0xdb   : > { %2305 = vmatmul.msk.f32.vlgmr.msrb.gmra.mxu3 %vm2795_vm12, %v4149_v14  ;;  %v3565_v14 = vld [vmem:[#allocation2 + $0x32] sm:$0xff]  ;;  %vm4152_vm12 = vnez %v4105_v46 }
  0xdc   : > { %1055 = vmatmul.f32.gmra.mxu0 %v3521_v63  ;;  %1381 = vmatpush.msra.mxu3 %v2152_v39  ;;  %v3631_v39 = vld [vmem:[#allocation2 + $0x52] sm:$0xff] }
  0xdd   : > { %v2192_v46 = vld [vmem:[%s4041_s5 + $0x410] sm:$0xff] }
  0xde   : > { %1382 = vmatpush.msra.mxu3 %v2151_v33  ;;  %v2163_v33 = vld [vmem:[%s4041_s5 + $0x328] sm:$0xff] }
  0xdf   : > { %2306 = vmatmul.msk.f32.gmra.mxu1 %vm2928_vm8, %v2960_v57 }
  0xe2   : > { %1281 = vmatmul.f32.gmra.mxu2 %v840_v29  ;;  %v2168_v29 = vld [vmem:[%s4041_s5 + $0x350] sm:$0xff] }
  0xe3   : > { %2307 = vmatmul.msk.f32.gmra.mxu3 %vm2746_vm10, %v4150_v25  ;;  %vm4151_vm10 = vnez %v4075_v38  ;;  %1496 = vmatpush.msrb.mxu0 %v2168_v29  ;;  %v2181_v25 = vld [vmem:[%s4041_s5 + $0x3b8] sm:$0xff]  ;;  %v2179_v29 = vld [vmem:[%s4041_s5 + $0x3a8] sm:$0xff]  ;;  %v2194_v38 = vld [vmem:[%s4041_s5 + $0x420] sm:$0xff] }
  0xe4   : > { %1058 = vmatmul.f32.gmra.mxu0 %v3543_v53  ;;  %1613 = vmatpush.msrb.mxu1 %v2181_v25  ;;  %v2160_v25 = vld [vmem:[%s4041_s5 + $0x310] sm:$0xff] }
  0xe5   : > { %1730 = vmatpush.msra.mxu2 %v2194_v38  ;;  %v3779_v38 = vld [vmem:[#allocation2 + $0x9a] sm:$0xff] }
  0xe6   : > { %1614 = vmatpush.msrb.mxu1 %v2180_v12  ;;  %v2158_v12 = vld [vmem:[%s4041_s5 + $0x300] sm:$0xff] }
  0xe7   : > { %2308 = vmatmul.msk.f32.gmra.mxu1 %vm4151_vm10, %v2962_v62 }
  0xe8   : > { %1615 = vmatpush.msrb.mxu1 %v2179_v29 }
  0xea   : > { %1284 = vmatmul.f32.gmra.mxu2 %v3164_v36  ;;  %v2167_v36 = vld [vmem:[%s4041_s5 + $0x348] sm:$0xff] }
  0xeb   : > { %2309 = vmatmul.msk.f32.gmra.mxu3 %vm3093_vm2, %v3102_v60  ;;  %v2150_v60 = vld [vmem:[%s4041_s5 + $0x2c0] sm:$0xff]  ;;  %1497 = vmatpush.msrb.mxu0 %v2167_v36  ;;  %v2177_v36 = vld [vmem:[%s4041_s5 + $0x398] sm:$0xff]  ;;  %vm4156_vm2 = vnez %v4123_v42 }
  0xec   : > { %1061 = vmatmul.f32.gmra.mxu0 %v3565_v14  ;;  %1383 = vmatpush.msra.mxu3 %v2150_v60  ;;  %v2162_v60 = vld [vmem:[%s4041_s5 + $0x320] sm:$0xff] }
  0xef   : > { %2310 = vmatmul.msk.f32.gmra.mxu1 %vm3150_vm7, %v3169_v9 }
  0xf2   : > { %1287 = vmatmul.f32.gmra.mxu2 %v3320_v59  ;;  %v2166_v59 = vld [vmem:[%s4041_s5 + $0x340] sm:$0xff] }
  0xf3   : > { %2311 = vmatmul.msk.f32.gmra.mxu3 %vm3041_vm15, %v3104_v61  ;;  %v2149_v61 = vld [vmem:[%s4041_s5 + $0x2b8] sm:$0xff]  ;;  %1498 = vmatpush.msrb.mxu0 %v2166_v59  ;;  %vm4154_vm15 = vnez %v4098_v47  ;;  %v2175_v59 = vld [vmem:[%s4041_s5 + $0x388] sm:$0xff] }
  0xf4   : > { %1064 = vmatmul.f32.gmra.mxu0 %v3587_v43  ;;  %1384 = vmatpush.msra.mxu3 %v2149_v61  ;;  %v2193_v61 = vld [vmem:[%s4041_s5 + $0x418] sm:$0xff] }
  0xf5   : > { %1731 = vmatpush.msra.mxu2 %v2193_v61 }
  0xf7   : > { %2312 = vmatmul.msk.f32.gmra.mxu1 %vm4152_vm12, %v3184_v30  ;;  %1732 = vmatpush.msra.mxu2 %v2192_v46 }
  0xfa   : > { %1290 = vmatmul.f32.gmra.mxu2 %v3204_v4  ;;  %v2165_v4 = vld [vmem:[%s4041_s5 + $0x338] sm:$0xff] }
  0xfb   : > { %2313 = vmatmul.msk.f32.gmra.mxu3 %vm2910_vm5, %v2942_v31  ;;  %v2148_v31 = vld [vmem:[%s4041_s5 + $0x2b0] sm:$0xff]  ;;  %1499 = vmatpush.msrb.mxu0 %v2165_v4  ;;  %v3728_v4 = vld [vmem:[#allocation2 + $0x82] sm:$0xff]  ;;  %vm4157_vm5 = vnez %v4115_v51 }
  0xfc   : > { %1067 = vmatmul.f32.gmra.mxu0 %v3609_v1  ;;  %1385 = vmatpush.msra.mxu3 %v2148_v31  ;;  %v2161_v31 = vld [vmem:[%s4041_s5 + $0x318] sm:$0xff] }
  0xfd   : > { %1500 = vmatpush.msrb.mxu0 %v2164_v7  ;;  %v2191_v7 = vld [vmem:[%s4041_s5 + $0x408] sm:$0xff] }
  0xfe   : > { %1733 = vmatpush.msra.mxu2 %v2191_v7  ;;  %v3826_v7 = vld [vmem:[#allocation2 + $0xc9] sm:$0xff] }
  0xff   : > { %2314 = vmatmul.msk.f32.gmra.mxu1 %vm3291_vm11, %v3322_v16  ;;  %1501 = vmatpush.msrb.mxu0 %v2163_v33 }
 0x100   : > { %1734 = vmatpush.msra.mxu2 %v2190_v5 }
 0x101   : > { %1502 = vmatpush.msrb.mxu0 %v2162_v60  ;;  %v3798_v60 = vld [vmem:[#allocation2 + $0xaa] sm:$0xff] }
 0x102   : > { %1293 = vmatmul.f32.gmra.mxu2 %v3356_v24  ;;  %v2147_v24 = vld [vmem:[%s4041_s5 + $0x2a8] sm:$0xff] }
 0x103   : > { %2315 = vmatmul.msk.f32.gmra.mxu3 %vm2836_vm1, %v2944_v32  ;;  %v4153_v32 = vld [vmem:[#allocation3_spill] sm:$0xff]  ;;  %vm4155_vm1 = vnez %v4090_v27  ;;  %1503 = vmatpush.msrb.mxu0 %v2161_v31  ;;  %v3816_v31 = vld [vmem:[#allocation2 + $0xc1] sm:$0xff] }
 0x104   : > { %1070 = vmatmul.f32.gmra.mxu0 %v3631_v39  ;;  %1386 = vmatpush.msra.mxu3 %v2147_v24  ;;  %v3751_v24 = vld [vmem:[#allocation2 + $0x92] sm:$0xff] }
 0x105   : > { %1504 = vmatpush.msrb.mxu0 %v2160_v25 }
 0x107   : > { %2316 = vmatmul.msk.f32.gmra.mxu1 %vm2888_vm4, %v4153_v32 }
 0x10a   : > { %1296 = vmatmul.f32.gmra.mxu2 %v3444_v41 }
 0x10b   : > { %2317 = vmatmul.msk.f32.gmra.mxu3 %vm2928_vm8, %v2960_v57  ;;  %v2146_v57 = vld [vmem:[%s4041_s5 + $0x2a0] sm:$0xff] }
 0x10c   : > { %1073 = vmatmul.f32.gmra.mxu0 %v3653_v20  ;;  %1387 = vmatpush.msra.mxu3 %v2146_v57  ;;  %v2142_v57 = vld [vmem:[%s4041_s5 + $0x280] sm:$0xff] }
 0x10e   : > { %1388 = vmatpush.msra.mxu3 %v2145_v0 }
 0x10f   : > { %2318 = vmatmul.msk.f32.gmra.mxu1 %vm4154_vm15, %v3087_v44 }
 0x110   : > { %1389 = vmatpush.msra.mxu3 %v2144_v37  ;;  %v1573_v37 = vld [vmem:[#allocation2 + $0x39] sm:$0xff] }
 0x112   : > { %1299 = vmatmul.f32.gmra.mxu2 %v3465_v49 }
 0x113   : > { %2319 = vmatmul.msk.f32.gmra.mxu3 %vm4151_vm10, %v2962_v62  ;;  %v2178_v62 = vld [vmem:[%s4041_s5 + $0x3a0] sm:$0xff] }
 0x114   : > { %1076 = vmatmul.f32.gmra.mxu0 %v3675_v10  ;;  %1616 = vmatpush.msrb.mxu1 %v2178_v62 }
 0x116   : > { %1617 = vmatpush.msrb.mxu1 %v2177_v36 }
 0x117   : > { %2320 = vmatmul.msk.f32.gmra.mxu1 %vm4155_vm1, %v3100_v17 }
 0x118   : > { %1618 = vmatpush.msrb.mxu1 %v2176_v45  ;;  %v1572_v45 = vld [vmem:[#allocation2 + $0x31] sm:$0xff] }
 0x11a   : > { %1302 = vmatmul.f32.gmra.mxu2 %v3486_v52  ;;  %1619 = vmatpush.msrb.mxu1 %v2175_v59  ;;  %v3811_v59 = vld [vmem:[#allocation2 + $0xb2] sm:$0xff] }
 0x11b   : > { %2321 = vmatmul.msk.f32.gmra.mxu3 %vm3150_vm7, %v3169_v9 }
 0x11c   : > { %1079 = vmatmul.f32.gmra.mxu0 %v3700_v26  ;;  %1620 = vmatpush.msrb.mxu1 %v2174_v34 }
 0x11f   : > { %2322 = vmatmul.msk.f32.gmra.mxu1 %vm4156_vm2, %v3241_v13 }
 0x122   : > { %1305 = vmatmul.f32.gmra.mxu2 %v3239_v23  ;;  %v2143_v23 = vld [vmem:[%s4041_s5 + $0x288] sm:$0xff] }
 0x123   : > { %2323 = vmatmul.msk.f32.gmra.mxu3 %vm4152_vm12, %v3184_v30 }
 0x124   : > { %1082 = vmatmul.f32.gmra.mxu0 %v3728_v4  ;;  %1390 = vmatpush.msra.mxu3 %v2143_v23  ;;  %v1458_v23 = vld [vmem:[#allocation2 + $0x30] sm:$0xff] }
 0x126   : > { %1391 = vmatpush.msra.mxu3 %v2142_v57  ;;  %v1459_v57 = vld [vmem:[#allocation2 + $0x38] sm:$0xff] }
 0x127   : > { %2324 = vmatmul.msk.f32.gmra.mxu1 %vm4157_vm5, %v3263_v18 }
 0x128   : > { %v3738_v30 = vpop.f32.mrf.mxu0 }
 0x12a   : > { %1308 = vmatmul.f32.gmra.mxu2 %v3392_v15  ;;  %v3749_v22 = vpop.f32.mrf.mxu1  ;;  %v2159_v15 = vld [vmem:[%s4041_s5 + $0x308] sm:$0xff] }
 0x12b   : > { %2325 = vmatmul.msk.f32.gmra.mxu3 %vm3291_vm11, %v3322_v16  ;;  %1505 = vmatpush.msrb.mxu0 %v2159_v15  ;;  %v1574_v15 = vld [vmem:[#allocation2 + $0x49] sm:$0xff] }
 0x12c   : > { %1085 = vmatmul.f32.gmra.mxu0 %v3751_v24 }
 0x12d   : > { %1506 = vmatpush.msrb.mxu0 %v2158_v12 }
 0x12f   : > { %2326 = vmatmul.msk.f32.gmra.mxu1 %vm3331_vm14, %v3343_v54 }
 0x130   : > { %v3767_v55 = vpop.f32.mrf.mxu0 }
 0x132   : > { %1311 = vmatmul.f32.gmra.mxu2 %v3447_v40  ;;  %v3775_v33 = vpop.f32.mrf.mxu2 }
 0x133   : > { %2327 = vmatmul.msk.f32.gmra.mxu3 %vm2888_vm4, %v4153_v32  ;;  %v3777_v29 = vpop.f32.mrf.mxu1  ;;  %vm4158_vm4 = vnez %v4127_v35  ;;  %v4162_v35 = vmax.f32 %v3365_v58, 0.0 }
 0x134   : > { %1088 = vmatmul.f32.gmra.mxu0 %v3779_v38  ;;  %v3782_v40 = vpop.f32.mrf.mxu3 }
 0x137   : > { %2328 = vmatmul.msk.f32.gmra.mxu1 %vm4158_vm4, %v3377_v48 }
 0x139   : > { %v3791_v32 = vpop.f32.mrf.mxu0 }
 0x13a   : > { %1314 = vmatmul.f32.gmra.mxu2 %v3468_v50 }
 0x13b   : > { %2329 = vmatmul.msk.f32.gmra.mxu3 %vm4154_vm15, %v3087_v44 }
 0x13c   : > { %v1165_v0 = vpop.f32.mrf.mxu1  ;;  %1091 = vmatmul.f32.gmra.mxu0 %v3798_v60 }
 0x13d   : > { %v3796_v62 = vpop.f32.mrf.mxu2 }
 0x13e   : > { %v3801_v36 = vpop.f32.mrf.mxu3 }
 0x13f   : > { %1621 = vmatmul.f32.vlgmr.msrb.gmra.mxu1 %v1572_v45  ;;  %v1575_v45 = vld [vmem:[#allocation2 + $0x51] sm:$0xff] }
 0x141   : > { %v3804_v61 = vpop.f32.mrf.mxu0 }
 0x142   : > { %1317 = vmatmul.f32.gmra.mxu2 %v3489_v3 }
 0x143   : > { %2330 = vmatmul.msk.f32.gmra.mxu3 %vm4155_vm1, %v3100_v17 }
 0x144   : > { %v1168_v44 = vpop.f32.mrf.mxu1  ;;  %1094 = vmatmul.f32.gmra.mxu0 %v3811_v59 }
 0x145   : > { %v3809_v47 = vpop.f32.mrf.mxu2 }
 0x146   : > { %v3814_v34 = vpop.f32.mrf.mxu3 }
 0x147   : > { %4159 = vst [vmem:[#allocation3_spill] sm:$0xff] %v3814_v34  ;;  %1624 = vmatmul.f32.gmra.mxu1 %v1573_v37 }
 0x149   : > { %v1050_v46 = vpop.f32.mrf.mxu0 }
 0x14a   : > { %1320 = vmatmul.f32.gmra.mxu2 %v3816_v31 }
 0x14b   : > { %2331 = vmatmul.msk.f32.gmra.mxu3 %vm4156_vm2, %v3241_v13 }
 0x14c   : > { %v1171_v17 = vpop.f32.mrf.mxu1  ;;  %1507 = vmatmul.f32.vlgmr.msrb.gmra.mxu0 %v1458_v23 }
 0x14d   : > { %v3822_v27 = vpop.f32.mrf.mxu2 }
 0x14e   : > { %v3824_v25 = vpop.f32.mrf.mxu3 }
 0x14f   : > { %4160 = vst [vmem:[#allocation5_spill] sm:$0xff] %v3824_v25  ;;  %1627 = vmatmul.f32.gmra.mxu1 %v1574_v15 }
 0x151   : > { %v1053_v12 = vpop.f32.mrf.mxu0 }
 0x152   : > { %1323 = vmatmul.f32.gmra.mxu2 %v3826_v7 }
 0x153   : > { %2332 = vmatmul.msk.f32.gmra.mxu3 %vm4157_vm5, %v3263_v18 }
 0x154   : > { %v1174_v13 = vpop.f32.mrf.mxu1  ;;  %1510 = vmatmul.f32.gmra.mxu0 %v1459_v57 }
 0x155   : > { %v3832_v42 = vpop.f32.mrf.mxu2 }
 0x156   : > { %v3834_v5 = vpop.f32.mrf.mxu3 }
 0x157   : > { %4161 = vst [vmem:[#allocation6_spill] sm:$0xff] %v3834_v5  ;;  %1630 = vmatmul.f32.gmra.mxu1 %v1575_v45 }
 0x159   : > { %v1056_v37 = vpop.f32.mrf.mxu0 }
 0x15a   : > { %1735 = vmatmul.f32.vlgmr.msra.gmra.mxu2 %v3565_v14 }
 0x15b   : > { %1392 = vmatmul.f32.vlgmr.msra.gmra.mxu3 %v3521_v63  ;;  %v1461_v63 = vld [vmem:[#allocation2 + $0x50] sm:$0xff] }
 0x15c   : > { %v1177_v15 = vpop.f32.mrf.mxu1  ;;  %1513 = vmatmul.f32.gmra.mxu0 %v1460_v2 }
 0x15d   : > { %v1279_v23 = vpop.f32.mrf.mxu2 }
 0x15e   : > { %v952_v51 = vpop.f32.mrf.mxu3 }
 0x15f   : > { %v953_v18 = vadd.f32 %v952_v51, %v3738_v30  ;;  %1633 = vmatmul.f32.gmra.mxu1 %v3444_v41 }
 0x161   : > { %v1098_v8 = vadd.f32 %v1050_v46, %v953_v18  ;;  %v1059_v57 = vpop.f32.mrf.mxu0 }
 0x162   : > { %1738 = vmatmul.f32.gmra.mxu2 %v3587_v43 }
 0x163   : > { %v1213_v5 = vadd.f32 %v1165_v0, %v1098_v8  ;;  %1395 = vmatmul.f32.gmra.mxu3 %v3543_v53 }
 0x164   : > { %v3842_v25 = vpop.f32.mrf.mxu1  ;;  %1516 = vmatmul.f32.gmra.mxu0 %v1461_v63 }
 0x165   : > { %v1282_v45 = vpop.f32.mrf.mxu2  ;;  %v3844_v34 = vadd.f32 %v1279_v23, %v1213_v5  ;;  %v1463_v23 = vld [vmem:[#allocation2 + $0x68] sm:$0xff] }
 0x166   : > { %v955_v2 = vpop.f32.mrf.mxu3 }
 0x167   : > { %v956_v21 = vadd.f32 %v955_v2, %v3767_v55  ;;  %1636 = vmatmul.f32.gmra.mxu1 %v3465_v49  ;;  %v1580_v2 = vld [vmem:[#allocation2 + $0x91] sm:$0xff] }
 0x169   : > { %v1099_v41 = vadd.f32 %v1053_v12, %v956_v21  ;;  %v1062_v30 = vpop.f32.mrf.mxu0 }
 0x16a   : > { %1741 = vmatmul.f32.gmra.mxu2 %v3609_v1 }
 0x16b   : > { %v1214_v46 = vadd.f32 %v1168_v44, %v1099_v41  ;;  %1398 = vmatmul.f32.gmra.mxu3 %v3565_v14 }
 0x16c   : > { %v3850_v53 = vpop.f32.mrf.mxu1  ;;  %2333 = vmatmul.msk.f32.gmra.mxu0 %vm3150_vm7, %v3169_v9  ;;  %v1579_v9 = vld [vmem:[#allocation2 + $0x81] sm:$0xff] }
 0x16d   : > { %v1285_v8 = vpop.f32.mrf.mxu2  ;;  %v3852_v0 = vadd.f32 %v1282_v45, %v1214_v46 }
 0x16e   : > { %v958_v5 = vpop.f32.mrf.mxu3 }
 0x16f   : > { %v959_v55 = vadd.f32 %v958_v5, %v3791_v32  ;;  %1639 = vmatmul.f32.gmra.mxu1 %v3486_v52 }
 0x171   : > { %v1100_v21 = vadd.f32 %v1056_v37, %v959_v55  ;;  %v1065_v49 = vpop.f32.mrf.mxu0 }
 0x172   : > { %1744 = vmatmul.f32.gmra.mxu2 %v3631_v39 }
 0x173   : > { %v1215_v44 = vadd.f32 %v1171_v17, %v1100_v21  ;;  %1401 = vmatmul.f32.gmra.mxu3 %v3587_v43 }
 0x174   : > { %v3861_v12 = vpop.f32.mrf.mxu1  ;;  %1522 = vmatmul.f32.gmra.mxu0 %v1463_v23 }
 0x175   : > { %v1288_v14 = vpop.f32.mrf.mxu2  ;;  %v3863_v51 = vadd.f32 %v1285_v8, %v1215_v44  ;;  %v1465_v8 = vld [vmem:[#allocation2 + $0x80] sm:$0xff]  ;;  %v1466_v44 = vld [vmem:[#allocation2 + $0x90] sm:$0xff] }
 0x176   : > { %v961_v28 = vpop.f32.mrf.mxu3 }
 0x177   : > { %v962_v32 = vadd.f32 %v961_v28, %v3804_v61  ;;  %1642 = vmatmul.f32.gmra.mxu1 %v1579_v9 }
 0x179   : > { %v1101_v52 = vadd.f32 %v1059_v57, %v962_v32  ;;  %v1068_v37 = vpop.f32.mrf.mxu0  ;;  %v1467_v32 = vld [vmem:[#allocation2 + $0x98] sm:$0xff] }
 0x17a   : > { %1747 = vmatmul.f32.gmra.mxu2 %v3653_v20 }
 0x17b   : > { %v1216_v18 = vadd.f32 %v1174_v13, %v1101_v52  ;;  %1404 = vmatmul.f32.gmra.mxu3 %v3609_v1 }
 0x17c   : > { %v3868_v17 = vpop.f32.mrf.mxu1  ;;  %2334 = vmatmul.msk.f32.gmra.mxu0 %vm3291_vm11, %v3322_v16  ;;  %v1581_v16 = vld [vmem:[#allocation2 + $0x99] sm:$0xff] }
 0x17d   : > { %v1291_v43 = vpop.f32.mrf.mxu2  ;;  %v3870_v45 = vadd.f32 %v1288_v14, %v1216_v18 }
 0x17e   : > { %v964_v63 = vpop.f32.mrf.mxu3 }
 0x17f   : > { %v965_v61 = vadd.f32 %v964_v63, %v3749_v22  ;;  %1645 = vmatmul.f32.gmra.mxu1 %v1580_v2  ;;  %v1468_v63 = vld [vmem:[#allocation2 + $0xa8] sm:$0xff] }
 0x181   : > { %v1102_v57 = vadd.f32 %v1062_v30, %v965_v61  ;;  %v1071_v13 = vpop.f32.mrf.mxu0 }
 0x182   : > { %1750 = vmatmul.f32.gmra.mxu2 %v3675_v10 }
 0x183   : > { %v1217_v41 = vadd.f32 %v1177_v15, %v1102_v57  ;;  %1407 = vmatmul.f32.gmra.mxu3 %v3631_v39 }
 0x184   : > { %v3878_v46 = vpop.f32.mrf.mxu1  ;;  %1528 = vmatmul.f32.gmra.mxu0 %v1465_v8 }
 0x185   : > { %v1294_v1 = vpop.f32.mrf.mxu2  ;;  %v3880_v5 = vadd.f32 %v1291_v43, %v1217_v41 }
 0x186   : > { %v967_v19 = vpop.f32.mrf.mxu3 }
 0x187   : > { %v968_v55 = vadd.f32 %v967_v19, %v3777_v29  ;;  %1648 = vmatmul.f32.gmra.mxu1 %v1581_v16 }
 0x189   : > { %v1103_v22 = vadd.f32 %v1065_v49, %v968_v55  ;;  %v1074_v30 = vpop.f32.mrf.mxu0 }
 0x18a   : > { %1753 = vmatmul.f32.gmra.mxu2 %v3700_v26 }
 0x18b   : > { %v1218_v15 = vadd.f32 %v3842_v25, %v1103_v22  ;;  %1410 = vmatmul.f32.gmra.mxu3 %v3653_v20  ;;  %v1586_v22 = vld [vmem:[#allocation2 + $0xd9] sm:$0xff] }
 0x18c   : > { %v1195_v21 = vpop.f32.mrf.mxu1  ;;  %1531 = vmatmul.f32.gmra.mxu0 %v1466_v44  ;;  %v1698_v44 = vld [vmem:[#allocation2 + $0xc2] sm:$0xff] }
 0x18d   : > { %v1297_v39 = vpop.f32.mrf.mxu2  ;;  %v3886_v14 = vadd.f32 %v1294_v1, %v1218_v15 }
 0x18e   : > { %v970_v23 = vpop.f32.mrf.mxu3 }
 0x18f   : > { %v971_v28 = vadd.f32 %v970_v23, %v3775_v33  ;;  %1651 = vmatmul.f32.gmra.mxu1 %v3468_v50 }
 0x191   : > { %v1104_v29 = vadd.f32 %v1068_v37, %v971_v28  ;;  %v1077_v49 = vpop.f32.mrf.mxu0 }
 0x192   : > { %1756 = vmatmul.f32.gmra.mxu2 %v3728_v4 }
 0x193   : > { %v1219_v9 = vadd.f32 %v3850_v53, %v1104_v29  ;;  %1413 = vmatmul.f32.gmra.mxu3 %v3675_v10 }
 0x194   : > { %v3893_v25 = vpop.f32.mrf.mxu1  ;;  %1534 = vmatmul.f32.gmra.mxu0 %v1467_v32 }
 0x195   : > { %v1300_v20 = vpop.f32.mrf.mxu2  ;;  %v3895_v52 = vadd.f32 %v1297_v39, %v1219_v9  ;;  %v1699_v9 = vld [vmem:[#allocation2 + $0xca] sm:$0xff] }
 0x196   : > { %v973_v18 = vpop.f32.mrf.mxu3 }
 0x197   : > { %v974_v33 = vadd.f32 %v973_v18, %v3796_v62  ;;  %1654 = vmatmul.f32.gmra.mxu1 %v3489_v3 }
 0x199   : > { %v1105_v50 = vadd.f32 %v1071_v13, %v974_v33  ;;  %v1080_v37 = vpop.f32.mrf.mxu0 }
 0x19a   : > { %1759 = vmatmul.f32.gmra.mxu2 %v3751_v24 }
 0x19b   : > { %v1220_v53 = vadd.f32 %v3861_v12, %v1105_v50  ;;  %1416 = vmatmul.f32.gmra.mxu3 %v3700_v26  ;;  %v1469_v12 = vld [vmem:[#allocation2 + $0xb0] sm:$0xff]  ;;  %v4163_v50 = vmax.f32 %v3388_v56, 0.0  ;;  %v4166_v56 = vld [vmem:[#allocation5_spill] sm:$0xff] }
 0x19c   : > { %v1201_v43 = vpop.f32.mrf.mxu1  ;;  %1537 = vmatmul.f32.gmra.mxu0 %v1468_v63 }
 0x19d   : > { %v1303_v10 = vpop.f32.mrf.mxu2  ;;  %v3902_v2 = vadd.f32 %v1300_v20, %v1220_v53 }
 0x19e   : > { %v976_v61 = vpop.f32.mrf.mxu3 }
 0x19f   : > { %v977_v57 = vadd.f32 %v976_v61, %v3809_v47  ;;  %1657 = vmatmul.f32.gmra.mxu1 %v3816_v31 }
 0x1a1   : > { %v1106_v3 = vadd.f32 %v1074_v30, %v977_v57  ;;  %v1083_v62 = vpop.f32.mrf.mxu0 }
 0x1a2   : > { %1762 = vmatmul.f32.gmra.mxu2 %v3779_v38 }
 0x1a3   : > { %v1221_v13 = vadd.f32 %v3868_v17, %v1106_v3  ;;  %1419 = vmatmul.f32.gmra.mxu3 %v3728_v4 }
 0x1a4   : > { %1540 = vmatmul.f32.gmra.mxu0 %v1469_v12  ;;  %v1204_v8 = vpop.f32.mrf.mxu1 }
 0x1a5   : > { %v1306_v26 = vpop.f32.mrf.mxu2  ;;  %v3909_v41 = vadd.f32 %v1303_v10, %v1221_v13  ;;  %v1701_v13 = vld [vmem:[#allocation2 + $0xe2] sm:$0xff] }
 0x1a6   : > { %v979_v1 = vpop.f32.mrf.mxu3 }
 0x1a7   : > { %v980_v19 = vadd.f32 %v979_v1, %v3822_v27  ;;  %1660 = vmatmul.f32.gmra.mxu1 %v3826_v7 }
 0x1a9   : > { %v1107_v47 = vadd.f32 %v1077_v49, %v980_v19  ;;  %v1086_v31 = vpop.f32.mrf.mxu0 }
 0x1aa   : > { %1765 = vmatmul.f32.gmra.mxu2 %v3798_v60 }
 0x1ab   : > { %v1222_v16 = vadd.f32 %v3878_v46, %v1107_v47  ;;  %1422 = vmatmul.f32.gmra.mxu3 %v3751_v24 }
 0x1ac   : > { %2335 = vmatmul.msk.f32.gmra.mxu0 %vm3331_vm14, %v3343_v54  ;;  %v1207_v7 = vpop.f32.mrf.mxu1  ;;  %v1587_v54 = vld [vmem:[#allocation2 + $0xe1] sm:$0xff] }
 0x1ad   : > { %v1309_v4 = vpop.f32.mrf.mxu2  ;;  %v3916_v17 = vadd.f32 %v1306_v26, %v1222_v16 }
 0x1ae   : > { %v982_v55 = vpop.f32.mrf.mxu3 }
 0x1af   : > { %v983_v27 = vadd.f32 %v982_v55, %v3832_v42  ;;  %1663 = vmatmul.f32.gmra.mxu1 %v1586_v22 }
 0x1b1   : > { %v1108_v30 = vadd.f32 %v1080_v37, %v983_v27  ;;  %v1089_v15 = vpop.f32.mrf.mxu0  ;;  %v4165_v37 = vld [vmem:[#allocation3_spill] sm:$0xff] }
 0x1b2   : > { %1768 = vmatmul.f32.gmra.mxu2 %v3811_v59 }
 0x1b3   : > { %v1223_v46 = vadd.f32 %v1195_v21, %v1108_v30  ;;  %1425 = vmatmul.f32.gmra.mxu3 %v3779_v38 }
 0x1b4   : > { %2336 = vmatmul.msk.f32.gmra.mxu0 %vm4158_vm4, %v3377_v48  ;;  %v1210_v28 = vpop.f32.mrf.mxu1 }
 0x1b5   : > { %v1312_v24 = vpop.f32.mrf.mxu2  ;;  %v3924_v39 = vadd.f32 %v1309_v4, %v1223_v46 }
 0x1b6   : > { %v985_v6 = vpop.f32.mrf.mxu3 }
 0x1b7   : > { %v986_v42 = vadd.f32 %v985_v6, %v3782_v40  ;;  %1666 = vmatmul.f32.gmra.mxu1 %v1587_v54 }
 0x1b9   : > { %v1109_v23 = vadd.f32 %v1083_v62, %v986_v42  ;;  %v1092_v29 = vpop.f32.mrf.mxu0 }
 0x1ba   : > { %1771 = vmatmul.f32.gmra.mxu2 %v1698_v44 }
 0x1bb   : > { %v1224_v21 = vadd.f32 %v3893_v25, %v1109_v23  ;;  %1428 = vmatmul.f32.gmra.mxu3 %v3798_v60 }
 0x1bc   : > { %2337 = vmatmul.msk.f32.gmra.mxu0 %vm3399_vm3, %v4162_v35  ;;  %v1622_v25 = vpop.f32.mrf.mxu1 }
 0x1bd   : > { %v1315_v38 = vpop.f32.mrf.mxu2  ;;  %v3932_v49 = vadd.f32 %v1312_v24, %v1224_v21 }
 0x1be   : > { %v988_v48 = vpop.f32.mrf.mxu3 }
 0x1bf   : > { %v989_v40 = vadd.f32 %v988_v48, %v3801_v36  ;;  %v1700_v36 = vld [vmem:[#allocation2 + $0xda] sm:$0xff] }
 0x1c1   : > { %v1110_v20 = vadd.f32 %v1086_v31, %v989_v40  ;;  %v1095_v32 = vpop.f32.mrf.mxu0  ;;  %v4167_v31 = vld [vmem:[#allocation6_spill] sm:$0xff] }
 0x1c2   : > { %1774 = vmatmul.f32.gmra.mxu2 %v1699_v9 }
 0x1c3   : > { %v1225_v18 = vadd.f32 %v1201_v43, %v1110_v20  ;;  %1431 = vmatmul.f32.gmra.mxu3 %v3811_v59 }
 0x1c4   : > { %2338 = vmatmul.msk.f32.gmra.mxu0 %vm3352_vm9, %v4163_v50  ;;  %v1625_v57 = vpop.f32.mrf.mxu1 }
 0x1c5   : > { %v1318_v60 = vpop.f32.mrf.mxu2  ;;  %v3940_v33 = vadd.f32 %v1315_v38, %v1225_v18 }
 0x1c6   : > { %v991_v11 = vpop.f32.mrf.mxu3 }
 0x1c7   : > { %v992_v53 = vadd.f32 %v991_v11, %v4165_v37 }
 0x1c9   : > { %v1111_v10 = vadd.f32 %v1089_v15, %v992_v53  ;;  %v1508_v63 = vpop.f32.mrf.mxu0 }
 0x1ca   : > { %1777 = vmatmul.f32.gmra.mxu2 %v1700_v36 }
 0x1cb   : > { %v1226_v43 = vadd.f32 %v1204_v8, %v1111_v10  ;;  %1434 = vmatmul.f32.gmra.mxu3 %v1698_v44  ;;  %v3962_v44 = vld [vmem:[%s4042_s6] ss:$0 sm:$0xff] }
 0x1cc   : > { %v1628_v4 = vpop.f32.mrf.mxu1 }
 0x1cd   : > { %v1321_v59 = vpop.f32.mrf.mxu2  ;;  %v3947_v61 = vadd.f32 %v1318_v60, %v1226_v43 }
 0x1ce   : > { %v994_v3 = vpop.f32.mrf.mxu3 }
 0x1cf   : > { %v995_v62 = vadd.f32 %v994_v3, %v4166_v56 }
 0x1d1   : > { %v1112_v26 = vadd.f32 %v1092_v29, %v995_v62  ;;  %v1511_v12 = vpop.f32.mrf.mxu0 }
 0x1d2   : > { %1780 = vmatmul.f32.gmra.mxu2 %v1701_v13 }
 0x1d3   : > { %v1227_v1 = vadd.f32 %v1207_v7, %v1112_v26  ;;  %1437 = vmatmul.f32.gmra.mxu3 %v1699_v9 }
 0x1d4   : > { %v1631_v6 = vpop.f32.mrf.mxu1 }
 0x1d5   : > { %v1324_v19 = vpop.f32.mrf.mxu2  ;;  %v3951_v47 = vadd.f32 %v1321_v59, %v1227_v1 }
 0x1d6   : > { %v997_v8 = vpop.f32.mrf.mxu3 }
 0x1d7   : > { %v998_v16 = vadd.f32 %v997_v8, %v4167_v31 }
 0x1d9   : > { %v1113_v55 = vadd.f32 %v1095_v32, %v998_v16  ;;  %v1514_v22 = vpop.f32.mrf.mxu0 }
 0x1db   : > { %v1228_v27 = vadd.f32 %v1210_v28, %v1113_v55 }
 0x1dc   : > { %v1634_v40 = vpop.f32.mrf.mxu1 }
 0x1dd   : > { %v1736_v30 = vpop.f32.mrf.mxu2  ;;  %v3956_v15 = vadd.f32 %v1324_v19, %v1228_v27 }
 0x1de   : > { %v1393_v46 = vpop.f32.mrf.mxu3 }
 0x1df   : > { %v1441_v7 = vadd.f32 %v1393_v46, %v3844_v34 }
 0x1e1   : > { %v1556_v24 = vadd.f32 %v1508_v63, %v1441_v7  ;;  %v1517_v54 = vpop.f32.mrf.mxu0 }
 0x1e3   : > { %v1670_v42 = vadd.f32 %v1622_v25, %v1556_v24 }
 0x1e4   : > { %v1637_v63 = vpop.f32.mrf.mxu1 }
 0x1e5   : > { %v1739_v23 = vpop.f32.mrf.mxu2  ;;  %v1784_v28 = vadd.f32 %v1736_v30, %v1670_v42 }
 0x1e6   : > { %v1396_v34 = vpop.f32.mrf.mxu3 }
 0x1e7   : > { %v1804_v29 = vadd.f32 %v3962_v44, %v1784_v28  ;;  %v1442_v21 = vadd.f32 %v1396_v34, %v3852_v0 }
 0x1e9   : > { %1820 = vst [vmem:[%s3967_s26] sm:$0xff] %v1804_v29  ;;  %v1557_v38 = vadd.f32 %v1511_v12, %v1442_v21  ;;  %v1520_v35 = vpop.f32.mrf.mxu0  ;;  %v1858_v60 = vmul.f32 %v1804_v29, %v1804_v29 }
 0x1eb   : > { %v1671_v48 = vadd.f32 %v1625_v57, %v1557_v38 }
 0x1ec   : > { %v1640_v16 = vpop.f32.mrf.mxu1 }
 0x1ed   : > { %v1742_v9 = vpop.f32.mrf.mxu2  ;;  %v1785_v20 = vadd.f32 %v1739_v23, %v1671_v48 }
 0x1ee   : > { %v1399_v32 = vpop.f32.mrf.mxu3 }
 0x1ef   : > { %v1805_v18 = vadd.f32 %v3962_v44, %v1785_v20  ;;  %v1443_v25 = vadd.f32 %v1399_v32, %v3863_v51 }
 0x1f1   : > { %1821 = vst [vmem:[%s3967_s26 + $0x8] sm:$0xff] %v1805_v18  ;;  %v1836_v50 = vadd.f32 %v1805_v18, %v1804_v29  ;;  %v1859_v58 = vmul.f32 %v1805_v18, %v1805_v18  ;;  %v1558_v11 = vadd.f32 %v1514_v22, %v1443_v25  ;;  %v1523_v36 = vpop.f32.mrf.mxu0 }
 0x1f3   : > { %v1874_v37 = vadd.f32 %v1859_v58, %v1858_v60  ;;  %v1672_v0 = vadd.f32 %v1628_v4, %v1558_v11 }
 0x1f4   : > { %v1643_v28 = vpop.f32.mrf.mxu1 }
 0x1f5   : > { %v1745_v53 = vpop.f32.mrf.mxu2  ;;  %v1786_v10 = vadd.f32 %v1742_v9, %v1672_v0 }
 0x1f6   : > { %v1402_v43 = vpop.f32.mrf.mxu3 }
 0x1f7   : > { %v1806_v59 = vadd.f32 %v3962_v44, %v1786_v10  ;;  %v1444_v57 = vadd.f32 %v1402_v43, %v3870_v45 }
 0x1f9   : > { %1822 = vst [vmem:[%s3967_s26 + $0x10] sm:$0xff] %v1806_v59  ;;  %v1837_v3 = vadd.f32 %v1836_v50, %v1806_v59  ;;  %v1860_v51 = vmul.f32 %v1806_v59, %v1806_v59  ;;  %v1559_v56 = vadd.f32 %v1517_v54, %v1444_v57  ;;  %v1526_v19 = vpop.f32.mrf.mxu0 }
 0x1fb   : > { %v1875_v62 = vadd.f32 %v1874_v37, %v1860_v51  ;;  %v1673_v13 = vadd.f32 %v1631_v6, %v1559_v56 }
 0x1fc   : > { %v1646_v60 = vpop.f32.mrf.mxu1 }
 0x1fd   : > { %v1748_v26 = vpop.f32.mrf.mxu2  ;;  %v1787_v12 = vadd.f32 %v1745_v53, %v1673_v13 }
 0x1fe   : > { %v1405_v1 = vpop.f32.mrf.mxu3 }
 0x1ff   : > { %v1807_v8 = vadd.f32 %v3962_v44, %v1787_v12  ;;  %v1445_v31 = vadd.f32 %v1405_v1, %v3880_v5 }
 0x201   : > { %1823 = vst [vmem:[%s3967_s26 + $0x18] sm:$0xff] %v1807_v8  ;;  %v1838_v4 = vadd.f32 %v1837_v3, %v1807_v8  ;;  %v1861_v55 = vmul.f32 %v1807_v8, %v1807_v8  ;;  %v1560_v45 = vadd.f32 %v1520_v35, %v1445_v31  ;;  %v1529_v54 = vpop.f32.mrf.mxu0 }
 0x203   : > { %v1876_v22 = vadd.f32 %v1875_v62, %v1861_v55  ;;  %v1674_v27 = vadd.f32 %v1634_v40, %v1560_v45 }
 0x204   : > { %v1649_v3 = vpop.f32.mrf.mxu1 }
 0x205   : > { %v1751_v30 = vpop.f32.mrf.mxu2  ;;  %v1788_v46 = vadd.f32 %v1748_v26, %v1674_v27 }
 0x206   : > { %v1408_v7 = vpop.f32.mrf.mxu3 }
 0x207   : > { %v1808_v24 = vadd.f32 %v3962_v44, %v1788_v46  ;;  %v1446_v6 = vadd.f32 %v1408_v7, %v3886_v14 }
 0x209   : > { %1824 = vst [vmem:[%s3967_s26 + $0x20] sm:$0xff] %v1808_v24  ;;  %v1839_v42 = vadd.f32 %v1838_v4, %v1808_v24  ;;  %v1862_v23 = vmul.f32 %v1808_v24, %v1808_v24  ;;  %v1561_v5 = vadd.f32 %v1523_v36, %v1446_v6  ;;  %v1532_v32 = vpop.f32.mrf.mxu0 }
 0x20b   : > { %v1877_v34 = vadd.f32 %v1876_v22, %v1862_v23  ;;  %v1675_v29 = vadd.f32 %v1637_v63, %v1561_v5 }
 0x20c   : > { %v1652_v45 = vpop.f32.mrf.mxu1 }
 0x20d   : > { %v1754_v21 = vpop.f32.mrf.mxu2  ;;  %v1789_v38 = vadd.f32 %v1751_v30, %v1675_v29 }
 0x20e   : > { %v1411_v35 = vpop.f32.mrf.mxu3 }
 0x20f   : > { %v1809_v48 = vadd.f32 %v3962_v44, %v1789_v38  ;;  %v1447_v40 = vadd.f32 %v1411_v35, %v3895_v52 }
 0x211   : > { %1825 = vst [vmem:[%s3967_s26 + $0x28] sm:$0xff] %v1809_v48  ;;  %v1840_v9 = vadd.f32 %v1839_v42, %v1809_v48  ;;  %v1863_v20 = vmul.f32 %v1809_v48, %v1809_v48  ;;  %v1562_v14 = vadd.f32 %v1526_v19, %v1447_v40  ;;  %v1535_v43 = vpop.f32.mrf.mxu0 }
 0x213   : > { %v1878_v18 = vadd.f32 %v1877_v34, %v1863_v20  ;;  %v1676_v25 = vadd.f32 %v1640_v16, %v1562_v14 }
 0x214   : > { %v1655_v34 = vpop.f32.mrf.mxu1 }
 0x215   : > { %v1757_v50 = vpop.f32.mrf.mxu2  ;;  %v1790_v58 = vadd.f32 %v1754_v21, %v1676_v25 }
 0x216   : > { %v1414_v11 = vpop.f32.mrf.mxu3 }
 0x217   : > { %v1810_v37 = vadd.f32 %v3962_v44, %v1790_v58  ;;  %v1448_v0 = vadd.f32 %v1414_v11, %v3902_v2 }
 0x219   : > { %1826 = vst [vmem:[%s3967_s26 + $0x30] sm:$0xff] %v1810_v37  ;;  %v1841_v53 = vadd.f32 %v1840_v9, %v1810_v37  ;;  %v1864_v36 = vmul.f32 %v1810_v37, %v1810_v37  ;;  %v1563_v52 = vadd.f32 %v1529_v54, %v1448_v0  ;;  %v1538_v31 = vpop.f32.mrf.mxu0 }
 0x21b   : > { %v1879_v10 = vadd.f32 %v1878_v18, %v1864_v36  ;;  %v1677_v63 = vadd.f32 %v1643_v28, %v1563_v52 }
 0x21d   : > { %v1760_v59 = vpop.f32.mrf.mxu2  ;;  %v1791_v57 = vadd.f32 %v1757_v50, %v1677_v63 }
 0x21e   : > { %v1417_v51 = vpop.f32.mrf.mxu3 }
 0x21f   : > { %v1811_v56 = vadd.f32 %v3962_v44, %v1791_v57  ;;  %v1449_v62 = vadd.f32 %v1417_v51, %v3909_v41 }
 0x221   : > { %1827 = vst [vmem:[%s3967_s26 + $0x38] sm:$0xff] %v1811_v56  ;;  %v1842_v13 = vadd.f32 %v1841_v53, %v1811_v56  ;;  %v1865_v26 = vmul.f32 %v1811_v56, %v1811_v56  ;;  %v1564_v2 = vadd.f32 %v1532_v32, %v1449_v62  ;;  %v1541_v23 = vpop.f32.mrf.mxu0 }
 0x223   : > { %v1880_v12 = vadd.f32 %v1879_v10, %v1865_v26  ;;  %v1678_v1 = vadd.f32 %v1646_v60, %v1564_v2  ;;  %v1658_v60 = vpop.f32.mrf.mxu1 }
 0x225   : > { %v1763_v19 = vpop.f32.mrf.mxu2  ;;  %v1792_v8 = vadd.f32 %v1760_v59, %v1678_v1 }
 0x226   : > { %v1420_v16 = vpop.f32.mrf.mxu3 }
 0x227   : > { %v1812_v4 = vadd.f32 %v3962_v44, %v1792_v8  ;;  %v1450_v55 = vadd.f32 %v1420_v16, %v3916_v17 }
 0x229   : > { %1828 = vst [vmem:[%s3967_s26 + $0x40] sm:$0xff] %v1812_v4  ;;  %v1843_v22 = vadd.f32 %v1842_v13, %v1812_v4  ;;  %v1866_v27 = vmul.f32 %v1812_v4, %v1812_v4  ;;  %v1565_v41 = vadd.f32 %v1535_v43, %v1450_v55  ;;  %v1544_v32 = vpop.f32.mrf.mxu0 }
 0x22b   : > { %v1881_v30 = vadd.f32 %v1880_v12, %v1866_v27  ;;  %v1679_v46 = vadd.f32 %v1649_v3, %v1565_v41  ;;  %v1661_v59 = vpop.f32.mrf.mxu1 }
 0x22d   : > { %v1766_v7 = vpop.f32.mrf.mxu2  ;;  %v1793_v24 = vadd.f32 %v1763_v19, %v1679_v46 }
 0x22e   : > { %v1423_v6 = vpop.f32.mrf.mxu3 }
 0x22f   : > { %v1813_v54 = vadd.f32 %v3962_v44, %v1793_v24  ;;  %v1451_v42 = vadd.f32 %v1423_v6, %v3924_v39 }
 0x231   : > { %1829 = vst [vmem:[%s3967_s26 + $0x48] sm:$0xff] %v1813_v54  ;;  %v1844_v5 = vadd.f32 %v1843_v22, %v1813_v54  ;;  %v1867_v28 = vmul.f32 %v1813_v54, %v1813_v54  ;;  %v1566_v17 = vadd.f32 %v1538_v31, %v1451_v42  ;;  %v1547_v63 = vpop.f32.mrf.mxu0 }
 0x233   : > { %v1882_v29 = vadd.f32 %v1881_v30, %v1867_v28  ;;  %v1680_v21 = vadd.f32 %v1652_v45, %v1566_v17  ;;  %v1664_v16 = vpop.f32.mrf.mxu1 }
 0x235   : > { %v1769_v38 = vpop.f32.mrf.mxu2  ;;  %v1794_v35 = vadd.f32 %v1766_v7, %v1680_v21 }
 0x236   : > { %v1426_v48 = vpop.f32.mrf.mxu3 }
 0x237   : > { %v1814_v40 = vadd.f32 %v3962_v44, %v1794_v35  ;;  %v1452_v9 = vadd.f32 %v1426_v48, %v3932_v49 }
 0x239   : > { %1830 = vst [vmem:[%s3967_s26 + $0x50] sm:$0xff] %v1814_v40  ;;  %v1845_v20 = vadd.f32 %v1844_v5, %v1814_v40  ;;  %v1868_v14 = vmul.f32 %v1814_v40, %v1814_v40  ;;  %v1567_v39 = vadd.f32 %v1541_v23, %v1452_v9  ;;  %v1550_v1 = vpop.f32.mrf.mxu0 }
 0x23b   : > { %v1883_v18 = vadd.f32 %v1882_v29, %v1868_v14  ;;  %v1681_v25 = vadd.f32 %v1655_v34, %v1567_v39  ;;  %v1667_v42 = vpop.f32.mrf.mxu1 }
 0x23d   : > { %v1795_v50 = vadd.f32 %v1769_v38, %v1681_v25  ;;  %v1772_v11 = vpop.f32.mrf.mxu2 }
 0x23e   : > { %v1429_v58 = vpop.f32.mrf.mxu3 }
 0x23f   : > { %v1815_v37 = vadd.f32 %v3962_v44, %v1795_v50  ;;  %v1453_v0 = vadd.f32 %v1429_v58, %v3940_v33 }
 0x241   : > { %1831 = vst [vmem:[%s3967_s26 + $0x58] sm:$0xff] %v1815_v37  ;;  %v1846_v53 = vadd.f32 %v1845_v20, %v1815_v37  ;;  %v1869_v36 = vmul.f32 %v1815_v37, %v1815_v37  ;;  %v1568_v49 = vadd.f32 %v1544_v32, %v1453_v0  ;;  %v1553_v24 = vpop.f32.mrf.mxu0 }
 0x243   : > { %v1884_v52 = vadd.f32 %v1883_v18, %v1869_v36  ;;  %v1682_v10 = vadd.f32 %v1658_v60, %v1568_v49 }
 0x245   : > { %v1796_v43 = vadd.f32 %v1772_v11, %v1682_v10  ;;  %v1775_v56 = vpop.f32.mrf.mxu2 }
 0x246   : > { %v1432_v57 = vpop.f32.mrf.mxu3 }
 0x247   : > { %v1816_v3 = vadd.f32 %v3962_v44, %v1796_v43  ;;  %v1454_v51 = vadd.f32 %v1432_v57, %v3947_v61 }
 0x249   : > { %1832 = vst [vmem:[%s3967_s26 + $0x60] sm:$0xff] %v1816_v3  ;;  %v1847_v62 = vadd.f32 %v1846_v53, %v1816_v3  ;;  %v1870_v13 = vmul.f32 %v1816_v3, %v1816_v3  ;;  %v1569_v33 = vadd.f32 %v1547_v63, %v1454_v51 }
 0x24b   : > { %v1885_v26 = vadd.f32 %v1884_v52, %v1870_v13  ;;  %v1683_v2 = vadd.f32 %v1661_v59, %v1569_v33 }
 0x24d   : > { %v1797_v12 = vadd.f32 %v1775_v56, %v1683_v2  ;;  %v1778_v45 = vpop.f32.mrf.mxu2 }
 0x24e   : > { %v1435_v19 = vpop.f32.mrf.mxu3 }
 0x24f   : > { %v1817_v8 = vadd.f32 %v3962_v44, %v1797_v12  ;;  %v1455_v31 = vadd.f32 %v1435_v19, %v3951_v47 }
 0x251   : > { %1833 = vst [vmem:[%s3967_s26 + $0x68] sm:$0xff] %v1817_v8  ;;  %v1848_v4 = vadd.f32 %v1847_v62, %v1817_v8  ;;  %v1871_v55 = vmul.f32 %v1817_v8, %v1817_v8  ;;  %v1570_v61 = vadd.f32 %v1550_v1, %v1455_v31 }
 0x253   : > { %v1886_v22 = vadd.f32 %v1885_v26, %v1871_v55  ;;  %v1684_v27 = vadd.f32 %v1664_v16, %v1570_v61 }
 0x255   : > { %v1798_v41 = vadd.f32 %v1778_v45, %v1684_v27  ;;  %v1781_v28 = vpop.f32.mrf.mxu2 }
 0x256   : > { %v1438_v30 = vpop.f32.mrf.mxu3 }
 0x257   : > { %v1818_v46 = vadd.f32 %v3962_v44, %v1798_v41  ;;  %v1456_v7 = vadd.f32 %v1438_v30, %v3956_v15 }
 0x259   : > { %1834 = vst [vmem:[%s3967_s26 + $0x70] sm:$0xff] %v1818_v46  ;;  %v1849_v6 = vadd.f32 %v1848_v4, %v1818_v46  ;;  %v1872_v47 = vmul.f32 %v1818_v46, %v1818_v46  ;;  %v1571_v54 = vadd.f32 %v1553_v24, %v1456_v7 }
 0x25b   : > { %v1887_v23 = vadd.f32 %v1886_v22, %v1872_v47  ;;  %v1685_v5 = vadd.f32 %v1667_v42, %v1571_v54 }
 0x25d   : > { %v1799_v17 = vadd.f32 %v1781_v28, %v1685_v5 }
 0x25f   : > { %v1819_v34 = vadd.f32 %v3962_v44, %v1799_v17 }
 0x261   : > { %1835 = vst [vmem:[%s3967_s26 + $0x78] sm:$0xff] %v1819_v34  ;;  %v1850_v29 = vadd.f32 %v1849_v6, %v1819_v34  ;;  %v1873_v21 = vmul.f32 %v1819_v34, %v1819_v34 }
 0x263   : > { %v1851_v38 = vrot.slane %v1850_v29, 4  ;;  %v1888_v35 = vadd.f32 %v1887_v23, %v1873_v21 }
 0x265   : > { %v1852_v15 = vadd.f32 %v1851_v38, %v1850_v29  ;;  %v1889_v48 = vrot.slane %v1888_v35, 4 }
 0x267   : > { %v1853_v40 = vrot.slane %v1852_v15, 2  ;;  %v1890_v9 = vadd.f32 %v1889_v48, %v1888_v35 }
 0x269   : > { %v1854_v20 = vadd.f32 %v1853_v40, %v1852_v15  ;;  %v1891_v14 = vrot.slane %v1890_v9, 2 }
 0x26b   : > { %v1855_v39 = vrot.slane %v1854_v20, 1  ;;  %v1892_v32 = vadd.f32 %v1891_v14, %v1890_v9 }
 0x26d   : > { %v1856_v44 = vadd.f32 %v1855_v39, %v1854_v20  ;;  %v1893_v18 = vrot.slane %v1892_v32, 1 }
 0x26f   : > { %1857 = vst [vmem:[%s379_s16] sm:$0x1] %v1856_v44  ;;  %v1894_v25 = vadd.f32 %v1893_v18, %v1892_v32 }
 0x271   : > { %1895 = vst [vmem:[%s379_s16 + $0x1] sm:$0x1] %v1894_v25 }
 0x272 PF: > { %s19_s9 = sadd.s32 1, %s2377_s9   ;;  %s4168_s27 = smov %s2369_s29 }
 0x273   : > { %p16_p8 = scmp.ge.s32.totalorder %s19_s9, 6   ;;  %s4169_s28 = smov %s2373_s30 }
 0x274   : > { %s4170_s29 = smov %s4173_s10  ;;  %s4171_s30 = smov %s4177_s11 }
 0x275   :  { %18 = sbr.rel (!%p16_p8) target bundleno = 3 (0x3), region = 103 }

</bundles_post_ra>
